<compile_context>
chip_gen: v6e
topology: v6e:2x2x1
jax: 0.10.0
libtpu: 0.0.40
codegen_flags: <defaults>
</compile_context>

<pallas_src>
import functools
import math

import jax
import jax.numpy as jnp
from jax.experimental import pallas as pl
from jax.experimental.pallas import tpu as pltpu

_PARAMS_PER_BLOCK = 26


# --------------------------------------------------------------------------
# Kernel: one decoder layer per grid step; grid = (batch_chunks, n_blocks).
# --------------------------------------------------------------------------
def decoder_layer_kernel(x_ref, ctx_ref, *rest,
                         n_heads, d_k, d_v,
                         has_dec_mask, has_enc_mask, compute_dtype):
    idx = 0
    dmask_ref = emask_ref = None
    if has_dec_mask:
        dmask_ref = rest[idx]; idx += 1
    if has_enc_mask:
        emask_ref = rest[idx]; idx += 1
    w_refs = rest[idx:-2]
    o_ref = rest[-2]
    h_acc = rest[-1]                      # VMEM scratch: f32 residual carry

    (wq1, bq1, wk1, bk1, wv1, bv1, wo1, bo1, g1, be1,
     wq2, bq2, wk2, bk2, wv2, bv2, wo2, bo2, g2, be2,
     w1f, b1f, w2f, b2f, g3, be3) = w_refs

    l = pl.program_id(1)
    Bt, Sd, D = x_ref.shape
    Se = ctx_ref.shape[1]
    H, dk, dv = n_heads, d_k, d_v
    cdt = compute_dtype                   # dtype fed to the MXU (bf16/f32)

    # Initialise the residual carry from the input on the first layer step.
    @pl.when(l == 0)
    def _():
        h_acc[...] = x_ref[...].astype(jnp.float32)

    # Causal mask generated on-chip: no HBM traffic for the default path.
    row = jax.lax.broadcasted_iota(jnp.int32, (Bt, Sd, Sd), 1)
    col = jax.lax.broadcasted_iota(jnp.int32, (Bt, Sd, Sd), 2)
    self_mask = row >= col
    if has_dec_mask:
        self_mask = jnp.logical_and(self_mask, dmask_ref[...] > 0)
    cross_mask = None
    if has_enc_mask:
        cross_mask = jnp.broadcast_to(emask_ref[...] > 0, (Bt, Sd, Se))

    def layer_norm(a, g_ref, b_ref, eps=1e-5):
        mu = jnp.mean(a, axis=-1, keepdims=True)
        var = jnp.mean(jnp.square(a - mu), axis=-1, keepdims=True)
        return (a - mu) * jax.lax.rsqrt(var + eps) * g_ref[0] + b_ref[0]

    def softmax_last(s):
        # scores stay f32; divide via approx EUP reciprocal + one Newton step.
        m = jnp.max(s, axis=-1, keepdims=True)
        p = jnp.exp(s - m)
        denom = jnp.sum(p, axis=-1, keepdims=True)
        r = pl.reciprocal(denom, approx=True)
        r = r * (2.0 - denom * r)
        return p * r

    def mha(q2d, kv2d, Sq, Sk, wq, bq, wk, bk, wv, bv, wo, bo, mask):
        # q2d: (Bt*Sq, D) f32   kv2d: (Bt*Sk, D)
        # Lane-dense fused projections (1/sqrt(d_k) already folded into wq/bq).
        q = jnp.dot(q2d.astype(cdt), wq[0],
                    preferred_element_type=jnp.float32) + bq[0]
        k = jnp.dot(kv2d.astype(cdt), wk[0],
                    preferred_element_type=jnp.float32) + bk[0]
        v = jnp.dot(kv2d.astype(cdt), wv[0],
                    preferred_element_type=jnp.float32) + bv[0]
        q3 = q.reshape(Bt, Sq, H * dk)
        k3 = k.reshape(Bt, Sk, H * dk)
        v3 = v.reshape(Bt, Sk, H * dv)

        head_out = []
        for h in range(H):                         # static unroll over heads
            qh = q3[:, :, h * dk:(h + 1) * dk].astype(cdt)
            kh = k3[:, :, h * dk:(h + 1) * dk].astype(cdt)
            vh = v3[:, :, h * dv:(h + 1) * dv].astype(cdt)
            s = jnp.einsum('bqd,bkd->bqk', qh, kh,
                           preferred_element_type=jnp.float32)
            if mask is not None:
                s = jnp.where(mask, s, jnp.float32(-1e30))
            p = softmax_last(s)
            head_out.append(jnp.einsum('bqk,bkd->bqd', p.astype(cdt), vh,
                                       preferred_element_type=jnp.float32))

        # Concatenate heads on the lane axis -> single output projection with
        # contraction depth K = H*d_v.
        o_cat = jnp.concatenate(head_out, axis=-1).reshape(Bt * Sq, H * dv)
        return jnp.dot(o_cat.astype(cdt), wo[0],
                       preferred_element_type=jnp.float32) + bo[0]

    # Row-batched activations: (Bt*Sd, D) f32 residual stream.
    h2 = h_acc[...].reshape(Bt * Sd, D)
    ctx2 = ctx_ref[...].reshape(Bt * Se, D)

    # 1) masked self-attention + residual + LN
    a1 = mha(h2, h2, Sd, Sd, wq1, bq1, wk1, bk1, wv1, bv1, wo1, bo1, self_mask)
    h2 = layer_norm(a1 + h2, g1, be1)

    # 2) cross-attention (K, V from encoder context) + residual + LN
    a2 = mha(h2, ctx2, Sd, Se, wq2, bq2, wk2, bk2, wv2, bv2, wo2, bo2, cross_mask)
    h2 = layer_norm(a2 + h2, g2, be2)

    # 3) position-wise FFN + residual + LN
    f1 = jnp.maximum(
        jnp.dot(h2.astype(cdt), w1f[0], preferred_element_type=jnp.float32)
        + b1f[0], 0.0)
    f2 = jnp.dot(f1.astype(cdt), w2f[0],
                 preferred_element_type=jnp.float32) + b2f[0]
    h2 = layer_norm(f2 + h2, g3, be3)

    h_new = h2.reshape(Bt, Sd, D)
    h_acc[...] = h_new

    @pl.when(l == pl.num_programs(1) - 1)
    def _():
        o_ref[...] = h_new.astype(o_ref.dtype)


# --------------------------------------------------------------------------
# Parameter prep: fold 1/sqrt(d_k) into Wq/bq, cast MXU weights to bf16.
# --------------------------------------------------------------------------
def _prep_block_params(p, *, d_k, compute_dtype):
    (wq1, bq1, wk1, bk1, wv1, bv1, wo1, bo1, g1, be1,
     wq2, bq2, wk2, bk2, wv2, bv2, wo2, bo2, g2, be2,
     w1f, b1f, w2f, b2f, g3, be3) = p
    s = 1.0 / math.sqrt(d_k)
    cd = compute_dtype
    f32 = jnp.float32
    return ((wq1 * s).astype(cd), (bq1 * s).astype(f32),
            wk1.astype(cd), bk1.astype(f32),
            wv1.astype(cd), bv1.astype(f32),
            wo1.astype(cd), bo1.astype(f32),
            g1.astype(f32), be1.astype(f32),
            (wq2 * s).astype(cd), (bq2 * s).astype(f32),
            wk2.astype(cd), bk2.astype(f32),
            wv2.astype(cd), bv2.astype(f32),
            wo2.astype(cd), bo2.astype(f32),
            g2.astype(f32), be2.astype(f32),
            w1f.astype(cd), b1f.astype(f32),
            w2f.astype(cd), b2f.astype(f32),
            g3.astype(f32), be3.astype(f32))


# --------------------------------------------------------------------------
# Wrapper: ONE pallas_call, grid = (batch_chunks, n_blocks).
# --------------------------------------------------------------------------
def decoder_forward(params_list, inputs, context,
                    decoder_mask=None, encoder_mask=None,
                    *, n_heads, d_k, d_v,
                    compute_dtype=jnp.bfloat16, block_b=None):
    B, Sd, D = inputs.shape
    Se = context.shape[1]
    n_blocks = len(params_list)

    # Row batching: pick the smallest batch block giving >=128 MXU rows,
    # else the whole batch.  TODO(synk): on v7x keep the batch grid a
    # multiple of 2 so both TensorCores get work.
    if block_b is None:
        block_b = B
        for cand in range(1, B + 1):
            if B % cand == 0 and cand * Sd >= 128:
                block_b = cand
                break
    assert B % block_b == 0

    # Stack each parameter across layers (leading n_blocks axis) so the layer
    # grid axis streams layer l+1 weights while layer l computes.
    prepped = [_prep_block_params(p, d_k=d_k, compute_dtype=compute_dtype)
               for p in params_list]
    stacked = [jnp.stack([blk[i] for blk in prepped], axis=0)
               for i in range(_PARAMS_PER_BLOCK)]

    extra_inputs, extra_specs = [], []
    if decoder_mask is not None:
        # TODO(synk): pass masks as int8 to cut mask DMA bytes 4x.
        extra_inputs.append(decoder_mask.astype(jnp.float32))
        extra_specs.append(pl.BlockSpec((block_b, Sd, Sd),
                                        lambda b, l: (b, 0, 0)))
    if encoder_mask is not None:
        # TODO(synk): reference applies a (B, Se, Se) encoder padding mask to
        # (B, H, Sd, Se) cross-attention scores; we take the key-padding row
        # and broadcast it over decoder queries inside the kernel.
        extra_inputs.append(encoder_mask[:, :1, :].astype(jnp.float32))
        extra_specs.append(pl.BlockSpec((block_b, 1, Se),
                                        lambda b, l: (b, 0, 0)))

    def _layer_spec(shape):
        rest = tuple(shape[1:])
        zeros = (0,) * len(rest)
        return pl.BlockSpec((1,) + rest, lambda b, l, _z=zeros: (l,) + _z)

    in_specs = ([pl.BlockSpec((block_b, Sd, D), lambda b, l: (b, 0, 0)),
                 pl.BlockSpec((block_b, Se, D), lambda b, l: (b, 0, 0))]
                + extra_specs
                + [_layer_spec(w.shape) for w in stacked])

    kernel = functools.partial(
        decoder_layer_kernel,
        n_heads=n_heads, d_k=d_k, d_v=d_v,
        has_dec_mask=decoder_mask is not None,
        has_enc_mask=encoder_mask is not None,
        compute_dtype=compute_dtype)

    return pl.pallas_call(
        kernel,
        out_shape=jax.ShapeDtypeStruct((B, Sd, D), inputs.dtype),
        grid=(B // block_b, n_blocks),
        in_specs=in_specs,
        out_specs=pl.BlockSpec((block_b, Sd, D), lambda b, l: (b, 0, 0)),
        scratch_shapes=[pltpu.VMEM((block_b, Sd, D), jnp.float32)],
        compiler_params=pltpu.CompilerParams(
            dimension_semantics=("parallel", "arbitrary"),
            vmem_limit_bytes=48 * 1024 * 1024),
    )(inputs, context, *extra_inputs, *stacked)


# --------------------------------------------------------------------------
# Deterministic parameter init (shapes from DecoderBlock's __init__).
# --------------------------------------------------------------------------
def init_block_params(key, d_model, d_k, d_v, n_heads, d_ff):
    ks = jax.random.split(key, 10)

    def lin(k, fan_in, fan_out):
        s = 1.0 / math.sqrt(fan_in)
        w = jax.random.uniform(k, (fan_in, fan_out), jnp.float32, -s, s)
        b = jnp.zeros((1, fan_out), jnp.float32)
        return w, b

    wq1, bq1 = lin(ks[0], d_model, n_heads * d_k)
    wk1, bk1 = lin(ks[1], d_model, n_heads * d_k)
    wv1, bv1 = lin(ks[2], d_model, n_heads * d_v)
    wo1, bo1 = lin(ks[3], n_heads * d_v, d_model)
    g1, be1 = jnp.ones((1, d_model), jnp.float32), jnp.zeros((1, d_model), jnp.float32)

    wq2, bq2 = lin(ks[4], d_model, n_heads * d_k)
    wk2, bk2 = lin(ks[5], d_model, n_heads * d_k)
    wv2, bv2 = lin(ks[6], d_model, n_heads * d_v)
    wo2, bo2 = lin(ks[7], n_heads * d_v, d_model)
    g2, be2 = jnp.ones((1, d_model), jnp.float32), jnp.zeros((1, d_model), jnp.float32)

    w1f, b1f = lin(ks[8], d_model, d_ff)
    w2f, b2f = lin(ks[9], d_ff, d_model)
    g3, be3 = jnp.ones((1, d_model), jnp.float32), jnp.zeros((1, d_model), jnp.float32)

    return (wq1, bq1, wk1, bk1, wv1, bv1, wo1, bo1, g1, be1,
            wq2, bq2, wk2, bk2, wv2, bv2, wo2, bo2, g2, be2,
            w1f, b1f, w2f, b2f, g3, be3)


# --------------------------------------------------------------------------
# Pure-JAX reference (same math, f32) for correctness checks.
# --------------------------------------------------------------------------
def _ref_block(x, ctx, smask, cmask, params, n_heads, d_k, d_v):
    (wq1, bq1, wk1, bk1, wv1, bv1, wo1, bo1, g1, be1,
     wq2, bq2, wk2, bk2, wv2, bv2, wo2, bo2, g2, be2,
     w1f, b1f, w2f, b2f, g3, be3) = params

    def ln(a, g, b, eps=1e-5):
        mu = a.mean(-1, keepdims=True)
        var = ((a - mu) ** 2).mean(-1, keepdims=True)
        return (a - mu) / jnp.sqrt(var + eps) * g + b

    def mha(qi, kvi, wq, bq, wk, bk, wv, bv, wo, bo, mask):
        B, Sq, _ = qi.shape
        Sk = kvi.shape[1]
        q = (qi @ wq + bq).reshape(B, Sq, n_heads, d_k).transpose(0, 2, 1, 3)
        k = (kvi @ wk + bk).reshape(B, Sk, n_heads, d_k).transpose(0, 2, 1, 3)
        v = (kvi @ wv + bv).reshape(B, Sk, n_heads, d_v).transpose(0, 2, 1, 3)
        s = jnp.einsum("bhqd,bhkd->bhqk", q, k) / math.sqrt(d_k)
        s = jnp.where(mask[:, None] > 0, s, -1e30)
        p = jax.nn.softmax(s, axis=-1)
        o = jnp.einsum("bhqk,bhkd->bhqd", p, v).transpose(0, 2, 1, 3)
        return o.reshape(B, Sq, n_heads * d_v) @ wo + bo

    h1 = ln(mha(x, x, wq1, bq1, wk1, bk1, wv1, bv1, wo1, bo1, smask) + x, g1, be1)
    h2 = ln(mha(h1, ctx, wq2, bq2, wk2, bk2, wv2, bv2, wo2, bo2, cmask) + h1, g2, be2)
    ff = jax.nn.relu(h2 @ w1f + b1f) @ w2f + b2f
    return ln(ff + h2, g3, be3)


def decoder_forward_ref(params_list, inputs, context, n_heads, d_k, d_v):
    B, Sd, _ = inputs.shape
    Se = context.shape[1]
    causal = jnp.broadcast_to(jnp.tril(jnp.ones((Sd, Sd), jnp.float32)), (B, Sd, Sd))
    cross = jnp.ones((B, Sd, Se), jnp.float32)
    out = inputs
    for p in params_list:
        out = _ref_block(out, context, causal, cross, p, n_heads, d_k, d_v)
    return out


# --------------------------------------------------------------------------
if __name__ == "__main__":
    # Lane-dense small sizes: d_model = n_heads*d_k = 128, d_ff = 256.
    d_model, d_k, d_v, n_heads, d_ff, n_blocks = 128, 64, 64, 2, 256, 2
    B, Sd, Se = 2, 8, 16

    key = jax.random.PRNGKey(0)
    k_in, k_ctx, *k_blocks = jax.random.split(key, 2 + n_blocks)
    inputs = jax.random.normal(k_in, (B, Sd, d_model), jnp.float32)
    context = jax.random.normal(k_ctx, (B, Se, d_model), jnp.float32)
    params_list = [init_block_params(k, d_model, d_k, d_v, n_heads, d_ff)
                   for k in k_blocks]

    ref = decoder_forward_ref(params_list, inputs, context, n_heads, d_k, d_v)

    # Tight correctness check with f32 MXU inputs.
    out_f32 = decoder_forward(params_list, inputs, context,
                              decoder_mask=None, encoder_mask=None,
                              n_heads=n_heads, d_k=d_k, d_v=d_v,
                              compute_dtype=jnp.float32)
    out_f32 = jax.block_until_ready(out_f32)
    assert out_f32.shape == (B, Sd, d_model)
    err = float(jnp.max(jnp.abs(out_f32 - ref)))
    assert jnp.allclose(out_f32, ref, atol=2e-3, rtol=2e-3), err

    # bf16 MXU inputs (v6e/v7x fast path): loose sanity check (accumulation
    # and residual/LN/softmax stats stay f32; math verified by the f32 run).
    out_bf16 = decoder_forward(params_list, inputs, context,
                               decoder_mask=None, encoder_mask=None,
                               n_heads=n_heads, d_k=d_k, d_v=d_v,
                               compute_dtype=jnp.bfloat16)
    out_bf16 = jax.block_until_ready(out_bf16)
    err_bf = float(jnp.max(jnp.abs(out_bf16.astype(jnp.float32) - ref)))
    assert jnp.allclose(out_bf16.astype(jnp.float32), ref,
                        atol=1e-1, rtol=1e-1), err_bf

    print("KERNEL_OK")
</pallas_src>

<mosaic_0001>
module attributes {stable_mosaic.version = 11 : i64} {
  func.func @decoder_layer_kernel(%arg0: i32, %arg1: i32, %arg2: memref<2x8x128xf32, #tpu.memory_space<vmem>>, %arg3: memref<2x16x128xf32, #tpu.memory_space<vmem>>, %arg4: memref<1x128x128xf32, #tpu.memory_space<vmem>>, %arg5: memref<1x1x128xf32, #tpu.memory_space<vmem>>, %arg6: memref<1x128x128xf32, #tpu.memory_space<vmem>>, %arg7: memref<1x1x128xf32, #tpu.memory_space<vmem>>, %arg8: memref<1x128x128xf32, #tpu.memory_space<vmem>>, %arg9: memref<1x1x128xf32, #tpu.memory_space<vmem>>, %arg10: memref<1x128x128xf32, #tpu.memory_space<vmem>>, %arg11: memref<1x1x128xf32, #tpu.memory_space<vmem>>, %arg12: memref<1x1x128xf32, #tpu.memory_space<vmem>>, %arg13: memref<1x1x128xf32, #tpu.memory_space<vmem>>, %arg14: memref<1x128x128xf32, #tpu.memory_space<vmem>>, %arg15: memref<1x1x128xf32, #tpu.memory_space<vmem>>, %arg16: memref<1x128x128xf32, #tpu.memory_space<vmem>>, %arg17: memref<1x1x128xf32, #tpu.memory_space<vmem>>, %arg18: memref<1x128x128xf32, #tpu.memory_space<vmem>>, %arg19: memref<1x1x128xf32, #tpu.memory_space<vmem>>, %arg20: memref<1x128x128xf32, #tpu.memory_space<vmem>>, %arg21: memref<1x1x128xf32, #tpu.memory_space<vmem>>, %arg22: memref<1x1x128xf32, #tpu.memory_space<vmem>>, %arg23: memref<1x1x128xf32, #tpu.memory_space<vmem>>, %arg24: memref<1x128x256xf32, #tpu.memory_space<vmem>>, %arg25: memref<1x1x256xf32, #tpu.memory_space<vmem>>, %arg26: memref<1x256x128xf32, #tpu.memory_space<vmem>>, %arg27: memref<1x1x128xf32, #tpu.memory_space<vmem>>, %arg28: memref<1x1x128xf32, #tpu.memory_space<vmem>>, %arg29: memref<1x1x128xf32, #tpu.memory_space<vmem>>, %arg30: memref<2x8x128xf32, #tpu.memory_space<vmem>>, %arg31: memref<2x8x128xf32, #tpu.memory_space<vmem>>) attributes {dimension_semantics = [#tpu.dimension_semantics<parallel>, #tpu.dimension_semantics<arbitrary>], iteration_bounds = array<i64: 1, 2>, scalar_prefetch = 0 : i64, scratch_operands = 1 : i64, tpu.core_type = #tpu.core_type<tc>, window_params = [{transform_indices = @transform_0, window_bounds = array<i64: 2, 8, 128>}, {transform_indices = @transform_1, window_bounds = array<i64: 2, 16, 128>}, {transform_indices = @transform_2, window_bounds = array<i64: 1, 128, 128>}, {transform_indices = @transform_3, window_bounds = array<i64: 1, 1, 128>}, {transform_indices = @transform_4, window_bounds = array<i64: 1, 128, 128>}, {transform_indices = @transform_5, window_bounds = array<i64: 1, 1, 128>}, {transform_indices = @transform_6, window_bounds = array<i64: 1, 128, 128>}, {transform_indices = @transform_7, window_bounds = array<i64: 1, 1, 128>}, {transform_indices = @transform_8, window_bounds = array<i64: 1, 128, 128>}, {transform_indices = @transform_9, window_bounds = array<i64: 1, 1, 128>}, {transform_indices = @transform_10, window_bounds = array<i64: 1, 1, 128>}, {transform_indices = @transform_11, window_bounds = array<i64: 1, 1, 128>}, {transform_indices = @transform_12, window_bounds = array<i64: 1, 128, 128>}, {transform_indices = @transform_13, window_bounds = array<i64: 1, 1, 128>}, {transform_indices = @transform_14, window_bounds = array<i64: 1, 128, 128>}, {transform_indices = @transform_15, window_bounds = array<i64: 1, 1, 128>}, {transform_indices = @transform_16, window_bounds = array<i64: 1, 128, 128>}, {transform_indices = @transform_17, window_bounds = array<i64: 1, 1, 128>}, {transform_indices = @transform_18, window_bounds = array<i64: 1, 128, 128>}, {transform_indices = @transform_19, window_bounds = array<i64: 1, 1, 128>}, {transform_indices = @transform_20, window_bounds = array<i64: 1, 1, 128>}, {transform_indices = @transform_21, window_bounds = array<i64: 1, 1, 128>}, {transform_indices = @transform_22, window_bounds = array<i64: 1, 128, 256>}, {transform_indices = @transform_23, window_bounds = array<i64: 1, 1, 256>}, {transform_indices = @transform_24, window_bounds = array<i64: 1, 256, 128>}, {transform_indices = @transform_25, window_bounds = array<i64: 1, 1, 128>}, {transform_indices = @transform_26, window_bounds = array<i64: 1, 1, 128>}, {transform_indices = @transform_27, window_bounds = array<i64: 1, 1, 128>}, {transform_indices = @transform_28, window_bounds = array<i64: 2, 8, 128>}]} {
    %c0_i32 = arith.constant 0 : i32
    %0 = arith.cmpi eq, %arg1, %c0_i32 : i32
    %1 = arith.extui %0 : i1 to i32
    %c0_i32_0 = arith.constant 0 : i32
    %2 = arith.cmpi ne, %1, %c0_i32_0 : i32
    scf.if %2 {
      %c0_135 = arith.constant 0 : index
      %c0_136 = arith.constant 0 : index
      %c0_137 = arith.constant 0 : index
      %258 = vector.load %arg2[%c0_135, %c0_136, %c0_137] : memref<2x8x128xf32, #tpu.memory_space<vmem>>, vector<2x8x128xf32>
      %c0_138 = arith.constant 0 : index
      %c0_139 = arith.constant 0 : index
      %c0_140 = arith.constant 0 : index
      %259 = vector.load %arg31[%c0_138, %c0_139, %c0_140] : memref<2x8x128xf32, #tpu.memory_space<vmem>>, vector<2x8x128xf32>
      tpu.vector_store %arg31[%c0_138, %c0_139, %c0_140], %258 {strides = array<i32>} : memref<2x8x128xf32, #tpu.memory_space<vmem>>, vector<2x8x128xf32>,
    } else {
    }
    %3 = tpu.iota {dimensions = array<i32: 1>} : vector<2x8x8xi32>
    %4 = tpu.iota {dimensions = array<i32: 2>} : vector<2x8x8xi32>
    %5 = arith.cmpi sge, %3, %4 : vector<2x8x8xi32>
    %c0 = arith.constant 0 : index
    %c0_1 = arith.constant 0 : index
    %c0_2 = arith.constant 0 : index
    %6 = vector.load %arg31[%c0, %c0_1, %c0_2] : memref<2x8x128xf32, #tpu.memory_space<vmem>>, vector<2x8x128xf32>
    %7 = vector.shape_cast %6 : vector<2x8x128xf32> to vector<16x128xf32>
    %c0_3 = arith.constant 0 : index
    %c0_4 = arith.constant 0 : index
    %c0_5 = arith.constant 0 : index
    %8 = vector.load %arg3[%c0_3, %c0_4, %c0_5] : memref<2x16x128xf32, #tpu.memory_space<vmem>>, vector<2x16x128xf32>
    %9 = vector.shape_cast %8 : vector<2x16x128xf32> to vector<32x128xf32>
    %c0_6 = arith.constant 0 : index
    %c0_7 = arith.constant 0 : index
    %c0_8 = arith.constant 0 : index
    %10 = vector.load %arg4[%c0_6, %c0_7, %c0_8] : memref<1x128x128xf32, #tpu.memory_space<vmem>>, vector<1x128x128xf32>
    %11 = vector.shape_cast %10 : vector<1x128x128xf32> to vector<128x128xf32>
    %cst = arith.constant dense<0.000000e+00> : vector<16x128xf32>
    %12 = tpu.matmul %7, %11, %cst {dimension_numbers = #tpu.dot_dimension_numbers<[1], [0], [0], [1], [0, 0, 1, 1], [], []>} : vector<16x128xf32>, vector<128x128xf32>, vector<16x128xf32> -> vector<16x128xf32>
    %c0_9 = arith.constant 0 : index
    %c0_10 = arith.constant 0 : index
    %c0_11 = arith.constant 0 : index
    %13 = vector.load %arg5[%c0_9, %c0_10, %c0_11] : memref<1x1x128xf32, #tpu.memory_space<vmem>>, vector<1x1x128xf32>
    %14 = vector.shape_cast %13 : vector<1x1x128xf32> to vector<1x128xf32>
    %15 = vector.broadcast %14 : vector<1x128xf32> to vector<16x128xf32>
    %16 = arith.addf %12, %15 : vector<16x128xf32>
    %c0_12 = arith.constant 0 : index
    %c0_13 = arith.constant 0 : index
    %c0_14 = arith.constant 0 : index
    %17 = vector.load %arg6[%c0_12, %c0_13, %c0_14] : memref<1x128x128xf32, #tpu.memory_space<vmem>>, vector<1x128x128xf32>
    %18 = vector.shape_cast %17 : vector<1x128x128xf32> to vector<128x128xf32>
    %cst_15 = arith.constant dense<0.000000e+00> : vector<16x128xf32>
    %19 = tpu.matmul %7, %18, %cst_15 {dimension_numbers = #tpu.dot_dimension_numbers<[1], [0], [0], [1], [0, 0, 1, 1], [], []>} : vector<16x128xf32>, vector<128x128xf32>, vector<16x128xf32> -> vector<16x128xf32>
    %c0_16 = arith.constant 0 : index
    %c0_17 = arith.constant 0 : index
    %c0_18 = arith.constant 0 : index
    %20 = vector.load %arg7[%c0_16, %c0_17, %c0_18] : memref<1x1x128xf32, #tpu.memory_space<vmem>>, vector<1x1x128xf32>
    %21 = vector.shape_cast %20 : vector<1x1x128xf32> to vector<1x128xf32>
    %22 = vector.broadcast %21 : vector<1x128xf32> to vector<16x128xf32>
    %23 = arith.addf %19, %22 : vector<16x128xf32>
    %c0_19 = arith.constant 0 : index
    %c0_20 = arith.constant 0 : index
    %c0_21 = arith.constant 0 : index
    %24 = vector.load %arg8[%c0_19, %c0_20, %c0_21] : memref<1x128x128xf32, #tpu.memory_space<vmem>>, vector<1x128x128xf32>
    %25 = vector.shape_cast %24 : vector<1x128x128xf32> to vector<128x128xf32>
    %cst_22 = arith.constant dense<0.000000e+00> : vector<16x128xf32>
    %26 = tpu.matmul %7, %25, %cst_22 {dimension_numbers = #tpu.dot_dimension_numbers<[1], [0], [0], [1], [0, 0, 1, 1], [], []>} : vector<16x128xf32>, vector<128x128xf32>, vector<16x128xf32> -> vector<16x128xf32>
    %c0_23 = arith.constant 0 : index
    %c0_24 = arith.constant 0 : index
    %c0_25 = arith.constant 0 : index
    %27 = vector.load %arg9[%c0_23, %c0_24, %c0_25] : memref<1x1x128xf32, #tpu.memory_space<vmem>>, vector<1x1x128xf32>
    %28 = vector.shape_cast %27 : vector<1x1x128xf32> to vector<1x128xf32>
    %29 = vector.broadcast %28 : vector<1x128xf32> to vector<16x128xf32>
    %30 = arith.addf %26, %29 : vector<16x128xf32>
    %31 = vector.shape_cast %16 : vector<16x128xf32> to vector<2x8x128xf32>
    %32 = vector.shape_cast %23 : vector<16x128xf32> to vector<2x8x128xf32>
    %33 = vector.shape_cast %30 : vector<16x128xf32> to vector<2x8x128xf32>
    %34 = vector.extract_strided_slice %31 {offsets = [0, 0, 0], sizes = [2, 8, 64], strides = [1, 1, 1]} : vector<2x8x128xf32> to vector<2x8x64xf32>
    %35 = vector.extract_strided_slice %32 {offsets = [0, 0, 0], sizes = [2, 8, 64], strides = [1, 1, 1]} : vector<2x8x128xf32> to vector<2x8x64xf32>
    %36 = vector.extract_strided_slice %33 {offsets = [0, 0, 0], sizes = [2, 8, 64], strides = [1, 1, 1]} : vector<2x8x128xf32> to vector<2x8x64xf32>
    "tpu.trace_start"() <{level = 10 : i32, message = "bqd,bkd->bqk"}> : () -> ()
    %cst_26 = arith.constant dense<0.000000e+00> : vector<2x8x8xf32>
    %37 = tpu.matmul %34, %35, %cst_26 {dimension_numbers = #tpu.dot_dimension_numbers<[2], [2], [1], [1], [0, 0, 0, 1, 1, 1], [0], [0]>} : vector<2x8x64xf32>, vector<2x8x64xf32>, vector<2x8x8xf32> -> vector<2x8x8xf32>
    %cst_27 = arith.constant -1.000000e+30 : f32
    "tpu.trace_stop"() : () -> ()
    %38 = vector.broadcast %cst_27 : f32 to vector<2x8x8xf32>
    %39 = arith.select %5, %37, %38 : vector<2x8x8xi1>, vector<2x8x8xf32>
    %cst_28 = arith.constant dense<0xFF800000> : vector<2x8xf32>
    %40 = vector.multi_reduction <maximumf>, %39, %cst_28 [2] : vector<2x8x8xf32> to vector<2x8xf32>
    %41 = vector.shape_cast %40 : vector<2x8xf32> to vector<2x8x1xf32>
    %42 = vector.broadcast %41 : vector<2x8x1xf32> to vector<2x8x8xf32>
    %43 = arith.subf %39, %42 : vector<2x8x8xf32>
    %44 = math.exp %43 : vector<2x8x8xf32>
    %cst_29 = arith.constant dense<0.000000e+00> : vector<2x8xf32>
    %45 = vector.multi_reduction <add>, %44, %cst_29 [2] : vector<2x8x8xf32> to vector<2x8xf32>
    %46 = vector.shape_cast %45 : vector<2x8xf32> to vector<2x8x1xf32>
    %47 = tpu.reciprocal %46 {approx = true} : vector<2x8x1xf32> -> vector<2x8x1xf32>
    %48 = arith.mulf %46, %47 : vector<2x8x1xf32>
    %cst_30 = arith.constant 2.000000e+00 : f32
    %49 = vector.broadcast %cst_30 : f32 to vector<2x8x1xf32>
    %50 = arith.subf %49, %48 : vector<2x8x1xf32>
    %51 = arith.mulf %47, %50 : vector<2x8x1xf32>
    %52 = vector.broadcast %51 : vector<2x8x1xf32> to vector<2x8x8xf32>
    %53 = arith.mulf %44, %52 : vector<2x8x8xf32>
    "tpu.trace_start"() <{level = 10 : i32, message = "bqk,bkd->bqd"}> : () -> ()
    %cst_31 = arith.constant dense<0.000000e+00> : vector<2x8x64xf32>
    %54 = tpu.matmul %53, %36, %cst_31 {dimension_numbers = #tpu.dot_dimension_numbers<[2], [1], [1], [2], [0, 0, 0, 1, 1, 2], [0], [0]>} : vector<2x8x8xf32>, vector<2x8x64xf32>, vector<2x8x64xf32> -> vector<2x8x64xf32>
    "tpu.trace_stop"() : () -> ()
    %55 = vector.extract_strided_slice %31 {offsets = [0, 0, 64], sizes = [2, 8, 64], strides = [1, 1, 1]} : vector<2x8x128xf32> to vector<2x8x64xf32>
    %56 = vector.extract_strided_slice %32 {offsets = [0, 0, 64], sizes = [2, 8, 64], strides = [1, 1, 1]} : vector<2x8x128xf32> to vector<2x8x64xf32>
    %57 = vector.extract_strided_slice %33 {offsets = [0, 0, 64], sizes = [2, 8, 64], strides = [1, 1, 1]} : vector<2x8x128xf32> to vector<2x8x64xf32>
    "tpu.trace_start"() <{level = 10 : i32, message = "bqd,bkd->bqk"}> : () -> ()
    %cst_32 = arith.constant dense<0.000000e+00> : vector<2x8x8xf32>
    %58 = tpu.matmul %55, %56, %cst_32 {dimension_numbers = #tpu.dot_dimension_numbers<[2], [2], [1], [1], [0, 0, 0, 1, 1, 1], [0], [0]>} : vector<2x8x64xf32>, vector<2x8x64xf32>, vector<2x8x8xf32> -> vector<2x8x8xf32>
    %cst_33 = arith.constant -1.000000e+30 : f32
    "tpu.trace_stop"() : () -> ()
    %59 = vector.broadcast %cst_33 : f32 to vector<2x8x8xf32>
    %60 = arith.select %5, %58, %59 : vector<2x8x8xi1>, vector<2x8x8xf32>
    %cst_34 = arith.constant dense<0xFF800000> : vector<2x8xf32>
    %61 = vector.multi_reduction <maximumf>, %60, %cst_34 [2] : vector<2x8x8xf32> to vector<2x8xf32>
    %62 = vector.shape_cast %61 : vector<2x8xf32> to vector<2x8x1xf32>
    %63 = vector.broadcast %62 : vector<2x8x1xf32> to vector<2x8x8xf32>
    %64 = arith.subf %60, %63 : vector<2x8x8xf32>
    %65 = math.exp %64 : vector<2x8x8xf32>
    %cst_35 = arith.constant dense<0.000000e+00> : vector<2x8xf32>
    %66 = vector.multi_reduction <add>, %65, %cst_35 [2] : vector<2x8x8xf32> to vector<2x8xf32>
    %67 = vector.shape_cast %66 : vector<2x8xf32> to vector<2x8x1xf32>
    %68 = tpu.reciprocal %67 {approx = true} : vector<2x8x1xf32> -> vector<2x8x1xf32>
    %69 = arith.mulf %67, %68 : vector<2x8x1xf32>
    %cst_36 = arith.constant 2.000000e+00 : f32
    %70 = vector.broadcast %cst_36 : f32 to vector<2x8x1xf32>
    %71 = arith.subf %70, %69 : vector<2x8x1xf32>
    %72 = arith.mulf %68, %71 : vector<2x8x1xf32>
    %73 = vector.broadcast %72 : vector<2x8x1xf32> to vector<2x8x8xf32>
    %74 = arith.mulf %65, %73 : vector<2x8x8xf32>
    "tpu.trace_start"() <{level = 10 : i32, message = "bqk,bkd->bqd"}> : () -> ()
    %cst_37 = arith.constant dense<0.000000e+00> : vector<2x8x64xf32>
    %75 = tpu.matmul %74, %57, %cst_37 {dimension_numbers = #tpu.dot_dimension_numbers<[2], [1], [1], [2], [0, 0, 0, 1, 1, 2], [0], [0]>} : vector<2x8x8xf32>, vector<2x8x64xf32>, vector<2x8x64xf32> -> vector<2x8x64xf32>
    "tpu.trace_stop"() : () -> ()
    %76 = tpu.concatenate %54, %75 in 2 : vector<2x8x64xf32>, vector<2x8x64xf32> -> vector<2x8x128xf32>
    %77 = vector.shape_cast %76 : vector<2x8x128xf32> to vector<16x128xf32>
    %c0_38 = arith.constant 0 : index
    %c0_39 = arith.constant 0 : index
    %c0_40 = arith.constant 0 : index
    %78 = vector.load %arg10[%c0_38, %c0_39, %c0_40] : memref<1x128x128xf32, #tpu.memory_space<vmem>>, vector<1x128x128xf32>
    %79 = vector.shape_cast %78 : vector<1x128x128xf32> to vector<128x128xf32>
    %cst_41 = arith.constant dense<0.000000e+00> : vector<16x128xf32>
    %80 = tpu.matmul %77, %79, %cst_41 {dimension_numbers = #tpu.dot_dimension_numbers<[1], [0], [0], [1], [0, 0, 1, 1], [], []>} : vector<16x128xf32>, vector<128x128xf32>, vector<16x128xf32> -> vector<16x128xf32>
    %c0_42 = arith.constant 0 : index
    %c0_43 = arith.constant 0 : index
    %c0_44 = arith.constant 0 : index
    %81 = vector.load %arg11[%c0_42, %c0_43, %c0_44] : memref<1x1x128xf32, #tpu.memory_space<vmem>>, vector<1x1x128xf32>
    %82 = vector.shape_cast %81 : vector<1x1x128xf32> to vector<1x128xf32>
    %83 = vector.broadcast %82 : vector<1x128xf32> to vector<16x128xf32>
    %84 = arith.addf %80, %83 : vector<16x128xf32>
    %85 = arith.addf %84, %7 : vector<16x128xf32>
    %cst_45 = arith.constant dense<0.000000e+00> : vector<16xf32>
    %86 = vector.multi_reduction <add>, %85, %cst_45 [1] : vector<16x128xf32> to vector<16xf32>
    %87 = vector.shape_cast %86 : vector<16xf32> to vector<16x1xf32>
    %cst_46 = arith.constant 1.280000e+02 : f32
    %88 = vector.broadcast %cst_46 : f32 to vector<16x1xf32>
    %89 = arith.divf %87, %88 : vector<16x1xf32>
    %90 = vector.broadcast %89 : vector<16x1xf32> to vector<16x128xf32>
    %91 = arith.subf %85, %90 : vector<16x128xf32>
    %92 = arith.mulf %91, %91 : vector<16x128xf32>
    %cst_47 = arith.constant dense<0.000000e+00> : vector<16xf32>
    %93 = vector.multi_reduction <add>, %92, %cst_47 [1] : vector<16x128xf32> to vector<16xf32>
    %94 = vector.shape_cast %93 : vector<16xf32> to vector<16x1xf32>
    %cst_48 = arith.constant 1.280000e+02 : f32
    %95 = vector.broadcast %cst_48 : f32 to vector<16x1xf32>
    %96 = arith.divf %94, %95 : vector<16x1xf32>
    %97 = vector.broadcast %89 : vector<16x1xf32> to vector<16x128xf32>
    %98 = arith.subf %85, %97 : vector<16x128xf32>
    %cst_49 = arith.constant 9.99999974E-6 : f32
    %99 = vector.broadcast %cst_49 : f32 to vector<16x1xf32>
    %100 = arith.addf %96, %99 : vector<16x1xf32>
    %101 = math.rsqrt %100 : vector<16x1xf32>
    %102 = vector.broadcast %101 : vector<16x1xf32> to vector<16x128xf32>
    %103 = arith.mulf %98, %102 : vector<16x128xf32>
    %c0_50 = arith.constant 0 : index
    %c0_51 = arith.constant 0 : index
    %c0_52 = arith.constant 0 : index
    %104 = vector.load %arg12[%c0_50, %c0_51, %c0_52] : memref<1x1x128xf32, #tpu.memory_space<vmem>>, vector<1x1x128xf32>
    %105 = vector.shape_cast %104 : vector<1x1x128xf32> to vector<1x128xf32>
    %106 = vector.broadcast %105 : vector<1x128xf32> to vector<16x128xf32>
    %107 = arith.mulf %103, %106 : vector<16x128xf32>
    %c0_53 = arith.constant 0 : index
    %c0_54 = arith.constant 0 : index
    %c0_55 = arith.constant 0 : index
    %108 = vector.load %arg13[%c0_53, %c0_54, %c0_55] : memref<1x1x128xf32, #tpu.memory_space<vmem>>, vector<1x1x128xf32>
    %109 = vector.shape_cast %108 : vector<1x1x128xf32> to vector<1x128xf32>
    %110 = vector.broadcast %109 : vector<1x128xf32> to vector<16x128xf32>
    %111 = arith.addf %107, %110 : vector<16x128xf32>
    %c0_56 = arith.constant 0 : index
    %c0_57 = arith.constant 0 : index
    %c0_58 = arith.constant 0 : index
    %112 = vector.load %arg14[%c0_56, %c0_57, %c0_58] : memref<1x128x128xf32, #tpu.memory_space<vmem>>, vector<1x128x128xf32>
    %113 = vector.shape_cast %112 : vector<1x128x128xf32> to vector<128x128xf32>
    %cst_59 = arith.constant dense<0.000000e+00> : vector<16x128xf32>
    %114 = tpu.matmul %111, %113, %cst_59 {dimension_numbers = #tpu.dot_dimension_numbers<[1], [0], [0], [1], [0, 0, 1, 1], [], []>} : vector<16x128xf32>, vector<128x128xf32>, vector<16x128xf32> -> vector<16x128xf32>
    %c0_60 = arith.constant 0 : index
    %c0_61 = arith.constant 0 : index
    %c0_62 = arith.constant 0 : index
    %115 = vector.load %arg15[%c0_60, %c0_61, %c0_62] : memref<1x1x128xf32, #tpu.memory_space<vmem>>, vector<1x1x128xf32>
    %116 = vector.shape_cast %115 : vector<1x1x128xf32> to vector<1x128xf32>
    %117 = vector.broadcast %116 : vector<1x128xf32> to vector<16x128xf32>
    %118 = arith.addf %114, %117 : vector<16x128xf32>
    %c0_63 = arith.constant 0 : index
    %c0_64 = arith.constant 0 : index
    %c0_65 = arith.constant 0 : index
    %119 = vector.load %arg16[%c0_63, %c0_64, %c0_65] : memref<1x128x128xf32, #tpu.memory_space<vmem>>, vector<1x128x128xf32>
    %120 = vector.shape_cast %119 : vector<1x128x128xf32> to vector<128x128xf32>
    %cst_66 = arith.constant dense<0.000000e+00> : vector<32x128xf32>
    %121 = tpu.matmul %9, %120, %cst_66 {dimension_numbers = #tpu.dot_dimension_numbers<[1], [0], [0], [1], [0, 0, 1, 1], [], []>} : vector<32x128xf32>, vector<128x128xf32>, vector<32x128xf32> -> vector<32x128xf32>
    %c0_67 = arith.constant 0 : index
    %c0_68 = arith.constant 0 : index
    %c0_69 = arith.constant 0 : index
    %122 = vector.load %arg17[%c0_67, %c0_68, %c0_69] : memref<1x1x128xf32, #tpu.memory_space<vmem>>, vector<1x1x128xf32>
    %123 = vector.shape_cast %122 : vector<1x1x128xf32> to vector<1x128xf32>
    %124 = vector.broadcast %123 : vector<1x128xf32> to vector<32x128xf32>
    %125 = arith.addf %121, %124 : vector<32x128xf32>
    %c0_70 = arith.constant 0 : index
    %c0_71 = arith.constant 0 : index
    %c0_72 = arith.constant 0 : index
    %126 = vector.load %arg18[%c0_70, %c0_71, %c0_72] : memref<1x128x128xf32, #tpu.memory_space<vmem>>, vector<1x128x128xf32>
    %127 = vector.shape_cast %126 : vector<1x128x128xf32> to vector<128x128xf32>
    %cst_73 = arith.constant dense<0.000000e+00> : vector<32x128xf32>
    %128 = tpu.matmul %9, %127, %cst_73 {dimension_numbers = #tpu.dot_dimension_numbers<[1], [0], [0], [1], [0, 0, 1, 1], [], []>} : vector<32x128xf32>, vector<128x128xf32>, vector<32x128xf32> -> vector<32x128xf32>
    %c0_74 = arith.constant 0 : index
    %c0_75 = arith.constant 0 : index
    %c0_76 = arith.constant 0 : index
    %129 = vector.load %arg19[%c0_74, %c0_75, %c0_76] : memref<1x1x128xf32, #tpu.memory_space<vmem>>, vector<1x1x128xf32>
    %130 = vector.shape_cast %129 : vector<1x1x128xf32> to vector<1x128xf32>
    %131 = vector.broadcast %130 : vector<1x128xf32> to vector<32x128xf32>
    %132 = arith.addf %128, %131 : vector<32x128xf32>
    %133 = vector.shape_cast %118 : vector<16x128xf32> to vector<2x8x128xf32>
    %134 = vector.shape_cast %125 : vector<32x128xf32> to vector<2x16x128xf32>
    %135 = vector.shape_cast %132 : vector<32x128xf32> to vector<2x16x128xf32>
    %136 = vector.extract_strided_slice %133 {offsets = [0, 0, 0], sizes = [2, 8, 64], strides = [1, 1, 1]} : vector<2x8x128xf32> to vector<2x8x64xf32>
    %137 = vector.extract_strided_slice %134 {offsets = [0, 0, 0], sizes = [2, 16, 64], strides = [1, 1, 1]} : vector<2x16x128xf32> to vector<2x16x64xf32>
    %138 = vector.extract_strided_slice %135 {offsets = [0, 0, 0], sizes = [2, 16, 64], strides = [1, 1, 1]} : vector<2x16x128xf32> to vector<2x16x64xf32>
    "tpu.trace_start"() <{level = 10 : i32, message = "bqd,bkd->bqk"}> : () -> ()
    %cst_77 = arith.constant dense<0.000000e+00> : vector<2x8x16xf32>
    %139 = tpu.matmul %136, %137, %cst_77 {dimension_numbers = #tpu.dot_dimension_numbers<[2], [2], [1], [1], [0, 0, 0, 1, 1, 1], [0], [0]>} : vector<2x8x64xf32>, vector<2x16x64xf32>, vector<2x8x16xf32> -> vector<2x8x16xf32>
    "tpu.trace_stop"() : () -> ()
    %cst_78 = arith.constant dense<0xFF800000> : vector<2x8xf32>
    %140 = vector.multi_reduction <maximumf>, %139, %cst_78 [2] : vector<2x8x16xf32> to vector<2x8xf32>
    %141 = vector.shape_cast %140 : vector<2x8xf32> to vector<2x8x1xf32>
    %142 = vector.broadcast %141 : vector<2x8x1xf32> to vector<2x8x16xf32>
    %143 = arith.subf %139, %142 : vector<2x8x16xf32>
    %144 = math.exp %143 : vector<2x8x16xf32>
    %cst_79 = arith.constant dense<0.000000e+00> : vector<2x8xf32>
    %145 = vector.multi_reduction <add>, %144, %cst_79 [2] : vector<2x8x16xf32> to vector<2x8xf32>
    %146 = vector.shape_cast %145 : vector<2x8xf32> to vector<2x8x1xf32>
    %147 = tpu.reciprocal %146 {approx = true} : vector<2x8x1xf32> -> vector<2x8x1xf32>
    %148 = arith.mulf %146, %147 : vector<2x8x1xf32>
    %cst_80 = arith.constant 2.000000e+00 : f32
    %149 = vector.broadcast %cst_80 : f32 to vector<2x8x1xf32>
    %150 = arith.subf %149, %148 : vector<2x8x1xf32>
    %151 = arith.mulf %147, %150 : vector<2x8x1xf32>
    %152 = vector.broadcast %151 : vector<2x8x1xf32> to vector<2x8x16xf32>
    %153 = arith.mulf %144, %152 : vector<2x8x16xf32>
    "tpu.trace_start"() <{level = 10 : i32, message = "bqk,bkd->bqd"}> : () -> ()
    %cst_81 = arith.constant dense<0.000000e+00> : vector<2x8x64xf32>
    %154 = tpu.matmul %153, %138, %cst_81 {dimension_numbers = #tpu.dot_dimension_numbers<[2], [1], [1], [2], [0, 0, 0, 1, 1, 2], [0], [0]>} : vector<2x8x16xf32>, vector<2x16x64xf32>, vector<2x8x64xf32> -> vector<2x8x64xf32>
    "tpu.trace_stop"() : () -> ()
    %155 = vector.extract_strided_slice %133 {offsets = [0, 0, 64], sizes = [2, 8, 64], strides = [1, 1, 1]} : vector<2x8x128xf32> to vector<2x8x64xf32>
    %156 = vector.extract_strided_slice %134 {offsets = [0, 0, 64], sizes = [2, 16, 64], strides = [1, 1, 1]} : vector<2x16x128xf32> to vector<2x16x64xf32>
    %157 = vector.extract_strided_slice %135 {offsets = [0, 0, 64], sizes = [2, 16, 64], strides = [1, 1, 1]} : vector<2x16x128xf32> to vector<2x16x64xf32>
    "tpu.trace_start"() <{level = 10 : i32, message = "bqd,bkd->bqk"}> : () -> ()
    %cst_82 = arith.constant dense<0.000000e+00> : vector<2x8x16xf32>
    %158 = tpu.matmul %155, %156, %cst_82 {dimension_numbers = #tpu.dot_dimension_numbers<[2], [2], [1], [1], [0, 0, 0, 1, 1, 1], [0], [0]>} : vector<2x8x64xf32>, vector<2x16x64xf32>, vector<2x8x16xf32> -> vector<2x8x16xf32>
    "tpu.trace_stop"() : () -> ()
    %cst_83 = arith.constant dense<0xFF800000> : vector<2x8xf32>
    %159 = vector.multi_reduction <maximumf>, %158, %cst_83 [2] : vector<2x8x16xf32> to vector<2x8xf32>
    %160 = vector.shape_cast %159 : vector<2x8xf32> to vector<2x8x1xf32>
    %161 = vector.broadcast %160 : vector<2x8x1xf32> to vector<2x8x16xf32>
    %162 = arith.subf %158, %161 : vector<2x8x16xf32>
    %163 = math.exp %162 : vector<2x8x16xf32>
    %cst_84 = arith.constant dense<0.000000e+00> : vector<2x8xf32>
    %164 = vector.multi_reduction <add>, %163, %cst_84 [2] : vector<2x8x16xf32> to vector<2x8xf32>
    %165 = vector.shape_cast %164 : vector<2x8xf32> to vector<2x8x1xf32>
    %166 = tpu.reciprocal %165 {approx = true} : vector<2x8x1xf32> -> vector<2x8x1xf32>
    %167 = arith.mulf %165, %166 : vector<2x8x1xf32>
    %cst_85 = arith.constant 2.000000e+00 : f32
    %168 = vector.broadcast %cst_85 : f32 to vector<2x8x1xf32>
    %169 = arith.subf %168, %167 : vector<2x8x1xf32>
    %170 = arith.mulf %166, %169 : vector<2x8x1xf32>
    %171 = vector.broadcast %170 : vector<2x8x1xf32> to vector<2x8x16xf32>
    %172 = arith.mulf %163, %171 : vector<2x8x16xf32>
    "tpu.trace_start"() <{level = 10 : i32, message = "bqk,bkd->bqd"}> : () -> ()
    %cst_86 = arith.constant dense<0.000000e+00> : vector<2x8x64xf32>
    %173 = tpu.matmul %172, %157, %cst_86 {dimension_numbers = #tpu.dot_dimension_numbers<[2], [1], [1], [2], [0, 0, 0, 1, 1, 2], [0], [0]>} : vector<2x8x16xf32>, vector<2x16x64xf32>, vector<2x8x64xf32> -> vector<2x8x64xf32>
    "tpu.trace_stop"() : () -> ()
    %174 = tpu.concatenate %154, %173 in 2 : vector<2x8x64xf32>, vector<2x8x64xf32> -> vector<2x8x128xf32>
    %175 = vector.shape_cast %174 : vector<2x8x128xf32> to vector<16x128xf32>
    %c0_87 = arith.constant 0 : index
    %c0_88 = arith.constant 0 : index
    %c0_89 = arith.constant 0 : index
    %176 = vector.load %arg20[%c0_87, %c0_88, %c0_89] : memref<1x128x128xf32, #tpu.memory_space<vmem>>, vector<1x128x128xf32>
    %177 = vector.shape_cast %176 : vector<1x128x128xf32> to vector<128x128xf32>
    %cst_90 = arith.constant dense<0.000000e+00> : vector<16x128xf32>
    %178 = tpu.matmul %175, %177, %cst_90 {dimension_numbers = #tpu.dot_dimension_numbers<[1], [0], [0], [1], [0, 0, 1, 1], [], []>} : vector<16x128xf32>, vector<128x128xf32>, vector<16x128xf32> -> vector<16x128xf32>
    %c0_91 = arith.constant 0 : index
    %c0_92 = arith.constant 0 : index
    %c0_93 = arith.constant 0 : index
    %179 = vector.load %arg21[%c0_91, %c0_92, %c0_93] : memref<1x1x128xf32, #tpu.memory_space<vmem>>, vector<1x1x128xf32>
    %180 = vector.shape_cast %179 : vector<1x1x128xf32> to vector<1x128xf32>
    %181 = vector.broadcast %180 : vector<1x128xf32> to vector<16x128xf32>
    %182 = arith.addf %178, %181 : vector<16x128xf32>
    %183 = arith.addf %182, %111 : vector<16x128xf32>
    %cst_94 = arith.constant dense<0.000000e+00> : vector<16xf32>
    %184 = vector.multi_reduction <add>, %183, %cst_94 [1] : vector<16x128xf32> to vector<16xf32>
    %185 = vector.shape_cast %184 : vector<16xf32> to vector<16x1xf32>
    %cst_95 = arith.constant 1.280000e+02 : f32
    %186 = vector.broadcast %cst_95 : f32 to vector<16x1xf32>
    %187 = arith.divf %185, %186 : vector<16x1xf32>
    %188 = vector.broadcast %187 : vector<16x1xf32> to vector<16x128xf32>
    %189 = arith.subf %183, %188 : vector<16x128xf32>
    %190 = arith.mulf %189, %189 : vector<16x128xf32>
    %cst_96 = arith.constant dense<0.000000e+00> : vector<16xf32>
    %191 = vector.multi_reduction <add>, %190, %cst_96 [1] : vector<16x128xf32> to vector<16xf32>
    %192 = vector.shape_cast %191 : vector<16xf32> to vector<16x1xf32>
    %cst_97 = arith.constant 1.280000e+02 : f32
    %193 = vector.broadcast %cst_97 : f32 to vector<16x1xf32>
    %194 = arith.divf %192, %193 : vector<16x1xf32>
    %195 = vector.broadcast %187 : vector<16x1xf32> to vector<16x128xf32>
    %196 = arith.subf %183, %195 : vector<16x128xf32>
    %cst_98 = arith.constant 9.99999974E-6 : f32
    %197 = vector.broadcast %cst_98 : f32 to vector<16x1xf32>
    %198 = arith.addf %194, %197 : vector<16x1xf32>
    %199 = math.rsqrt %198 : vector<16x1xf32>
    %200 = vector.broadcast %199 : vector<16x1xf32> to vector<16x128xf32>
    %201 = arith.mulf %196, %200 : vector<16x128xf32>
    %c0_99 = arith.constant 0 : index
    %c0_100 = arith.constant 0 : index
    %c0_101 = arith.constant 0 : index
    %202 = vector.load %arg22[%c0_99, %c0_100, %c0_101] : memref<1x1x128xf32, #tpu.memory_space<vmem>>, vector<1x1x128xf32>
    %203 = vector.shape_cast %202 : vector<1x1x128xf32> to vector<1x128xf32>
    %204 = vector.broadcast %203 : vector<1x128xf32> to vector<16x128xf32>
    %205 = arith.mulf %201, %204 : vector<16x128xf32>
    %c0_102 = arith.constant 0 : index
    %c0_103 = arith.constant 0 : index
    %c0_104 = arith.constant 0 : index
    %206 = vector.load %arg23[%c0_102, %c0_103, %c0_104] : memref<1x1x128xf32, #tpu.memory_space<vmem>>, vector<1x1x128xf32>
    %207 = vector.shape_cast %206 : vector<1x1x128xf32> to vector<1x128xf32>
    %208 = vector.broadcast %207 : vector<1x128xf32> to vector<16x128xf32>
    %209 = arith.addf %205, %208 : vector<16x128xf32>
    %c0_105 = arith.constant 0 : index
    %c0_106 = arith.constant 0 : index
    %c0_107 = arith.constant 0 : index
    %210 = vector.load %arg24[%c0_105, %c0_106, %c0_107] : memref<1x128x256xf32, #tpu.memory_space<vmem>>, vector<1x128x256xf32>
    %211 = vector.shape_cast %210 : vector<1x128x256xf32> to vector<128x256xf32>
    %cst_108 = arith.constant dense<0.000000e+00> : vector<16x256xf32>
    %212 = tpu.matmul %209, %211, %cst_108 {dimension_numbers = #tpu.dot_dimension_numbers<[1], [0], [0], [1], [0, 0, 1, 1], [], []>} : vector<16x128xf32>, vector<128x256xf32>, vector<16x256xf32> -> vector<16x256xf32>
    %c0_109 = arith.constant 0 : index
    %c0_110 = arith.constant 0 : index
    %c0_111 = arith.constant 0 : index
    %213 = vector.load %arg25[%c0_109, %c0_110, %c0_111] : memref<1x1x256xf32, #tpu.memory_space<vmem>>, vector<1x1x256xf32>
    %214 = vector.shape_cast %213 : vector<1x1x256xf32> to vector<1x256xf32>
    %215 = vector.broadcast %214 : vector<1x256xf32> to vector<16x256xf32>
    %216 = arith.addf %212, %215 : vector<16x256xf32>
    %cst_112 = arith.constant 0.000000e+00 : f32
    %217 = vector.broadcast %cst_112 : f32 to vector<16x256xf32>
    %218 = arith.maximumf %216, %217 : vector<16x256xf32>
    %c0_113 = arith.constant 0 : index
    %c0_114 = arith.constant 0 : index
    %c0_115 = arith.constant 0 : index
    %219 = vector.load %arg26[%c0_113, %c0_114, %c0_115] : memref<1x256x128xf32, #tpu.memory_space<vmem>>, vector<1x256x128xf32>
    %220 = vector.shape_cast %219 : vector<1x256x128xf32> to vector<256x128xf32>
    %cst_116 = arith.constant dense<0.000000e+00> : vector<16x128xf32>
    %221 = tpu.matmul %218, %220, %cst_116 {dimension_numbers = #tpu.dot_dimension_numbers<[1], [0], [0], [1], [0, 0, 1, 1], [], []>} : vector<16x256xf32>, vector<256x128xf32>, vector<16x128xf32> -> vector<16x128xf32>
    %c0_117 = arith.constant 0 : index
    %c0_118 = arith.constant 0 : index
    %c0_119 = arith.constant 0 : index
    %222 = vector.load %arg27[%c0_117, %c0_118, %c0_119] : memref<1x1x128xf32, #tpu.memory_space<vmem>>, vector<1x1x128xf32>
    %223 = vector.shape_cast %222 : vector<1x1x128xf32> to vector<1x128xf32>
    %224 = vector.broadcast %223 : vector<1x128xf32> to vector<16x128xf32>
    %225 = arith.addf %221, %224 : vector<16x128xf32>
    %226 = arith.addf %225, %209 : vector<16x128xf32>
    %cst_120 = arith.constant dense<0.000000e+00> : vector<16xf32>
    %227 = vector.multi_reduction <add>, %226, %cst_120 [1] : vector<16x128xf32> to vector<16xf32>
    %228 = vector.shape_cast %227 : vector<16xf32> to vector<16x1xf32>
    %cst_121 = arith.constant 1.280000e+02 : f32
    %229 = vector.broadcast %cst_121 : f32 to vector<16x1xf32>
    %230 = arith.divf %228, %229 : vector<16x1xf32>
    %231 = vector.broadcast %230 : vector<16x1xf32> to vector<16x128xf32>
    %232 = arith.subf %226, %231 : vector<16x128xf32>
    %233 = arith.mulf %232, %232 : vector<16x128xf32>
    %cst_122 = arith.constant dense<0.000000e+00> : vector<16xf32>
    %234 = vector.multi_reduction <add>, %233, %cst_122 [1] : vector<16x128xf32> to vector<16xf32>
    %235 = vector.shape_cast %234 : vector<16xf32> to vector<16x1xf32>
    %cst_123 = arith.constant 1.280000e+02 : f32
    %236 = vector.broadcast %cst_123 : f32 to vector<16x1xf32>
    %237 = arith.divf %235, %236 : vector<16x1xf32>
    %238 = vector.broadcast %230 : vector<16x1xf32> to vector<16x128xf32>
    %239 = arith.subf %226, %238 : vector<16x128xf32>
    %cst_124 = arith.constant 9.99999974E-6 : f32
    %240 = vector.broadcast %cst_124 : f32 to vector<16x1xf32>
    %241 = arith.addf %237, %240 : vector<16x1xf32>
    %242 = math.rsqrt %241 : vector<16x1xf32>
    %243 = vector.broadcast %242 : vector<16x1xf32> to vector<16x128xf32>
    %244 = arith.mulf %239, %243 : vector<16x128xf32>
    %c0_125 = arith.constant 0 : index
    %c0_126 = arith.constant 0 : index
    %c0_127 = arith.constant 0 : index
    %245 = vector.load %arg28[%c0_125, %c0_126, %c0_127] : memref<1x1x128xf32, #tpu.memory_space<vmem>>, vector<1x1x128xf32>
    %246 = vector.shape_cast %245 : vector<1x1x128xf32> to vector<1x128xf32>
    %247 = vector.broadcast %246 : vector<1x128xf32> to vector<16x128xf32>
    %248 = arith.mulf %244, %247 : vector<16x128xf32>
    %c0_128 = arith.constant 0 : index
    %c0_129 = arith.constant 0 : index
    %c0_130 = arith.constant 0 : index
    %249 = vector.load %arg29[%c0_128, %c0_129, %c0_130] : memref<1x1x128xf32, #tpu.memory_space<vmem>>, vector<1x1x128xf32>
    %250 = vector.shape_cast %249 : vector<1x1x128xf32> to vector<1x128xf32>
    %251 = vector.broadcast %250 : vector<1x128xf32> to vector<16x128xf32>
    %252 = arith.addf %248, %251 : vector<16x128xf32>
    %253 = vector.shape_cast %252 : vector<16x128xf32> to vector<2x8x128xf32>
    %c0_131 = arith.constant 0 : index
    %c0_132 = arith.constant 0 : index
    %c0_133 = arith.constant 0 : index
    %254 = vector.load %arg31[%c0_131, %c0_132, %c0_133] : memref<2x8x128xf32, #tpu.memory_space<vmem>>, vector<2x8x128xf32>
    tpu.vector_store %arg31[%c0_131, %c0_132, %c0_133], %253 {strides = array<i32>} : memref<2x8x128xf32, #tpu.memory_space<vmem>>, vector<2x8x128xf32>,
    %c1_i32 = arith.constant 1 : i32
    %255 = arith.cmpi eq, %arg1, %c1_i32 : i32
    %256 = arith.extui %255 : i1 to i32
    %c0_i32_134 = arith.constant 0 : i32
    %257 = arith.cmpi ne, %256, %c0_i32_134 : i32
    scf.if %257 {
      %c0_135 = arith.constant 0 : index
      %c0_136 = arith.constant 0 : index
      %c0_137 = arith.constant 0 : index
      %258 = vector.load %arg30[%c0_135, %c0_136, %c0_137] : memref<2x8x128xf32, #tpu.memory_space<vmem>>, vector<2x8x128xf32>
      tpu.vector_store %arg30[%c0_135, %c0_136, %c0_137], %253 {strides = array<i32>} : memref<2x8x128xf32, #tpu.memory_space<vmem>>, vector<2x8x128xf32>,
    } else {
    }
    return
  }
  func.func @transform_0(%arg0: i32, %arg1: i32) -> (i32, i32, i32) {
    %c0_i32 = arith.constant 0 : i32
    %c0_i32_0 = arith.constant 0 : i32
    %c0_i32_1 = arith.constant 0 : i32
    return %arg0, %c0_i32, %c0_i32_0 : i32, i32, i32
  }
  func.func @transform_1(%arg0: i32, %arg1: i32) -> (i32, i32, i32) {
    %c0_i32 = arith.constant 0 : i32
    %c0_i32_0 = arith.constant 0 : i32
    %c0_i32_1 = arith.constant 0 : i32
    return %arg0, %c0_i32, %c0_i32_0 : i32, i32, i32
  }
  func.func @transform_2(%arg0: i32, %arg1: i32) -> (i32, i32, i32) {
    %c0_i32 = arith.constant 0 : i32
    %c0_i32_0 = arith.constant 0 : i32
    %c0_i32_1 = arith.constant 0 : i32
    return %arg1, %c0_i32, %c0_i32_0 : i32, i32, i32
  }
  func.func @transform_3(%arg0: i32, %arg1: i32) -> (i32, i32, i32) {
    %c0_i32 = arith.constant 0 : i32
    %c0_i32_0 = arith.constant 0 : i32
    %c0_i32_1 = arith.constant 0 : i32
    return %arg1, %c0_i32, %c0_i32_0 : i32, i32, i32
  }
  func.func @transform_4(%arg0: i32, %arg1: i32) -> (i32, i32, i32) {
    %c0_i32 = arith.constant 0 : i32
    %c0_i32_0 = arith.constant 0 : i32
    %c0_i32_1 = arith.constant 0 : i32
    return %arg1, %c0_i32, %c0_i32_0 : i32, i32, i32
  }
  func.func @transform_5(%arg0: i32, %arg1: i32) -> (i32, i32, i32) {
    %c0_i32 = arith.constant 0 : i32
    %c0_i32_0 = arith.constant 0 : i32
    %c0_i32_1 = arith.constant 0 : i32
    return %arg1, %c0_i32, %c0_i32_0 : i32, i32, i32
  }
  func.func @transform_6(%arg0: i32, %arg1: i32) -> (i32, i32, i32) {
    %c0_i32 = arith.constant 0 : i32
    %c0_i32_0 = arith.constant 0 : i32
    %c0_i32_1 = arith.constant 0 : i32
    return %arg1, %c0_i32, %c0_i32_0 : i32, i32, i32
  }
  func.func @transform_7(%arg0: i32, %arg1: i32) -> (i32, i32, i32) {
    %c0_i32 = arith.constant 0 : i32
    %c0_i32_0 = arith.constant 0 : i32
    %c0_i32_1 = arith.constant 0 : i32
    return %arg1, %c0_i32, %c0_i32_0 : i32, i32, i32
  }
  func.func @transform_8(%arg0: i32, %arg1: i32) -> (i32, i32, i32) {
    %c0_i32 = arith.constant 0 : i32
    %c0_i32_0 = arith.constant 0 : i32
    %c0_i32_1 = arith.constant 0 : i32
    return %arg1, %c0_i32, %c0_i32_0 : i32, i32, i32
  }
  func.func @transform_9(%arg0: i32, %arg1: i32) -> (i32, i32, i32) {
    %c0_i32 = arith.constant 0 : i32
    %c0_i32_0 = arith.constant 0 : i32
    %c0_i32_1 = arith.constant 0 : i32
    return %arg1, %c0_i32, %c0_i32_0 : i32, i32, i32
  }
  func.func @transform_10(%arg0: i32, %arg1: i32) -> (i32, i32, i32) {
    %c0_i32 = arith.constant 0 : i32
    %c0_i32_0 = arith.constant 0 : i32
    %c0_i32_1 = arith.constant 0 : i32
    return %arg1, %c0_i32, %c0_i32_0 : i32, i32, i32
  }
  func.func @transform_11(%arg0: i32, %arg1: i32) -> (i32, i32, i32) {
    %c0_i32 = arith.constant 0 : i32
    %c0_i32_0 = arith.constant 0 : i32
    %c0_i32_1 = arith.constant 0 : i32
    return %arg1, %c0_i32, %c0_i32_0 : i32, i32, i32
  }
  func.func @transform_12(%arg0: i32, %arg1: i32) -> (i32, i32, i32) {
    %c0_i32 = arith.constant 0 : i32
    %c0_i32_0 = arith.constant 0 : i32
    %c0_i32_1 = arith.constant 0 : i32
    return %arg1, %c0_i32, %c0_i32_0 : i32, i32, i32
  }
  func.func @transform_13(%arg0: i32, %arg1: i32) -> (i32, i32, i32) {
    %c0_i32 = arith.constant 0 : i32
    %c0_i32_0 = arith.constant 0 : i32
    %c0_i32_1 = arith.constant 0 : i32
    return %arg1, %c0_i32, %c0_i32_0 : i32, i32, i32
  }
  func.func @transform_14(%arg0: i32, %arg1: i32) -> (i32, i32, i32) {
    %c0_i32 = arith.constant 0 : i32
    %c0_i32_0 = arith.constant 0 : i32
    %c0_i32_1 = arith.constant 0 : i32
    return %arg1, %c0_i32, %c0_i32_0 : i32, i32, i32
  }
  func.func @transform_15(%arg0: i32, %arg1: i32) -> (i32, i32, i32) {
    %c0_i32 = arith.constant 0 : i32
    %c0_i32_0 = arith.constant 0 : i32
    %c0_i32_1 = arith.constant 0 : i32
    return %arg1, %c0_i32, %c0_i32_0 : i32, i32, i32
  }
  func.func @transform_16(%arg0: i32, %arg1: i32) -> (i32, i32, i32) {
    %c0_i32 = arith.constant 0 : i32
    %c0_i32_0 = arith.constant 0 : i32
    %c0_i32_1 = arith.constant 0 : i32
    return %arg1, %c0_i32, %c0_i32_0 : i32, i32, i32
  }
  func.func @transform_17(%arg0: i32, %arg1: i32) -> (i32, i32, i32) {
    %c0_i32 = arith.constant 0 : i32
    %c0_i32_0 = arith.constant 0 : i32
    %c0_i32_1 = arith.constant 0 : i32
    return %arg1, %c0_i32, %c0_i32_0 : i32, i32, i32
  }
  func.func @transform_18(%arg0: i32, %arg1: i32) -> (i32, i32, i32) {
    %c0_i32 = arith.constant 0 : i32
    %c0_i32_0 = arith.constant 0 : i32
    %c0_i32_1 = arith.constant 0 : i32
    return %arg1, %c0_i32, %c0_i32_0 : i32, i32, i32
  }
  func.func @transform_19(%arg0: i32, %arg1: i32) -> (i32, i32, i32) {
    %c0_i32 = arith.constant 0 : i32
    %c0_i32_0 = arith.constant 0 : i32
    %c0_i32_1 = arith.constant 0 : i32
    return %arg1, %c0_i32, %c0_i32_0 : i32, i32, i32
  }
  func.func @transform_20(%arg0: i32, %arg1: i32) -> (i32, i32, i32) {
    %c0_i32 = arith.constant 0 : i32
    %c0_i32_0 = arith.constant 0 : i32
    %c0_i32_1 = arith.constant 0 : i32
    return %arg1, %c0_i32, %c0_i32_0 : i32, i32, i32
  }
  func.func @transform_21(%arg0: i32, %arg1: i32) -> (i32, i32, i32) {
    %c0_i32 = arith.constant 0 : i32
    %c0_i32_0 = arith.constant 0 : i32
    %c0_i32_1 = arith.constant 0 : i32
    return %arg1, %c0_i32, %c0_i32_0 : i32, i32, i32
  }
  func.func @transform_22(%arg0: i32, %arg1: i32) -> (i32, i32, i32) {
    %c0_i32 = arith.constant 0 : i32
    %c0_i32_0 = arith.constant 0 : i32
    %c0_i32_1 = arith.constant 0 : i32
    return %arg1, %c0_i32, %c0_i32_0 : i32, i32, i32
  }
  func.func @transform_23(%arg0: i32, %arg1: i32) -> (i32, i32, i32) {
    %c0_i32 = arith.constant 0 : i32
    %c0_i32_0 = arith.constant 0 : i32
    %c0_i32_1 = arith.constant 0 : i32
    return %arg1, %c0_i32, %c0_i32_0 : i32, i32, i32
  }
  func.func @transform_24(%arg0: i32, %arg1: i32) -> (i32, i32, i32) {
    %c0_i32 = arith.constant 0 : i32
    %c0_i32_0 = arith.constant 0 : i32
    %c0_i32_1 = arith.constant 0 : i32
    return %arg1, %c0_i32, %c0_i32_0 : i32, i32, i32
  }
  func.func @transform_25(%arg0: i32, %arg1: i32) -> (i32, i32, i32) {
    %c0_i32 = arith.constant 0 : i32
    %c0_i32_0 = arith.constant 0 : i32
    %c0_i32_1 = arith.constant 0 : i32
    return %arg1, %c0_i32, %c0_i32_0 : i32, i32, i32
  }
  func.func @transform_26(%arg0: i32, %arg1: i32) -> (i32, i32, i32) {
    %c0_i32 = arith.constant 0 : i32
    %c0_i32_0 = arith.constant 0 : i32
    %c0_i32_1 = arith.constant 0 : i32
    return %arg1, %c0_i32, %c0_i32_0 : i32, i32, i32
  }
  func.func @transform_27(%arg0: i32, %arg1: i32) -> (i32, i32, i32) {
    %c0_i32 = arith.constant 0 : i32
    %c0_i32_0 = arith.constant 0 : i32
    %c0_i32_1 = arith.constant 0 : i32
    return %arg1, %c0_i32, %c0_i32_0 : i32, i32, i32
  }
  func.func @transform_28(%arg0: i32, %arg1: i32) -> (i32, i32, i32) {
    %c0_i32 = arith.constant 0 : i32
    %c0_i32_0 = arith.constant 0 : i32
    %c0_i32_1 = arith.constant 0 : i32
    return %arg0, %c0_i32, %c0_i32_0 : i32, i32, i32
  }
}

</mosaic_0001>

<bundles_post_ra>
// kernel: tpu_custom_call.1
= control target key start
LH: loop header
LB: loop body
LE: loop exit
PB: predicated region body
PF: predicated region fallthrough
CT: control target
= control target key end

     0   :  { %s6872_s0 = inlined_call_operand.hbm [shape: f32[2,8,128], index: 0, kind: input, shape index: {}]   ;;  %s6873_s1 = inlined_call_operand.hbm [shape: f32[2,16,128], index: 1, kind: input, shape index: {}]   ;;  %s6874_s2 = inlined_call_operand.hbm [shape: f32[2,128,128], index: 2, kind: input, shape index: {}]   ;;  %s6875_s3 = inlined_call_operand.vmem [shape: f32[2,1,128], index: 3, kind: input, shape index: {}]   ;;  %s6876_s4 = inlined_call_operand.hbm [shape: f32[2,128,128], index: 4, kind: input, shape index: {}]   ;;  %s6877_s5 = inlined_call_operand.vmem [shape: f32[2,1,128], index: 5, kind: input, shape index: {}]   ;;  %s6878_s6 = inlined_call_operand.hbm [shape: f32[2,128,128], index: 6, kind: input, shape index: {}]   ;;  %s6879_s7 = inlined_call_operand.vmem [shape: f32[2,1,128], index: 7, kind: input, shape index: {}]   ;;  %s6880_s8 = inlined_call_operand.hbm [shape: f32[2,128,128], index: 8, kind: input, shape index: {}]   ;;  %s6881_s9 = inlined_call_operand.vmem [shape: f32[2,1,128], index: 9, kind: input, shape index: {}]   ;;  %s6882_s10 = inlined_call_operand.vmem [shape: f32[2,1,128], index: 10, kind: input, shape index: {}]   ;;  %s6883_s11 = inlined_call_operand.vmem [shape: f32[2,1,128], index: 11, kind: input, shape index: {}]   ;;  %s6884_s12 = inlined_call_operand.hbm [shape: f32[2,128,128], index: 12, kind: input, shape index: {}]   ;;  %s6885_s13 = inlined_call_operand.vmem [shape: f32[2,1,128], index: 13, kind: input, shape index: {}]   ;;  %s6886_s14 = inlined_call_operand.hbm [shape: f32[2,128,128], index: 14, kind: input, shape index: {}]   ;;  %s6887_s15 = inlined_call_operand.vmem [shape: f32[2,1,128], index: 15, kind: input, shape index: {}]   ;;  %s6888_s16 = inlined_call_operand.hbm [shape: f32[2,128,128], index: 16, kind: input, shape index: {}]   ;;  %s6889_s17 = inlined_call_operand.vmem [shape: f32[2,1,128], index: 17, kind: input, shape index: {}]   ;;  %s6890_s18 = inlined_call_operand.hbm [shape: f32[2,128,128], index: 18, kind: input, shape index: {}]   ;;  %s6891_s19 = inlined_call_operand.vmem [shape: f32[2,1,128], index: 19, kind: input, shape index: {}]   ;;  %s6892_s20 = inlined_call_operand.vmem [shape: f32[2,1,128], index: 20, kind: input, shape index: {}]   ;;  %s6893_s21 = inlined_call_operand.vmem [shape: f32[2,1,128], index: 21, kind: input, shape index: {}]   ;;  %s6894_s22 = inlined_call_operand.hbm [shape: f32[2,128,256], index: 22, kind: input, shape index: {}]   ;;  %s6895_s23 = inlined_call_operand.vmem [shape: f32[2,1,256], index: 23, kind: input, shape index: {}]   ;;  %s6896_s24 = inlined_call_operand.hbm [shape: f32[2,256,128], index: 24, kind: input, shape index: {}]   ;;  %s6897_s25 = inlined_call_operand.vmem [shape: f32[2,1,128], index: 25, kind: input, shape index: {}]   ;;  %s6898_s26 = inlined_call_operand.vmem [shape: f32[2,1,128], index: 26, kind: input, shape index: {}]   ;;  %s6899_s27 = inlined_call_operand.vmem [shape: f32[2,1,128], index: 27, kind: input, shape index: {}]   ;;  %s6900_s28 = inlined_call_operand.hbm [shape: f32[2,8,128], index: 28, kind: output, shape index: {}]  }
   0x1   :  { %6905 = sst [smem:[#allocation27_spill]] %s6872_s0 }
   0x2   :  { %6906 = sst [smem:[#allocation28_spill]] %s6873_s1 }
   0x3   :  { %6907 = sst [smem:[#allocation29_spill]] %s6874_s2 }
   0x4   :  { %6908 = sst [smem:[#allocation30_spill]] %s6875_s3 }
   0x5   :  { %6909 = sst [smem:[#allocation31_spill]] %s6876_s4 }
   0x6   :  { %6910 = sst [smem:[#allocation32_spill]] %s6877_s5 }
   0x7   :  { %6911 = sst [smem:[#allocation33_spill]] %s6878_s6 }
   0x8   :  { %6912 = sst [smem:[#allocation34_spill]] %s6879_s7 }
   0x9   :  { %6913 = sst [smem:[#allocation35_spill]] %s6880_s8 }
   0xa   :  { %6914 = sst [smem:[#allocation36_spill]] %s6881_s9 }
   0xb   :  { %6915 = sst [smem:[#allocation37_spill]] %s6882_s10 }
   0xc   :  { %6916 = sst [smem:[#allocation38_spill]] %s6883_s11 }
   0xd   :  { %6917 = sst [smem:[#allocation39_spill]] %s6884_s12 }
   0xe   :  { %6918 = sst [smem:[#allocation40_spill]] %s6885_s13 }
   0xf   :  { %6919 = sst [smem:[#allocation41_spill]] %s6886_s14 }
  0x10   :  { %6920 = sst [smem:[#allocation42_spill]] %s6887_s15 }
  0x11   :  { %6921 = sst [smem:[#allocation43_spill]] %s6888_s16 }
  0x12   :  { %6922 = sst [smem:[#allocation44_spill]] %s6889_s17 }
  0x13   :  { %6923 = sst [smem:[#allocation45_spill]] %s6890_s18 }
  0x14   :  { %6924 = sst [smem:[#allocation46_spill]] %s6891_s19 }
  0x15   :  { %6925 = sst [smem:[#allocation47_spill]] %s6892_s20 }
  0x16   :  { %6926 = sst [smem:[#allocation48_spill]] %s6893_s21 }
  0x17   :  { %6927 = sst [smem:[#allocation49_spill]] %s6894_s22 }
  0x18   :  { %6928 = sst [smem:[#allocation50_spill]] %s6895_s23 }
  0x19   :  { %6929 = sst [smem:[#allocation51_spill]] %s6897_s25 }
  0x1a   :  { %6930 = sst [smem:[#allocation52_spill]] %s6898_s26 }
  0x1b   :  { %6931 = sst [smem:[#allocation53_spill]] %s6899_s27 }
  0x1c   :  { %6932 = sst [smem:[#allocation54_spill]] %s6900_s28 }
  0x1d   :  { %33 = vsyncpa [#allocation4], 0 }
  0x1e   :  { %34 = vsyncpa [#allocation7], 0 }
  0x1f   :  { %35 = vsyncpa [#allocation5], 0  ;;  %s5967_s8 = smov 0   ;;  %s5969_s5 = smov 0  }
  0x20   :  { %s5971_s9 = smov 0   ;;  %s5973_s30 = smov 0  }
  0x21   :  { %s5975_s3 = smov 0   ;;  %s5977_s6 = smov 0  }
  0x22 LB: > { %6933 = sst [smem:[#allocation23_spill]] %s5790_s30  ;;  %s5996_s10 = sadd.s32 4294967295, %s5798_s6   ;;  %s5798_s6 = sphi %s5977_s6, %s41_s6   ;;  %s5794_s3 = sphi %s5975_s3, %s7007_s3   ;;  %s5790_s30 = sphi %s5973_s30, %s7006_s30   ;;  %s5786_s9 = sphi %s5971_s9, %s7005_s9   ;;  %s5782_s5 = sphi %s5969_s5, %s7004_s5   ;;  %s5778_s8 = sphi %s5967_s8, %s7003_s8  }
  0x23   : > { %6934 = sst [smem:[#allocation24_spill]] %s5798_s6  ;;  %s50_s0 = sadd.s32 1, %s5794_s3 }
  0x24   : > { %p51_p0 = scmp.ge.s32.totalorder %s50_s0, 2  ;;  %s112_s11 = sadd.s32 1, %s5786_s9 }
  0x25   : > { %p119_p1 = scmp.ne.s32.totalorder %s5786_s9, %s5782_s5  ;;  %p120_p2 = scmp.eq.s32.totalorder %s5798_s6, 0 }
  0x26   : > { %s7009_s0 = smov (%p51_p0, %s50_s0), 0  ;;  %p125_p4 = scmp.ne.s32.totalorder %s5782_s5, %s5778_s8 }
  0x27   : > { %6935 = sst [smem:[#allocation25_spill]] %s7009_s0  ;;  %p6005_p3 = por %p120_p2, %p119_p1 }
  0x28   : > { %s109_s2 = ssub.s32 %s5794_s3, %s7009_s0  ;;  %p126_p5 = scmp.eq.s32.totalorder %s5996_s10, 0 }
  0x29   : > { %p110_p6 = scmp.eq.s32.totalorder %s109_s2, 0  ;;  %p4474_p7 = scmp.ge.s32.totalorder %s5798_s6, 1 }
  0x2a   : > { %p6016_p8 = por %p126_p5, %p125_p4  ;;  %p812_p9 = scmp.lt.s32.totalorder %s5798_s6, 3 }
  0x2b   : > { %s6022_s12 = scalar_select %p110_p6, %s5786_s9, %s112_s11  }
  0x2c   : > { %p6024_p10 = pnand %p4474_p7, %p812_p9  ;;  %s5800_s4 = smov [#allocation3]  }
  0x2d   : > { %6938 = sst [smem:[#allocation26_spill]] %s6022_s12  ;;  %s827_s8 = sshll.u32 %s5800_s4, 4  ;;  %s828_s8 = int_to_ptr.vmem [resolvable:$true] %s827_s8 }
  0x2e   : > { %p5221_p11 = pneg %p6024_p10  ;;  %p5261_p13 = scmp.lt.s32.totalorder %s5798_s6, 2 }
  0x2f   : > { %s6902_s11 = sand.u32 1, %s5786_s9   ;;  %s5391_s12 = scalar_lea.vmem %s828_s8, 256 }
  0x30   : > { %p6032_p12 = pnand %p5221_p11, %p126_p5  ;;  %s6040_s0 = sshll.u32 %s6902_s11, 7 }
  0x31   : > { %p5392_p1 = scmp.ne.s32.totalorder %s828_s8, %s5391_s12  ;;  %p5399_p6 = scmp.lt.s32.totalorder %s828_s8, %s828_s8 }
  0x32   : > { %p5382_p0 = pneg %p6032_p12  ;;  %p5400_p7 = scmp.lt.s32.totalorder %s5391_s12, %s5391_s12 }
  0x34   : > { %p5394_p2 = pnand %p5392_p1, %p5382_p0  ;;  %p5401_p9 = por %p5400_p7, %p5399_p6 }
  0x36   : > { %p5395_p4 = pneg %p5394_p2 }
  0x38   : > { %p5402_p11 = pnand %p5401_p9, %p5395_p4 }
  0x3a   : > { %5405 = shalt.err (!%p5402_p11)
}
  0x3b   : > { %s5801_s4 = smov 128   ;;  %s5802_s11 = smov 8  }
  0x3c   : > { %s6941_s26 = sld [smem:[#allocation27_spill]]  ;;  %p6059_p1 = pnand %p5261_p13, %p6005_p3 }
  0x3d   : > { %s858_s23 = sand.u32 1, %s5798_s6   ;;  %s6065_s25 = sshll.u32 %s5794_s3, 11 }
  0x3e   : > { %s6943_s19 = sld [smem:[#allocation29_spill]]  ;;  %s862_s15 = scalar_lea.vmem [#allocation8], %s6040_s0 }
  0x3f   : > { %s869_s13 = sshll.u32 %s862_s15, 4  ;;  %s6072_s27 = scalar_lea.sflag [#allocation4], %s858_s23  ;;  %s870_s13 = int_to_ptr.vmem [resolvable:$true] %s869_s13 }
  0x40   : > { %p6076_p2 = pneg %p6059_p1  ;;  %s5419_s28 = scalar_lea.vmem %s870_s13, 2048 }
  0x41   : > { %p5420_p3 = scmp.ne.s32.totalorder %s870_s13, %s5419_s28  ;;  %s5803_s29 = smov [#allocation8]  }
  0x42   : > { %5224 = dma.hbm_to_vmem [thread:$0]  (!%p6032_p12), %s6941_s26, 256, %s828_s8, [#allocation4], %s5801_s4, %s5801_s4, %s5802_s11  }
  0x43   : > { %p5422_p13 = pnand %p5420_p3, %p6076_p2  ;;  %s5424_s8 = sshll.u32 %s5803_s29, 4  ;;  %s5425_s8 = int_to_ptr.vmem [resolvable:$false] %s5424_s8 }
  0x44   : > { %s868_s17 = scalar_lea.hbm %s6943_s19, %s6065_s25  ;;  %s5426_s19 = scalar_lea.vmem %s5425_s8, 4096 }
  0x45   : > { %p5423_p4 = pneg %p5422_p13  ;;  %p5427_p6 = scmp.lt.s32.totalorder %s870_s13, %s5425_s8 }
  0x46   : > { %p5428_p7 = scmp.lt.s32.totalorder %s5426_s19, %s5419_s28 }
  0x48   : > { %p5429_p9 = por %p5428_p7, %p5427_p6 }
  0x4a   : > { %p5430_p11 = pnand %p5429_p9, %p5423_p4 }
  0x4c   : > { %5433 = shalt.err (!%p5430_p11)
}
  0x4d   : > { %5231 = dma.hbm_to_vmem [thread:$0]  (!%p6059_p1), %s868_s17, 2048, %s870_s13, %s6072_s27, %s5801_s4, %s5801_s4, %s5802_s11  }
  0x4e   : > { %s6945_s21 = sld [smem:[#allocation31_spill]]  ;;  %s889_s29 = scalar_lea.vmem [#allocation9], %s6040_s0 }
  0x4f   : > { %s896_s8 = sshll.u32 %s889_s29, 4  ;;  %s5804_s19 = smov [#allocation9]   ;;  %s897_s8 = int_to_ptr.vmem [resolvable:$true] %s896_s8 }
  0x50   : > { %s5447_s28 = scalar_lea.vmem %s897_s8, 2048  ;;  %s5452_s6 = sshll.u32 %s5804_s19, 4  ;;  %s5453_s6 = int_to_ptr.vmem [resolvable:$false] %s5452_s6 }
  0x51   : > { %p5448_p3 = scmp.ne.s32.totalorder %s897_s8, %s5447_s28  ;;  %s5454_s30 = scalar_lea.vmem %s5453_s6, 4096 }
  0x52   : > { %p5455_p6 = scmp.lt.s32.totalorder %s897_s8, %s5453_s6  ;;  %p5456_p7 = scmp.lt.s32.totalorder %s5454_s30, %s5447_s28 }
  0x53   : > { %p5450_p13 = pnand %p5448_p3, %p6076_p2 }
  0x54   : > { %s895_s23 = scalar_lea.hbm %s6945_s21, %s6065_s25  ;;  %p5457_p9 = por %p5456_p7, %p5455_p6 }
  0x55   : > { %p5451_p4 = pneg %p5450_p13 }
  0x57   : > { %p5458_p11 = pnand %p5457_p9, %p5451_p4 }
  0x59   : > { %5461 = shalt.err (!%p5458_p11)
}
  0x5a   : > { %5234 = dma.hbm_to_vmem [thread:$0]  (!%p6059_p1), %s895_s23, 2048, %s897_s8, %s6072_s27, %s5801_s4, %s5801_s4, %s5802_s11  }
  0x5b   : > { %s6946_s15 = sld [smem:[#allocation33_spill]]  ;;  %s916_s21 = scalar_lea.vmem [#allocation10], %s6040_s0 }
  0x5c   : > { %s923_s6 = sshll.u32 %s916_s21, 4  ;;  %s5805_s29 = smov [#allocation10]   ;;  %s924_s6 = int_to_ptr.vmem [resolvable:$true] %s923_s6 }
  0x5d   : > { %s5475_s30 = scalar_lea.vmem %s924_s6, 2048  ;;  %s5480_s28 = sshll.u32 %s5805_s29, 4  ;;  %s5481_s28 = int_to_ptr.vmem [resolvable:$false] %s5480_s28 }
  0x5e   : > { %p5476_p3 = scmp.ne.s32.totalorder %s924_s6, %s5475_s30  ;;  %s5482_s19 = scalar_lea.vmem %s5481_s28, 4096 }
  0x5f   : > { %p5483_p6 = scmp.lt.s32.totalorder %s924_s6, %s5481_s28  ;;  %p5484_p7 = scmp.lt.s32.totalorder %s5482_s19, %s5475_s30 }
  0x60   : > { %p5478_p13 = pnand %p5476_p3, %p6076_p2 }
  0x61   : > { %s922_s20 = scalar_lea.hbm %s6946_s15, %s6065_s25  ;;  %p5485_p9 = por %p5484_p7, %p5483_p6 }
  0x62   : > { %p5479_p4 = pneg %p5478_p13 }
  0x64   : > { %p5486_p11 = pnand %p5485_p9, %p5479_p4 }
  0x66   : > { %5489 = shalt.err (!%p5486_p11)
}
  0x67   : > { %5237 = dma.hbm_to_vmem [thread:$0]  (!%p6059_p1), %s922_s20, 2048, %s924_s6, %s6072_s27, %s5801_s4, %s5801_s4, %s5802_s11  }
  0x68   : > { %s6947_s13 = sld [smem:[#allocation35_spill]]  ;;  %s943_s15 = scalar_lea.vmem [#allocation11], %s6040_s0 }
  0x69   : > { %s950_s21 = sshll.u32 %s943_s15, 4  ;;  %s5806_s29 = smov [#allocation11]   ;;  %s951_s21 = int_to_ptr.vmem [resolvable:$true] %s950_s21 }
  0x6a   : > { %s5503_s30 = scalar_lea.vmem %s951_s21, 2048  ;;  %s5508_s28 = sshll.u32 %s5806_s29, 4  ;;  %s5509_s28 = int_to_ptr.vmem [resolvable:$false] %s5508_s28 }
  0x6b   : > { %p5504_p3 = scmp.ne.s32.totalorder %s951_s21, %s5503_s30  ;;  %s5510_s19 = scalar_lea.vmem %s5509_s28, 4096 }
  0x6c   : > { %p5511_p6 = scmp.lt.s32.totalorder %s951_s21, %s5509_s28  ;;  %p5512_p7 = scmp.lt.s32.totalorder %s5510_s19, %s5503_s30 }
  0x6d   : > { %p5506_p13 = pnand %p5504_p3, %p6076_p2 }
  0x6e   : > { %s949_s17 = scalar_lea.hbm %s6947_s13, %s6065_s25  ;;  %p5513_p9 = por %p5512_p7, %p5511_p6 }
  0x6f   : > { %p5507_p4 = pneg %p5506_p13 }
  0x71   : > { %p5514_p11 = pnand %p5513_p9, %p5507_p4 }
  0x73   : > { %5517 = shalt.err (!%p5514_p11)
}
  0x74   : > { %5240 = dma.hbm_to_vmem [thread:$0]  (!%p6059_p1), %s949_s17, 2048, %s951_s21, %s6072_s27, %s5801_s4, %s5801_s4, %s5802_s11  }
  0x75   : > { %s6948_s23 = sld [smem:[#allocation39_spill]]  ;;  %s982_s13 = scalar_lea.vmem [#allocation12], %s6040_s0 }
  0x76   : > { %s989_s15 = sshll.u32 %s982_s13, 4  ;;  %s5807_s29 = smov [#allocation12]   ;;  %s990_s15 = int_to_ptr.vmem [resolvable:$true] %s989_s15 }
  0x77   : > { %s5531_s30 = scalar_lea.vmem %s990_s15, 2048  ;;  %s5536_s28 = sshll.u32 %s5807_s29, 4  ;;  %s5537_s28 = int_to_ptr.vmem [resolvable:$false] %s5536_s28 }
  0x78   : > { %p5532_p3 = scmp.ne.s32.totalorder %s990_s15, %s5531_s30  ;;  %s5538_s19 = scalar_lea.vmem %s5537_s28, 4096 }
  0x79   : > { %p5539_p6 = scmp.lt.s32.totalorder %s990_s15, %s5537_s28  ;;  %p5540_p7 = scmp.lt.s32.totalorder %s5538_s19, %s5531_s30 }
  0x7a   : > { %p5534_p13 = pnand %p5532_p3, %p6076_p2 }
  0x7b   : > { %s988_s8 = scalar_lea.hbm %s6948_s23, %s6065_s25  ;;  %p5541_p9 = por %p5540_p7, %p5539_p6 }
  0x7c   : > { %p5535_p4 = pneg %p5534_p13 }
  0x7e   : > { %p5542_p11 = pnand %p5541_p9, %p5535_p4 }
  0x80   : > { %5545 = shalt.err (!%p5542_p11)
}
  0x81   : > { %5243 = dma.hbm_to_vmem [thread:$0]  (!%p6059_p1), %s988_s8, 2048, %s990_s15, %s6072_s27, %s5801_s4, %s5801_s4, %s5802_s11  }
  0x82   : > { %s6949_s14 = sld [smem:[#allocation41_spill]]  ;;  %s1009_s6 = scalar_lea.vmem [#allocation13], %s6040_s0 }
  0x83   : > { %s1016_s23 = sshll.u32 %s1009_s6, 4  ;;  %s5808_s30 = smov [#allocation13]   ;;  %s1017_s23 = int_to_ptr.vmem [resolvable:$true] %s1016_s23 }
  0x84   : > { %s5559_s13 = scalar_lea.vmem %s1017_s23, 2048  ;;  %s5564_s29 = sshll.u32 %s5808_s30, 4  ;;  %s5565_s29 = int_to_ptr.vmem [resolvable:$false] %s5564_s29 }
  0x85   : > { %p5560_p3 = scmp.ne.s32.totalorder %s1017_s23, %s5559_s13  ;;  %s5566_s28 = scalar_lea.vmem %s5565_s29, 4096 }
  0x86   : > { %p5567_p6 = scmp.lt.s32.totalorder %s1017_s23, %s5565_s29  ;;  %p5568_p7 = scmp.lt.s32.totalorder %s5566_s28, %s5559_s13 }
  0x87   : > { %p5562_p13 = pnand %p5560_p3, %p6076_p2 }
  0x88   : > { %s1015_s20 = scalar_lea.hbm %s6949_s14, %s6065_s25  ;;  %p5569_p9 = por %p5568_p7, %p5567_p6 }
  0x89   : > { %p5563_p4 = pneg %p5562_p13 }
  0x8b   : > { %p5570_p11 = pnand %p5569_p9, %p5563_p4 }
  0x8d   : > { %5573 = shalt.err (!%p5570_p11)
}
  0x8e   : > { %5246 = dma.hbm_to_vmem [thread:$0]  (!%p6059_p1), %s1015_s20, 2048, %s1017_s23, %s6072_s27, %s5801_s4, %s5801_s4, %s5802_s11  }
  0x8f   : > { %s6950_s16 = sld [smem:[#allocation43_spill]]  ;;  %s1036_s17 = scalar_lea.vmem [#allocation14], %s6040_s0 }
  0x90   : > { %s1043_s21 = sshll.u32 %s1036_s17, 4  ;;  %s5809_s13 = smov [#allocation14]   ;;  %s1044_s21 = int_to_ptr.vmem [resolvable:$true] %s1043_s21 }
  0x91   : > { %s5587_s6 = scalar_lea.vmem %s1044_s21, 2048  ;;  %s5592_s30 = sshll.u32 %s5809_s13, 4  ;;  %s5593_s30 = int_to_ptr.vmem [resolvable:$false] %s5592_s30 }
  0x92   : > { %p5588_p3 = scmp.ne.s32.totalorder %s1044_s21, %s5587_s6  ;;  %s5594_s29 = scalar_lea.vmem %s5593_s30, 4096 }
  0x93   : > { %p5595_p6 = scmp.lt.s32.totalorder %s1044_s21, %s5593_s30  ;;  %p5596_p7 = scmp.lt.s32.totalorder %s5594_s29, %s5587_s6 }
  0x94   : > { %p5590_p13 = pnand %p5588_p3, %p6076_p2 }
  0x95   : > { %s1042_s19 = scalar_lea.hbm %s6950_s16, %s6065_s25  ;;  %p5597_p9 = por %p5596_p7, %p5595_p6 }
  0x96   : > { %p5591_p4 = pneg %p5590_p13 }
  0x98   : > { %p5598_p11 = pnand %p5597_p9, %p5591_p4 }
  0x9a   : > { %5601 = shalt.err (!%p5598_p11)
}
  0x9b   : > { %5249 = dma.hbm_to_vmem [thread:$0]  (!%p6059_p1), %s1042_s19, 2048, %s1044_s21, %s6072_s27, %s5801_s4, %s5801_s4, %s5802_s11  }
  0x9c   : > { %s6951_s18 = sld [smem:[#allocation45_spill]]  ;;  %s1063_s8 = scalar_lea.vmem [#allocation15], %s6040_s0 }
  0x9d   : > { %s1070_s15 = sshll.u32 %s1063_s8, 4  ;;  %s6952_s17 = sand.u32 1, %s5786_s9   ;;  %s1071_s15 = int_to_ptr.vmem [resolvable:$true] %s1070_s15 }
  0x9e   : > { %s6173_s6 = sshll.u32 %s6952_s17, 8  ;;  %s5615_s13 = scalar_lea.vmem %s1071_s15, 2048 }
  0x9f   : > { %p5616_p3 = scmp.ne.s32.totalorder %s1071_s15, %s5615_s13  ;;  %s5810_s30 = smov [#allocation15]  }
  0xa0   : > { %s5620_s29 = sshll.u32 %s5810_s30, 4  ;;  %s5621_s29 = int_to_ptr.vmem [resolvable:$false] %s5620_s29 }
  0xa1   : > { %p5618_p13 = pnand %p5616_p3, %p6076_p2  ;;  %s5622_s14 = scalar_lea.vmem %s5621_s29, 4096 }
  0xa2   : > { %s1069_s28 = scalar_lea.hbm %s6951_s18, %s6065_s25  ;;  %p5623_p6 = scmp.lt.s32.totalorder %s1071_s15, %s5621_s29 }
  0xa3   : > { %p5619_p4 = pneg %p5618_p13  ;;  %p5624_p7 = scmp.lt.s32.totalorder %s5622_s14, %s5615_s13 }
  0xa5   : > { %p5625_p9 = por %p5624_p7, %p5623_p6 }
  0xa7   : > { %p5626_p11 = pnand %p5625_p9, %p5619_p4 }
  0xa9   : > { %5629 = shalt.err (!%p5626_p11)
}
  0xaa   : > { %5252 = dma.hbm_to_vmem [thread:$0]  (!%p6059_p1), %s1069_s28, 2048, %s1071_s15, %s6072_s27, %s5801_s4, %s5801_s4, %s5802_s11  }
  0xab   : > { %s4579_s25 = sshll.u32 %s5794_s3, 12  ;;  %s6953_s22 = sld [smem:[#allocation49_spill]] }
  0xac   : > { %s1102_s20 = scalar_lea.vmem [#allocation16], %s6173_s6  ;;  %s5811_s8 = smov [#allocation16]  }
  0xad   : > { %s1109_s14 = sshll.u32 %s1102_s20, 4  ;;  %s5648_s17 = sshll.u32 %s5811_s8, 4  ;;  %s1110_s14 = int_to_ptr.vmem [resolvable:$true] %s1109_s14  ;;  %s5649_s17 = int_to_ptr.vmem [resolvable:$false] %s5648_s17 }
  0xae   : > { %s5643_s23 = scalar_lea.vmem %s1110_s14, 4096  ;;  %s5650_s13 = scalar_lea.vmem %s5649_s17, 8192 }
  0xaf   : > { %p5644_p3 = scmp.ne.s32.totalorder %s1110_s14, %s5643_s23  ;;  %p5651_p6 = scmp.lt.s32.totalorder %s1110_s14, %s5649_s17 }
  0xb0   : > { %p5652_p7 = scmp.lt.s32.totalorder %s5650_s13, %s5643_s23 }
  0xb1   : > { %s1108_s21 = scalar_lea.hbm %s6953_s22, %s4579_s25  ;;  %p5646_p13 = pnand %p5644_p3, %p6076_p2 }
  0xb2   : > { %p5653_p9 = por %p5652_p7, %p5651_p6 }
  0xb3   : > { %p5647_p4 = pneg %p5646_p13 }
  0xb5   : > { %p5654_p11 = pnand %p5653_p9, %p5647_p4 }
  0xb7   : > { %5657 = shalt.err (!%p5654_p11)
}
  0xb8   : > { %s5812_s28 = smov 256   ;;  %s5813_s15 = smov 16  }
  0xb9   : > { %5255 = dma.hbm_to_vmem [thread:$0]  (!%p6059_p1), %s1108_s21, 4096, %s1110_s14, %s6072_s27, %s5812_s28, %s5812_s28, %s5813_s15  }
  0xba   : > { %s5814_s30 = smov [#allocation6]   ;;  %s6196_s20 = scalar_lea.hbm %s6896_s24, %s4579_s25 }
  0xbb   : > { %s844_s29 = sshll.u32 %s5814_s30, 4  ;;  %s845_s29 = int_to_ptr.vmem [resolvable:$true] %s844_s29 }
  0xbc   : > { %s5669_s8 = scalar_lea.vmem %s845_s29, 512  ;;  %p5677_p6 = scmp.lt.s32.totalorder %s845_s29, %s845_s29 }
  0xbd   : > { %p5670_p3 = scmp.ne.s32.totalorder %s845_s29, %s5669_s8  ;;  %p5678_p7 = scmp.lt.s32.totalorder %s5669_s8, %s5669_s8 }
  0xbf   : > { %p5672_p13 = pnand %p5670_p3, %p5382_p0  ;;  %p5679_p9 = por %p5678_p7, %p5677_p6 }
  0xc1   : > { %p5673_p4 = pneg %p5672_p13 }
  0xc3   : > { %p5680_p11 = pnand %p5679_p9, %p5673_p4 }
  0xc5   : > { %5683 = shalt.err (!%p5680_p11)
}
  0xc6   : > { %s6954_s25 = sld [smem:[#allocation28_spill]]  ;;  %s1130_s23 = scalar_lea.vmem [#allocation17], %s6173_s6 }
  0xc7   : > { %s1137_s17 = sshll.u32 %s1130_s23, 4  ;;  %s5815_s28 = smov [#allocation17]   ;;  %s1138_s17 = int_to_ptr.vmem [resolvable:$true] %s1137_s17 }
  0xc8   : > { %s5697_s13 = scalar_lea.vmem %s1138_s17, 4096  ;;  %s5702_s15 = sshll.u32 %s5815_s28, 4  ;;  %s5703_s15 = int_to_ptr.vmem [resolvable:$false] %s5702_s15 }
  0xc9   : > { %p5698_p0 = scmp.ne.s32.totalorder %s1138_s17, %s5697_s13  ;;  %s5704_s2 = scalar_lea.vmem %s5703_s15, 8192 }
  0xca   : > { %p5705_p4 = scmp.lt.s32.totalorder %s1138_s17, %s5703_s15  ;;  %p5706_p6 = scmp.lt.s32.totalorder %s5704_s2, %s5697_s13 }
  0xcb   : > { %p5700_p3 = pnand %p5698_p0, %p6076_p2 }
  0xcc   : > { %5227 = dma.hbm_to_vmem [thread:$0]  (!%p6032_p12), %s6954_s25, 512, %s845_s29, [#allocation7], %s5801_s4, %s5801_s4, %s5802_s11  }
  0xcd   : > { %p5701_p13 = pneg %p5700_p3  ;;  %p5707_p7 = por %p5706_p6, %p5705_p4 }
  0xcf   : > { %p5708_p9 = pnand %p5707_p7, %p5701_p13 }
  0xd1   : > { %5711 = shalt.err (!%p5708_p9)
}
  0xd2   : > { %5258 = dma.hbm_to_vmem [thread:$0]  (!%p6059_p1), %s6196_s20, 4096, %s1138_s17, %s6072_s27, %s5801_s4, %s5801_s4, %s5802_s11  }
  0xd3   : > { %1167 = sbr.rel (%p6024_p10) target bundleno = 5133 (0x140d), region = 132 }
  0xd8   : > { %5761 = dma.done.wait (%p126_p5), [#allocation4], 256  }
  0xd9   : > { %5763 = vsyncadd (%p126_p5), [#allocation4], 4294967040 }
  0xda   : > { %5765 = dma.done.wait (%p126_p5), [#allocation7], 512  }
  0xdb   : > { %5767 = vsyncadd (%p126_p5), [#allocation7], 4294966784  ;;  %s1177_s12 = sand.u32 1, %s5996_s10   ;;  %s1179_s11 = sand.u32 1, %s5782_s5  }
  0xdc   : > { %s6231_s4 = sshll.u32 %s1179_s11, 7  ;;  %s1178_s1 = scalar_lea.sflag [#allocation4], %s1177_s12 }
  0xdd   : > { %s6234_s27 = scalar_lea.vmem [#allocation8], %s6231_s4 }
  0xde   : > { %5769 = dma.done.wait (%p6016_p8), %s1178_s1, 24576  }
  0xdf   : > { %5771 = vsyncadd (%p6016_p8), %s1178_s1, 4294942720  ;;  %s6955_s26 = sld [smem:[#allocation23_spill]]  ;;  %s4519_s6 = sshll.u32 %s1179_s11, 8 }
  0xe0   : > { %s6967_s23 = sld [smem:[#allocation48_spill]]  ;;  %s6311_s21 = scalar_lea.vmem [#allocation9], %s6231_s4 }
  0xe1   : > { %s6968_s15 = sld [smem:[#allocation51_spill]]  ;;  %s6317_s25 = scalar_lea.vmem [#allocation11], %s6231_s4 }
  0xe2   : > { %s6969_s11 = sld [smem:[#allocation50_spill]]  ;;  %s6323_s17 = scalar_lea.vmem [#allocation13], %s6231_s4 }
  0xe3   : > { %s6970_s7 = sld [smem:[#allocation52_spill]]  ;;  %s6329_s28 = scalar_lea.vmem [#allocation15], %s6231_s4 }
  0xe4   : > { %s6971_s20 = sld [smem:[#allocation53_spill]]  ;;  %s6331_s12 = scalar_lea.vmem [#allocation16], %s4519_s6 }
  0xe5   : > { %p1426_p5 = scmp.lt.s32.totalorder %s6955_s26, 1  ;;  %s6333_s2 = scalar_lea.vmem [#allocation17], %s4519_s6 }
  0xe6   : > { %p4522_p8 = scmp.ne.s32.totalorder %s6955_s26, 0 }
  0xe7   : > { %s6242_s30 = scalar_select %p1426_p5, %s6955_s26, 1 }
  0xe9   : > { %s1461_s18 = scalar_lea.vmem %s6967_s23, %s6242_s30  ;;  %s4521_s13 = sshll.u32 %s6242_s30, 1 }
  0xea   : > { %s1468_s22 = scalar_lea.vmem %s6968_s15, %s6242_s30  ;;  %s6300_s1 = scalar_lea.vmem %s6969_s11, %s4521_s13 }
  0xeb   : > { %s1471_s19 = scalar_lea.vmem %s6970_s7, %s6242_s30  ;;  %s1474_s14 = scalar_lea.vmem %s6971_s20, %s6242_s30 }
  0xec   : > { %s6314_s23 = scalar_lea.vmem [#allocation10], %s6231_s4  ;;  %s6320_s15 = scalar_lea.vmem [#allocation12], %s6231_s4 }
  0xed   : > { %s6326_s13 = scalar_lea.vmem [#allocation14], %s6231_s4  ;;  %1479 = sbr.rel (%p4522_p8) target bundleno = 244 (0xf4), region = 184 }
  0xf2   : > { %v1480_v0 = vld [vmem:[#allocation3] sm:$0xff]  ;;  %v1481_v1 = vld [vmem:[#allocation3 + $0x8] sm:$0xff] }
  0xf3   : > { %1482 = vst [vmem:[#allocation2] sm:$0xff] %v1480_v0  ;;  %1483 = vst [vmem:[#allocation2 + $0x8] sm:$0xff] %v1481_v1 }
  0xf4 PF: > { %v1608_v2 = vld [vmem:[%s6311_s21 + $0x78] sm:$0xff]  ;;  %v1607_v4 = vld [vmem:[%s6311_s21 + $0x70] sm:$0xff]  ;;  %v1606_v6 = vld [vmem:[%s6311_s21 + $0x68] sm:$0xff]  ;;  %v5816_v36 = vmov 0.0   ;;  %vm5817_vm0 = vmmov 0   ;;  %s6972_s26 = sld [smem:[#allocation32_spill]]  ;;  %v1484_v63 = vlaneseq }
  0xf5   : > { %v1510_v3 = vld [vmem:[%s6234_s27 + $0x78] sm:$0xff]  ;;  %4842 = vmatprep.subr.mxu1 %v1608_v2  ;;  %v1509_v5 = vld [vmem:[%s6234_s27 + $0x70] sm:$0xff]  ;;  %v1508_v7 = vld [vmem:[%s6234_s27 + $0x68] sm:$0xff]  ;;  %vm1789_vm1 = vcmask 523264   ;;  %s6974_s29 = sld [smem:[#allocation30_spill]]  ;;  %vm1944_vm3 = vcmask 64512  }
  0xf6   : > { %4807 = vmatprep.subr.mxu0 %v1510_v3  ;;  %4843 = vmatpush3.msra.mxu1 %v1608_v2  ;;  %v1605_v8 = vld [vmem:[%s6311_s21 + $0x60] sm:$0xff]  ;;  %v1604_v10 = vld [vmem:[%s6311_s21 + $0x58] sm:$0xff]  ;;  %v1603_v12 = vld [vmem:[%s6311_s21 + $0x50] sm:$0xff]  ;;  %v6429_v0 = vshrl.u32 %v1484_v63, 7  ;;  %v6431_v1 = vand.u32 127, %v1484_v63  ;;  %s5818_s8 = smov 64  }
  0xf7   : > { %4808 = vmatpush3.msra.mxu0 %v1510_v3  ;;  %4844 = vmatprep.subr.mxu1 %v1607_v4  ;;  %v1507_v9 = vld [vmem:[%s6234_s27 + $0x60] sm:$0xff]  ;;  %v1506_v11 = vld [vmem:[%s6234_s27 + $0x58] sm:$0xff]  ;;  %v1505_v13 = vld [vmem:[%s6234_s27 + $0x50] sm:$0xff]  ;;  %vm3082_vm4 = vcmask 130048  }
  0xf8   : > { %4809 = vmatprep.subr.mxu0 %v1509_v5  ;;  %4845 = vmatpush3.msra.mxu1 %v1607_v4  ;;  %v1602_v14 = vld [vmem:[%s6311_s21 + $0x48] sm:$0xff]  ;;  %v1601_v16 = vld [vmem:[%s6311_s21 + $0x40] sm:$0xff]  ;;  %v1600_v18 = vld [vmem:[%s6311_s21 + $0x38] sm:$0xff]  ;;  %vm1488_vm2 = vcmp.ge.s32.totalorder %v6429_v0, %v6431_v1 }
  0xf9   : > { %4810 = vmatpush3.msra.mxu0 %v1509_v5  ;;  %4846 = vmatprep.subr.mxu1 %v1606_v6  ;;  %v1504_v15 = vld [vmem:[%s6234_s27 + $0x48] sm:$0xff]  ;;  %v1503_v17 = vld [vmem:[%s6234_s27 + $0x40] sm:$0xff]  ;;  %v1502_v19 = vld [vmem:[%s6234_s27 + $0x38] sm:$0xff] }
  0xfa   : > { %4811 = vmatprep.subr.mxu0 %v1508_v7  ;;  %4847 = vmatpush3.msra.mxu1 %v1606_v6  ;;  %v1599_v20 = vld [vmem:[%s6311_s21 + $0x30] sm:$0xff]  ;;  %v1598_v22 = vld [vmem:[%s6311_s21 + $0x28] sm:$0xff]  ;;  %v1597_v24 = vld [vmem:[%s6311_s21 + $0x20] sm:$0xff]  ;;  %s6973_s6 = scalar_lea.vmem %s6972_s26, %s6242_s30 }
  0xfb   : > { %4812 = vmatpush3.msra.mxu0 %v1508_v7  ;;  %4848 = vmatprep.subr.mxu1 %v1605_v8  ;;  %v1501_v21 = vld [vmem:[%s6234_s27 + $0x30] sm:$0xff]  ;;  %v1500_v23 = vld [vmem:[%s6234_s27 + $0x28] sm:$0xff]  ;;  %v1499_v25 = vld [vmem:[%s6234_s27 + $0x20] sm:$0xff]  ;;  %s6975_s7 = scalar_lea.vmem %s6974_s29, %s6242_s30  ;;  %s6990_s29 = sld [smem:[#allocation46_spill]] }
  0xfc   : > { %4813 = vmatprep.subr.mxu0 %v1507_v9  ;;  %4849 = vmatpush3.msra.mxu1 %v1605_v8  ;;  %v1596_v26 = vld [vmem:[%s6311_s21 + $0x18] sm:$0xff]  ;;  %v1595_v28 = vld [vmem:[%s6311_s21 + $0x10] sm:$0xff]  ;;  %v1594_v30 = vld [vmem:[%s6311_s21 + $0x8] sm:$0xff] }
  0xfd   : > { %4814 = vmatpush3.msra.mxu0 %v1507_v9  ;;  %4850 = vmatprep.subr.mxu1 %v1604_v10  ;;  %v1498_v27 = vld [vmem:[%s6234_s27 + $0x18] sm:$0xff]  ;;  %v1497_v29 = vld [vmem:[%s6234_s27 + $0x10] sm:$0xff]  ;;  %v1496_v31 = vld [vmem:[%s6234_s27 + $0x8] sm:$0xff] }
  0xfe   : > { %4815 = vmatprep.subr.mxu0 %v1506_v11  ;;  %4851 = vmatpush3.msra.mxu1 %v1604_v10  ;;  %v1593_v32 = vld [vmem:[%s6311_s21] sm:$0xff]  ;;  %v6370_v35 = vld [vmem:[#allocation2 + $0x8] sm:$0xff]  ;;  %v1706_v47 = vld [vmem:[%s6314_s23 + $0x78] sm:$0xff]  ;;  %s6976_s21 = sld [smem:[#allocation34_spill]] }
  0xff   : > { %4816 = vmatpush3.msra.mxu0 %v1506_v11  ;;  %4852 = vmatprep.subr.mxu1 %v1603_v12  ;;  %v6367_v33 = vld [vmem:[#allocation2] sm:$0xff]  ;;  %v1705_v48 = vld [vmem:[%s6314_s23 + $0x70] sm:$0xff]  ;;  %v1704_v49 = vld [vmem:[%s6314_s23 + $0x68] sm:$0xff] }
 0x100   : > { %4817 = vmatprep.subr.mxu0 %v1505_v13  ;;  %4853 = vmatpush3.msra.mxu1 %v1603_v12  ;;  %v1495_v34 = vld [vmem:[%s6234_s27] sm:$0xff]  ;;  %v1702_v51 = vld [vmem:[%s6314_s23 + $0x58] sm:$0xff]  ;;  %v1701_v52 = vld [vmem:[%s6314_s23 + $0x50] sm:$0xff]  ;;  %s6978_s27 = sld [smem:[#allocation36_spill]] }
 0x101   : > { %4818 = vmatpush3.msra.mxu0 %v1505_v13  ;;  %4854 = vmatprep.subr.mxu1 %v1602_v14  ;;  %v4524_v38 = vld [vmem:[%s6973_s6] ss:$0 sm:$0xff]  ;;  %v1700_v53 = vld [vmem:[%s6314_s23 + $0x48] sm:$0xff]  ;;  %v1698_v55 = vld [vmem:[%s6314_s23 + $0x38] sm:$0xff]  ;;  %s6980_s6 = sld [smem:[#allocation37_spill]] }
 0x102   : > { %4819 = vmatprep.subr.mxu0 %v1504_v15  ;;  %4855 = vmatpush3.msra.mxu1 %v1602_v14  ;;  %v4523_v41 = vld [vmem:[%s6975_s7] ss:$0 sm:$0xff]  ;;  %v1697_v56 = vld [vmem:[%s6314_s23 + $0x30] sm:$0xff]  ;;  %v1696_v57 = vld [vmem:[%s6314_s23 + $0x28] sm:$0xff]  ;;  %s6982_s7 = sld [smem:[#allocation38_spill]] }
 0x103   : > { %4820 = vmatpush3.msra.mxu0 %v1504_v15  ;;  %4856 = vmatprep.subr.mxu1 %v1601_v16  ;;  %v1703_v50 = vld [vmem:[%s6314_s23 + $0x60] sm:$0xff]  ;;  %v1694_v59 = vld [vmem:[%s6314_s23 + $0x18] sm:$0xff]  ;;  %v1693_v60 = vld [vmem:[%s6314_s23 + $0x10] sm:$0xff] }
 0x104   : > { %4821 = vmatprep.subr.mxu0 %v1503_v17  ;;  %4857 = vmatpush3.msra.mxu1 %v1601_v16  ;;  %v1699_v54 = vld [vmem:[%s6314_s23 + $0x40] sm:$0xff]  ;;  %v1692_v61 = vld [vmem:[%s6314_s23 + $0x8] sm:$0xff] }
 0x105   : > { %4822 = vmatpush3.msra.mxu0 %v1503_v17  ;;  %4858 = vmatprep.subr.mxu1 %v1600_v18  ;;  %v1695_v58 = vld [vmem:[%s6314_s23 + $0x20] sm:$0xff] }
 0x106   : > { %4823 = vmatprep.subr.mxu0 %v1502_v19  ;;  %4859 = vmatpush3.msra.mxu1 %v1600_v18  ;;  %v1691_v62 = vld [vmem:[%s6314_s23] sm:$0xff]  ;;  %s6977_s23 = scalar_lea.vmem %s6976_s21, %s6242_s30  ;;  %s6979_s26 = scalar_lea.vmem %s6978_s27, %s6242_s30 }
 0x107   : > { %4824 = vmatpush3.msra.mxu0 %v1502_v19  ;;  %4860 = vmatprep.subr.mxu1 %v1599_v20  ;;  %s6981_s11 = scalar_lea.vmem %s6980_s6, %s6242_s30  ;;  %s6986_s27 = sld [smem:[#allocation40_spill]] }
 0x108   : > { %4825 = vmatprep.subr.mxu0 %v1501_v21  ;;  %4861 = vmatpush3.msra.mxu1 %v1599_v20  ;;  %s6983_s16 = scalar_lea.vmem %s6982_s7, %s6242_s30  ;;  %s6988_s6 = sld [smem:[#allocation44_spill]] }
 0x109   : > { %4826 = vmatpush3.msra.mxu0 %v1501_v21  ;;  %4862 = vmatprep.subr.mxu1 %v1598_v22  ;;  %v4525_v21 = vld [vmem:[%s6977_s23] ss:$0 sm:$0xff]  ;;  %s6984_s23 = sld [smem:[#allocation42_spill]]  ;;  %s6991_s7 = scalar_lea.vmem %s6990_s29, %s6242_s30 }
 0x10a   : > { %4827 = vmatprep.subr.mxu0 %v1500_v23  ;;  %4863 = vmatpush3.msra.mxu1 %v1598_v22 }
 0x10b   : > { %4828 = vmatpush3.msra.mxu0 %v1500_v23  ;;  %4864 = vmatprep.subr.mxu1 %v1597_v24 }
 0x10c   : > { %4829 = vmatprep.subr.mxu0 %v1499_v25  ;;  %4865 = vmatpush3.msra.mxu1 %v1597_v24 }
 0x10d   : > { %4830 = vmatpush3.msra.mxu0 %v1499_v25  ;;  %4866 = vmatprep.subr.mxu1 %v1596_v26 }
 0x10e   : > { %4831 = vmatprep.subr.mxu0 %v1498_v27  ;;  %4867 = vmatpush3.msra.mxu1 %v1596_v26 }
 0x10f   : > { %4832 = vmatpush3.msra.mxu0 %v1498_v27  ;;  %4868 = vmatprep.subr.mxu1 %v1595_v28 }
 0x110   : > { %4833 = vmatprep.subr.mxu0 %v1497_v29  ;;  %4869 = vmatpush3.msra.mxu1 %v1595_v28 }
 0x111   : > { %4834 = vmatpush3.msra.mxu0 %v1497_v29  ;;  %4870 = vmatprep.subr.mxu1 %v1594_v30 }
 0x112   : > { %4835 = vmatprep.subr.mxu0 %v1496_v31  ;;  %4871 = vmatpush3.msra.mxu1 %v1594_v30 }
 0x113   : > { %4836 = vmatpush3.msra.mxu0 %v1496_v31  ;;  %4872 = vmatprep.subr.mxu1 %v1593_v32 }
 0x114   : > { %4874 = vmatprep.mubr.f32.mxu1 %v6367_v33  ;;  %4873 = vmatpush3.msra.mxu1 %v1593_v32 }
 0x115   : > { %4837 = vmatprep.subr.mxu0 %v1495_v34  ;;  %4875 = vmatmul.mubr.f32.vlgmr.msra.gmra.mxu1 %v6370_v35 }
 0x116   : > { %4838 = vmatpush3.msra.mxu0 %v1495_v34  ;;  %4839 = vmatprep.mubr.f32.mxu0 %v6367_v33 }
 0x117   : > { %4840 = vmatmul.mubr.f32.vlgmr.msra.gmra.mxu0 %v6370_v35  ;;  %4912 = vmatprep.subr.mxu1 %v5816_v36 }
 0x118   : > { %4909 = vmatprep.mubr.f32.mxu0 %v6367_v33  ;;  %4914 = vmatprep.mubr.msk.f32.mxu1 %vm5817_vm0, %v5816_v36 }
 0x119   : > { %4877 = vmatprep.subr.mxu0 %v1706_v47 }
 0x11a   : > { %4878 = vmatpush3.msra.mxu0 %v1706_v47 }
 0x11b   : > { %4879 = vmatprep.subr.mxu0 %v1705_v48 }
 0x11c   : > { %4880 = vmatpush3.msra.mxu0 %v1705_v48 }
 0x11d   : > { %4881 = vmatprep.subr.mxu0 %v1704_v49 }
 0x11e   : > { %4882 = vmatpush3.msra.mxu0 %v1704_v49 }
 0x11f   : > { %4883 = vmatprep.subr.mxu0 %v1703_v50 }
 0x120   : > { %4884 = vmatpush3.msra.mxu0 %v1703_v50 }
 0x121   : > { %4885 = vmatprep.subr.mxu0 %v1702_v51 }
 0x122   : > { %4886 = vmatpush3.msra.mxu0 %v1702_v51 }
 0x123   : > { %4887 = vmatprep.subr.mxu0 %v1701_v52 }
 0x124   : > { %4888 = vmatpush3.msra.mxu0 %v1701_v52 }
 0x125   : > { %4889 = vmatprep.subr.mxu0 %v1700_v53 }
 0x126   : > { %4890 = vmatpush3.msra.mxu0 %v1700_v53 }
 0x127   : > { %4891 = vmatprep.subr.mxu0 %v1699_v54 }
 0x128   : > { %4892 = vmatpush3.msra.mxu0 %v1699_v54 }
 0x129   : > { %4893 = vmatprep.subr.mxu0 %v1698_v55 }
 0x12a   : > { %4894 = vmatpush3.msra.mxu0 %v1698_v55 }
 0x12b   : > { %4895 = vmatprep.subr.mxu0 %v1697_v56 }
 0x12c   : > { %4896 = vmatpush3.msra.mxu0 %v1697_v56 }
 0x12d   : > { %4897 = vmatprep.subr.mxu0 %v1696_v57 }
 0x12e   : > { %4898 = vmatpush3.msra.mxu0 %v1696_v57 }
 0x12f   : > { %4899 = vmatprep.subr.mxu0 %v1695_v58 }
 0x130   : > { %4900 = vmatpush3.msra.mxu0 %v1695_v58 }
 0x131   : > { %4901 = vmatprep.subr.mxu0 %v1694_v59 }
 0x132   : > { %4902 = vmatpush3.msra.mxu0 %v1694_v59 }
 0x133   : > { %4903 = vmatprep.subr.mxu0 %v1693_v60 }
 0x134   : > { %4904 = vmatpush3.msra.mxu0 %v1693_v60 }
 0x135   : > { %4905 = vmatprep.subr.mxu0 %v1692_v61 }
 0x136   : > { %4906 = vmatpush3.msra.mxu0 %v1692_v61 }
 0x137   : > { %4907 = vmatprep.subr.mxu0 %v1691_v62 }
 0x138   : > { %4908 = vmatpush3.msra.mxu0 %v1691_v62 }
 0x139   : > { %4910 = vmatmul.mubr.f32.vlgmr.msra.gmra.mxu0 %v6370_v35 }
 0x1d5   : > { %v4876_v37 = vpop.f32.mrf.mxu1 }
 0x1d6   : > { %v6397_v45 = vadd.f32 %v4876_v37, %v4524_v38 }
 0x1d7   : > { %v4841_v39 = vpop.f32.mrf.mxu0  ;;  %v1682_v40 = vpop.f32.mrf.mxu1 }
 0x1d8   : > { %v6390_v42 = vadd.f32 %v4524_v38, %v1682_v40  ;;  %v6405_v46 = vadd.f32 %v4841_v39, %v4523_v41 }
 0x1d9   : > { %v1584_v43 = vpop.f32.mrf.mxu0 }
 0x1da   : > { %4913 = vmatpush3.xpose.msk.msra.mxu1 %vm1789_vm1, %v6390_v42  ;;  %v6394_v44 = vadd.f32 %v4523_v41, %v1584_v43 }
 0x1db   : > { %4917 = vmatprep.subr.mxu1 %v5816_v36 }
 0x1dd   : > { %4915 = vmatmul.mubr.msk.f32.vlgmr.msra.gmra.mxu1 %vm1789_vm1, %v6394_v44 }
 0x1de   : > { %4918 = vmatpush3.xpose.msk.msra.mxu1 %vm1789_vm1, %v6397_v45  ;;  %4919 = vmatprep.mubr.msk.f32.mxu1 %vm5817_vm0, %v5816_v36 }
 0x1df   : > { %4922 = vmatprep.subr.mxu1 %v5816_v36 }
 0x1e1   : > { %4920 = vmatmul.mubr.msk.f32.vlgmr.msra.gmra.mxu1 %vm1789_vm1, %v6405_v46 }
 0x1e2   : > { %4924 = vmatprep.mubr.msk.f32.mxu1 %vm5817_vm0, %v5816_v36 }
 0x1f9   : > { %v4911_v20 = vpop.f32.mrf.mxu0 }
 0x1fa   : > { %v1786_v23 = vadd.f32 %v4911_v20, %v4525_v21  ;;  %v2481_v20 = vld [vmem:[%s6317_s25 + $0x60] sm:$0xff] }
 0x1fb   : > { %v1780_v22 = vpop.f32.mrf.mxu0 }
 0x1fc   : > { %v6456_v24 = vadd.f32 %v4525_v21, %v1780_v22  ;;  %v2480_v21 = vld [vmem:[%s6317_s25 + $0x58] sm:$0xff]  ;;  %v2479_v22 = vld [vmem:[%s6317_s25 + $0x50] sm:$0xff] }
 0x1fe   : > { %4923 = vmatpush3.msra.mxu1 %v6456_v24 }
 0x1ff   : > { %4927 = vmatprep.subr.mxu1 %v5816_v36 }
 0x29d   : > { %v1862_v2 = vpop.f32.mrf.mxu1 }
 0x29e   : > { %v1942_v3 = vsel %vm1488_vm2, %v1862_v2, -1e+30 }
 0x29f   : > { %v4916_v4 = vpop.f32.mrf.mxu1  ;;  %v1945_v5 = vsel %vm1944_vm3, %v1942_v3, -inf }
 0x2a0   : > { %1946 = vmax.xlane.f32.xlu0 %v1945_v5 }
 0x2a1   : > { %v1938_v6 = vpop.f32.mrf.mxu1 }
 0x2a2   : > { %v1943_v7 = vsel %vm1488_vm2, %v1938_v6, -1e+30 }
 0x2a3   : > { %v4921_v8 = vpop.f32.mrf.mxu1  ;;  %v1948_v9 = vsel %vm1944_vm3, %v1943_v7, -inf }
 0x2a4   : > { %1949 = vmax.xlane.f32.xlu0 %v1948_v9 }
 0x2ba   : > { %2121 = vrot.lane.b32.xlu0 %v6390_v42, %s5818_s8 }
 0x329   : > { %v1947_v10 = vpop.xlane.xlu0 %1946 }
 0x32a   : > { %v1951_v11 = vsub.f32 %v1942_v3, %v1947_v10 }
 0x32c   : > { %v1953_v12 = vmul.f32 1.442695, %v1951_v11 }
 0x32d   : > { %v1950_v13 = vpop.xlane.xlu0 %1949 }
 0x32e   : > { %5336 = vpow2.f32 %v1953_v12  ;;  %v1952_v14 = vsub.f32 %v1943_v7, %v1950_v13 }
 0x330   : > { %v1955_v15 = vmul.f32 1.442695, %v1952_v14 }
 0x331   : > { %v2122_v41 = vpop.permute.xlu0 %2121 }
 0x332   : > { %5338 = vpow2.f32 %v1955_v15 }
 0x33b   : > { %v5337_v16 = vpop.eup %5336 }
 0x33c   : > { %v1957_v17 = vsel %vm1944_vm3, %v5337_v16, 0.0 }
 0x33d   : > { %1958 = vadd.xlane.f32.xlu1 %v1957_v17  ;;  %v2484_v17 = vld [vmem:[%s6317_s25 + $0x78] sm:$0xff] }
 0x33e   : > { %4952 = vmatprep.subr.mxu0 %v2484_v17 }
 0x33f   : > { %v5339_v18 = vpop.eup %5338  ;;  %4953 = vmatpush3.msra.mxu0 %v2484_v17  ;;  %v2617_v17 = vld [vmem:[%s6320_s15 + $0x38] sm:$0xff] }
 0x340   : > { %v1960_v19 = vsel %vm1944_vm3, %v5339_v18, 0.0 }
 0x341   : > { %1961 = vadd.xlane.f32.xlu1 %v1960_v19  ;;  %v2482_v19 = vld [vmem:[%s6317_s25 + $0x68] sm:$0xff] }
 0x352   : > { %2119 = vrot.lane.b32.xlu1 %v6394_v44, %s5818_s8 }
 0x356   : > { %2199 = vrot.lane.b32.xlu1 %v6397_v45, %s5818_s8 }
 0x35a   : > { %2197 = vrot.lane.b32.xlu1 %v6405_v46, %s5818_s8 }
 0x3c6   : > { %v1959_v25 = vpop.xlane.xlu1 %1958 }
 0x3c7   : > { %5340 = vrcp.f32 %v1959_v25 }
 0x3ca   : > { %v1962_v26 = vpop.xlane.xlu1 %1961 }
 0x3cb   : > { %5342 = vrcp.f32 %v1962_v26 }
 0x3ce   : > { %v2120_v38 = vpop.permute.xlu1 %2119 }
 0x3d2   : > { %v2200_v42 = vpop.permute.xlu1 %2199 }
 0x3d4   : > { %v5341_v27 = vpop.eup %5340 }
 0x3d5   : > { %v1965_v28 = vmul.f32 %v5341_v27, %v1959_v25  ;;  %v2476_v25 = vld [vmem:[%s6317_s25 + $0x38] sm:$0xff] }
 0x3d6   : > { %v2198_v43 = vpop.permute.xlu1 %2197 }
 0x3d7   : > { %v1967_v29 = vsub.f32 2.0, %v1965_v28  ;;  %v2473_v28 = vld [vmem:[%s6317_s25 + $0x20] sm:$0xff] }
 0x3d8   : > { %v5343_v30 = vpop.eup %5342 }
 0x3d9   : > { %v1969_v31 = vmul.f32 %v5341_v27, %v1967_v29  ;;  %v1966_v32 = vmul.f32 %v5343_v30, %v1962_v26  ;;  %v2475_v26 = vld [vmem:[%s6317_s25 + $0x30] sm:$0xff]  ;;  %v2474_v27 = vld [vmem:[%s6317_s25 + $0x28] sm:$0xff]  ;;  %v2472_v29 = vld [vmem:[%s6317_s25 + $0x18] sm:$0xff] }
 0x3db   : > { %v1971_v34 = vmul.f32 %v5337_v16, %v1969_v31  ;;  %v1968_v37 = vsub.f32 2.0, %v1966_v32  ;;  %v2470_v31 = vld [vmem:[%s6317_s25 + $0x8] sm:$0xff]  ;;  %v2469_v32 = vld [vmem:[%s6317_s25] sm:$0xff] }
 0x3dd   : > { %v1970_v39 = vmul.f32 %v5343_v30, %v1968_v37  ;;  %4925 = vmatmul.mubr.msk.f32.vlgmr.msra.gmra.mxu1 %vm1944_vm3, %v1971_v34  ;;  %v2471_v30 = vld [vmem:[%s6317_s25 + $0x10] sm:$0xff] }
 0x3de   : > { %4928 = vmatpush3.msra.mxu1 %v1786_v23  ;;  %4929 = vmatprep.mubr.msk.f32.mxu1 %vm5817_vm0, %v5816_v36 }
 0x3df   : > { %v1972_v40 = vmul.f32 %v5339_v18, %v1970_v39  ;;  %4932 = vmatprep.subr.mxu1 %v5816_v36  ;;  %v2483_v18 = vld [vmem:[%s6317_s25 + $0x70] sm:$0xff] }
 0x3e0   : > { %4954 = vmatprep.subr.mxu0 %v2483_v18 }
 0x3e1   : > { %4930 = vmatmul.mubr.msk.f32.vlgmr.msra.gmra.mxu1 %vm1944_vm3, %v1972_v40  ;;  %4955 = vmatpush3.msra.mxu0 %v2483_v18  ;;  %v2710_v18 = vld [vmem:[%s6323_s17 + $0x10] sm:$0xff] }
 0x3e2   : > { %4933 = vmatpush3.xpose.msk.msra.mxu1 %vm1789_vm1, %v2122_v41  ;;  %4934 = vmatprep.mubr.msk.f32.mxu1 %vm5817_vm0, %v5816_v36 }
 0x3e3   : > { %4937 = vmatprep.subr.mxu1 %v5816_v36  ;;  %4956 = vmatprep.subr.mxu0 %v2482_v19 }
 0x3e4   : > { %4957 = vmatpush3.msra.mxu0 %v2482_v19  ;;  %v2616_v19 = vld [vmem:[%s6320_s15 + $0x30] sm:$0xff] }
 0x3e5   : > { %4935 = vmatmul.mubr.msk.f32.vlgmr.msra.gmra.mxu1 %vm1789_vm1, %v2120_v38  ;;  %4958 = vmatprep.subr.mxu0 %v2481_v20 }
 0x3e6   : > { %4938 = vmatpush3.xpose.msk.msra.mxu1 %vm1789_vm1, %v2200_v42  ;;  %4939 = vmatprep.mubr.msk.f32.mxu1 %vm5817_vm0, %v5816_v36 }
 0x3e7   : > { %4942 = vmatprep.subr.mxu1 %v5816_v36  ;;  %4959 = vmatpush3.msra.mxu0 %v2481_v20  ;;  %v2709_v20 = vld [vmem:[%s6323_s17 + $0x8] sm:$0xff] }
 0x3e8   : > { %4960 = vmatprep.subr.mxu0 %v2480_v21 }
 0x3e9   : > { %4940 = vmatmul.mubr.msk.f32.vlgmr.msra.gmra.mxu1 %vm1789_vm1, %v2198_v43  ;;  %4961 = vmatpush3.msra.mxu0 %v2480_v21  ;;  %v2615_v21 = vld [vmem:[%s6320_s15 + $0x28] sm:$0xff] }
 0x3ea   : > { %4944 = vmatprep.mubr.msk.f32.mxu1 %vm5817_vm0, %v5816_v36  ;;  %4962 = vmatprep.subr.mxu0 %v2479_v22 }
 0x3eb   : > { %4963 = vmatpush3.msra.mxu0 %v2479_v22  ;;  %v2708_v22 = vld [vmem:[%s6323_s17] sm:$0xff] }
 0x49d   : > { %v6479_v44 = vpop.f32.mrf.mxu1 }
 0x49f   : > { %v4926_v45 = vpop.f32.mrf.mxu1 }
 0x4a1   : > { %v6481_v46 = vpop.f32.mrf.mxu1 }
 0x4a3   : > { %v4931_v47 = vpop.f32.mrf.mxu1 }
 0x4a5   : > { %v2193_v48 = vpop.f32.mrf.mxu1 }
 0x4a6   : > { %v2275_v49 = vsel %vm1488_vm2, %v2193_v48, -1e+30  ;;  %v4538_v48 = vld [vmem:[%s6979_s26] ss:$0 sm:$0xff]  ;;  %s6987_s26 = scalar_lea.vmem %s6986_s27, %s6242_s30 }
 0x4a7   : > { %v4936_v50 = vpop.f32.mrf.mxu1  ;;  %v2277_v51 = vsel %vm1944_vm3, %v2275_v49, -inf }
 0x4a8   : > { %2278 = vmax.xlane.f32.xlu0 %v2277_v51 }
 0x4a9   : > { %v2271_v52 = vpop.f32.mrf.mxu1 }
 0x4aa   : > { %v2276_v53 = vsel %vm1488_vm2, %v2271_v52, -1e+30 }
 0x4ab   : > { %v4941_v54 = vpop.f32.mrf.mxu1  ;;  %v2280_v55 = vsel %vm1944_vm3, %v2276_v53, -inf }
 0x4ac   : > { %2281 = vmax.xlane.f32.xlu1 %v2280_v55  ;;  %v2722_v54 = vld [vmem:[%s6323_s17 + $0x70] sm:$0xff]  ;;  %v2625_v55 = vld [vmem:[%s6320_s15 + $0x78] sm:$0xff] }
 0x4bd   : > { %2383 = vrot.lane.b32.xlu1 %v1786_v23, %s5818_s8  ;;  %v2478_v23 = vld [vmem:[%s6317_s25 + $0x48] sm:$0xff] }
 0x4be   : > { %4964 = vmatprep.subr.mxu0 %v2478_v23 }
 0x4bf   : > { %4965 = vmatpush3.msra.mxu0 %v2478_v23  ;;  %v2614_v23 = vld [vmem:[%s6320_s15 + $0x20] sm:$0xff] }
 0x531   : > { %v2279_v56 = vpop.xlane.xlu0 %2278 }
 0x532   : > { %v2283_v57 = vsub.f32 %v2275_v49, %v2279_v56  ;;  %v2721_v56 = vld [vmem:[%s6323_s17 + $0x68] sm:$0xff] }
 0x534   : > { %v2285_v58 = vmul.f32 1.442695, %v2283_v57  ;;  %v2624_v57 = vld [vmem:[%s6320_s15 + $0x70] sm:$0xff] }
 0x535   : > { %v2282_v59 = vpop.xlane.xlu1 %2281 }
 0x536   : > { %5344 = vpow2.f32 %v2285_v58  ;;  %v2284_v60 = vsub.f32 %v2276_v53, %v2282_v59  ;;  %v2720_v58 = vld [vmem:[%s6323_s17 + $0x60] sm:$0xff]  ;;  %v2717_v59 = vld [vmem:[%s6323_s17 + $0x48] sm:$0xff] }
 0x538   : > { %v2287_v61 = vmul.f32 1.442695, %v2284_v60 }
 0x539   : > { %v2384_v14 = vpop.permute.xlu1 %2383 }
 0x53a   : > { %5346 = vpow2.f32 %v2287_v61 }
 0x543   : > { %v5345_v62 = vpop.eup %5344 }
 0x544   : > { %v2289_v63 = vsel %vm1944_vm3, %v5345_v62, 0.0 }
 0x545   : > { %2290 = vadd.xlane.f32.xlu0 %v2289_v63 }
 0x547   : > { %v5347_v1 = vpop.eup %5346 }
 0x548   : > { %v2292_v2 = vsel %vm1944_vm3, %v5347_v1, 0.0 }
 0x549   : > { %2293 = vadd.xlane.f32.xlu0 %v2292_v2 }
 0x55f   : > { %2306 = vrot.lane.b32.xlu0 %v6456_v24, %s5818_s8  ;;  %v2477_v24 = vld [vmem:[%s6317_s25 + $0x40] sm:$0xff] }
 0x560   : > { %4966 = vmatprep.subr.mxu0 %v2477_v24 }
 0x561   : > { %4967 = vmatpush3.msra.mxu0 %v2477_v24  ;;  %v1491_v24 = vld [vmem:[#allocation6] sm:$0xff] }
 0x562   : > { %4968 = vmatprep.subr.mxu0 %v2476_v25 }
 0x563   : > { %4969 = vmatpush3.msra.mxu0 %v2476_v25  ;;  %v6565_v25 = vld [vmem:[#allocation6 + $0x8] sm:$0xff] }
 0x564   : > { %4970 = vmatprep.subr.mxu0 %v2475_v26 }
 0x565   : > { %4971 = vmatpush3.msra.mxu0 %v2475_v26  ;;  %v2613_v26 = vld [vmem:[%s6320_s15 + $0x18] sm:$0xff] }
 0x566   : > { %4972 = vmatprep.subr.mxu0 %v2474_v27 }
 0x567   : > { %4973 = vmatpush3.msra.mxu0 %v2474_v27  ;;  %v2612_v27 = vld [vmem:[%s6320_s15 + $0x10] sm:$0xff] }
 0x568   : > { %4974 = vmatprep.subr.mxu0 %v2473_v28 }
 0x569   : > { %4975 = vmatpush3.msra.mxu0 %v2473_v28  ;;  %v2611_v28 = vld [vmem:[%s6320_s15 + $0x8] sm:$0xff] }
 0x56a   : > { %4976 = vmatprep.subr.mxu0 %v2472_v29 }
 0x56b   : > { %4977 = vmatpush3.msra.mxu0 %v2472_v29  ;;  %v2610_v29 = vld [vmem:[%s6320_s15] sm:$0xff] }
 0x56c   : > { %4978 = vmatprep.subr.mxu0 %v2471_v30 }
 0x56d   : > { %4979 = vmatpush3.msra.mxu0 %v2471_v30  ;;  %v6573_v30 = vld [vmem:[#allocation6 + $0x10] sm:$0xff] }
 0x56e   : > { %4980 = vmatprep.subr.mxu0 %v2470_v31 }
 0x56f   : > { %4981 = vmatpush3.msra.mxu0 %v2470_v31  ;;  %v6576_v31 = vld [vmem:[#allocation6 + $0x18] sm:$0xff] }
 0x570   : > { %4982 = vmatprep.subr.mxu0 %v2469_v32 }
 0x571   : > { %4983 = vmatpush3.msra.mxu0 %v2469_v32  ;;  %v2831_v32 = vld [vmem:[%s6326_s13 + $0x78] sm:$0xff] }
 0x5ce   : > { %v2291_v3 = vpop.xlane.xlu0 %2290 }
 0x5cf   : > { %5348 = vrcp.f32 %v2291_v3 }
 0x5d2   : > { %v2294_v4 = vpop.xlane.xlu0 %2293 }
 0x5d3   : > { %5350 = vrcp.f32 %v2294_v4 }
 0x5d6   : > { %v2307_v5 = vpop.permute.xlu0 %2306 }
 0x5d7   : > { %4943 = vmatpush3.msra.mxu1 %v2307_v5  ;;  %v2623_v5 = vld [vmem:[%s6320_s15 + $0x68] sm:$0xff] }
 0x5d8   : > { %4947 = vmatprep.subr.mxu1 %v5816_v36 }
 0x5dc   : > { %v5349_v6 = vpop.eup %5348 }
 0x5dd   : > { %v2297_v7 = vmul.f32 %v5349_v6, %v2291_v3 }
 0x5df   : > { %v2299_v8 = vsub.f32 2.0, %v2297_v7  ;;  %v2622_v7 = vld [vmem:[%s6320_s15 + $0x60] sm:$0xff] }
 0x5e0   : > { %v5351_v9 = vpop.eup %5350 }
 0x5e1   : > { %v2301_v10 = vmul.f32 %v5349_v6, %v2299_v8  ;;  %v2298_v11 = vmul.f32 %v5351_v9, %v2294_v4  ;;  %v2716_v6 = vld [vmem:[%s6323_s17 + $0x40] sm:$0xff]  ;;  %v2715_v8 = vld [vmem:[%s6323_s17 + $0x38] sm:$0xff] }
 0x5e3   : > { %v2303_v12 = vmul.f32 %v5345_v62, %v2301_v10  ;;  %v2300_v13 = vsub.f32 2.0, %v2298_v11  ;;  %v2714_v10 = vld [vmem:[%s6323_s17 + $0x30] sm:$0xff] }
 0x5e4   : > { %v2620_v11 = vld [vmem:[%s6320_s15 + $0x50] sm:$0xff] }
 0x5e5   : > { %v2302_v15 = vmul.f32 %v5351_v9, %v2300_v13  ;;  %4945 = vmatmul.mubr.msk.f32.vlgmr.msra.gmra.mxu1 %vm1944_vm3, %v2303_v12  ;;  %v2621_v9 = vld [vmem:[%s6320_s15 + $0x58] sm:$0xff]  ;;  %v2713_v12 = vld [vmem:[%s6323_s17 + $0x28] sm:$0xff] }
 0x5e6   : > { %4948 = vmatpush3.msra.mxu1 %v2384_v14  ;;  %4949 = vmatprep.mubr.msk.f32.mxu1 %vm5817_vm0, %v5816_v36  ;;  %v2619_v13 = vld [vmem:[%s6320_s15 + $0x48] sm:$0xff]  ;;  %v2712_v14 = vld [vmem:[%s6323_s17 + $0x20] sm:$0xff] }
 0x5e7   : > { %v2304_v16 = vmul.f32 %v5347_v1, %v2302_v15  ;;  %4987 = vmatprep.subr.mxu1 %v2625_v55  ;;  %v2618_v15 = vld [vmem:[%s6320_s15 + $0x40] sm:$0xff] }
 0x5e9   : > { %4950 = vmatmul.mubr.msk.f32.vlgmr.msra.gmra.mxu1 %vm1944_vm3, %v2304_v16  ;;  %v2711_v16 = vld [vmem:[%s6323_s17 + $0x18] sm:$0xff] }
 0x5ea   : > { %4988 = vmatpush3.msra.mxu1 %v2625_v55  ;;  %v2827_v55 = vld [vmem:[%s6326_s13 + $0x58] sm:$0xff] }
 0x5eb   : > { %4989 = vmatprep.subr.mxu1 %v2624_v57 }
 0x5ec   : > { %4990 = vmatpush3.msra.mxu1 %v2624_v57  ;;  %v2825_v57 = vld [vmem:[%s6326_s13 + $0x48] sm:$0xff] }
 0x5ed   : > { %4991 = vmatprep.subr.mxu1 %v2623_v5 }
 0x5ee   : > { %4992 = vmatpush3.msra.mxu1 %v2623_v5 }
 0x5ef   : > { %4993 = vmatprep.subr.mxu1 %v2622_v7 }
 0x5f0   : > { %4994 = vmatpush3.msra.mxu1 %v2622_v7 }
 0x5f1   : > { %4995 = vmatprep.subr.mxu1 %v2621_v9 }
 0x5f2   : > { %4996 = vmatpush3.msra.mxu1 %v2621_v9  ;;  %v4541_v9 = vld [vmem:[%s6987_s26] ss:$0 sm:$0xff] }
 0x5f3   : > { %4997 = vmatprep.subr.mxu1 %v2620_v11 }
 0x5f4   : > { %4998 = vmatpush3.msra.mxu1 %v2620_v11 }
 0x5f5   : > { %4999 = vmatprep.subr.mxu1 %v2619_v13 }
 0x5f6   : > { %5000 = vmatpush3.msra.mxu1 %v2619_v13 }
 0x5f7   : > { %5001 = vmatprep.subr.mxu1 %v2618_v15 }
 0x5f8   : > { %5002 = vmatpush3.msra.mxu1 %v2618_v15 }
 0x5f9   : > { %5003 = vmatprep.subr.mxu1 %v2617_v17 }
 0x5fa   : > { %5004 = vmatpush3.msra.mxu1 %v2617_v17 }
 0x5fb   : > { %5005 = vmatprep.subr.mxu1 %v2616_v19 }
 0x5fc   : > { %5006 = vmatpush3.msra.mxu1 %v2616_v19 }
 0x5fd   : > { %5007 = vmatprep.subr.mxu1 %v2615_v21 }
 0x5fe   : > { %5008 = vmatpush3.msra.mxu1 %v2615_v21 }
 0x5ff   : > { %5009 = vmatprep.subr.mxu1 %v2614_v23 }
 0x600   : > { %5010 = vmatpush3.msra.mxu1 %v2614_v23 }
 0x601   : > { %5011 = vmatprep.subr.mxu1 %v2613_v26 }
 0x602   : > { %5012 = vmatpush3.msra.mxu1 %v2613_v26 }
 0x603   : > { %5013 = vmatprep.subr.mxu1 %v2612_v27 }
 0x604   : > { %5014 = vmatpush3.msra.mxu1 %v2612_v27 }
 0x605   : > { %5015 = vmatprep.subr.mxu1 %v2611_v28 }
 0x606   : > { %5016 = vmatpush3.msra.mxu1 %v2611_v28 }
 0x607   : > { %5017 = vmatprep.subr.mxu1 %v2610_v29 }
 0x608   : > { %5018 = vmatpush3.msra.mxu1 %v2610_v29 }
 0x609   : > { %5060 = vmatprep.subr.mxu1 %v2831_v32 }
 0x6a5   : > { %v2378_v34 = vpop.f32.mrf.mxu1 }
 0x6a7   : > { %v4946_v37 = vpop.f32.mrf.mxu1 }
 0x6a9   : > { %v2455_v38 = vpop.f32.mrf.mxu1 }
 0x6aa   : > { %v5326_v39 = vpack.i.bf16 %v2455_v38, %v2378_v34 }
 0x6ab   : > { %v4951_v40 = vpop.f32.mrf.mxu1 }
 0x6ac   : > { %5327 = vrot.lane.b32.xlu1 %v5326_v39, %s5818_s8 }
 0x71e   : > { %v5328_v41 = vpop.permute.xlu1 %5327 }
 0x71f   : > { %v5330_v42 = vunpack.i.h.bf16 %v5328_v41  ;;  %v5329_v43 = vunpack.i.l.bf16 %v5328_v41 }
 0x721   : > { %v2467_v45 = vsel %vm1789_vm1, %v6479_v44, %v5329_v43  ;;  %v2468_v47 = vsel %vm1789_vm1, %v6481_v46, %v5330_v42  ;;  %v2723_v46 = vld [vmem:[%s6323_s17 + $0x78] sm:$0xff]  ;;  %v4539_v43 = vld [vmem:[%s6981_s11] ss:$0 sm:$0xff]  ;;  %s6989_s11 = scalar_lea.vmem %s6988_s6, %s6242_s30 }
 0x722   : > { %4984 = vmatprep.mubr.f32.mxu0 %v2467_v45  ;;  %5022 = vmatprep.subr.mxu0 %v2723_v46 }
 0x723   : > { %4985 = vmatmul.mubr.f32.vlgmr.msra.gmra.mxu0 %v2468_v47  ;;  %v4540_v47 = vld [vmem:[%s6983_s16] ss:$0 sm:$0xff]  ;;  %s6992_s16 = sld [smem:[#allocation47_spill]] }
 0x724   : > { %5023 = vmatpush3.msra.mxu0 %v2723_v46  ;;  %5054 = vmatprep.mubr.f32.mxu0 %v1491_v24  ;;  %v2829_v46 = vld [vmem:[%s6326_s13 + $0x68] sm:$0xff] }
 0x725   : > { %5024 = vmatprep.subr.mxu0 %v2722_v54 }
 0x726   : > { %5025 = vmatpush3.msra.mxu0 %v2722_v54  ;;  %v2828_v54 = vld [vmem:[%s6326_s13 + $0x60] sm:$0xff] }
 0x727   : > { %5026 = vmatprep.subr.mxu0 %v2721_v56 }
 0x728   : > { %5027 = vmatpush3.msra.mxu0 %v2721_v56  ;;  %v2826_v56 = vld [vmem:[%s6326_s13 + $0x50] sm:$0xff] }
 0x729   : > { %5028 = vmatprep.subr.mxu0 %v2720_v58  ;;  %s6993_s20 = scalar_lea.vmem %s6992_s16, %s6242_s30 }
 0x72a   : > { %5029 = vmatpush3.msra.mxu0 %v2720_v58  ;;  %v2824_v58 = vld [vmem:[%s6326_s13 + $0x40] sm:$0xff] }
 0x7e3   : > { %v4986_v49 = vpop.f32.mrf.mxu0 }
 0x7e4   : > { %v2564_v50 = vadd.f32 %v4986_v49, %v4538_v48 }
 0x7e5   : > { %v2558_v51 = vpop.f32.mrf.mxu0 }
 0x7e6   : > { %v2559_v52 = vadd.f32 %v4538_v48, %v2558_v51  ;;  %v2568_v44 = vadd.f32 %v2564_v50, %v6370_v35  ;;  %v2718_v35 = vld [vmem:[%s6323_s17 + $0x50] sm:$0xff] }
 0x7e8   : > { %2571 = vadd.xlane.f32.xlu0 %v2568_v44  ;;  %v2567_v53 = vadd.f32 %v2559_v52, %v6367_v33  ;;  %v2719_v33 = vld [vmem:[%s6323_s17 + $0x58] sm:$0xff]  ;;  %s6998_s17 = sld [smem:[#allocation23_spill]] }
 0x7e9   : > { %5030 = vmatprep.subr.mxu0 %v2719_v33 }
 0x7ea   : > { %2569 = vadd.xlane.f32.xlu1 %v2567_v53  ;;  %5031 = vmatpush3.msra.mxu0 %v2719_v33  ;;  %v2823_v33 = vld [vmem:[%s6326_s13 + $0x38] sm:$0xff] }
 0x7eb   : > { %5032 = vmatprep.subr.mxu0 %v2718_v35 }
 0x7ec   : > { %5033 = vmatpush3.msra.mxu0 %v2718_v35  ;;  %v2822_v35 = vld [vmem:[%s6326_s13 + $0x30] sm:$0xff] }
 0x7ed   : > { %5034 = vmatprep.subr.mxu0 %v2717_v59 }
 0x7ee   : > { %5035 = vmatpush3.msra.mxu0 %v2717_v59  ;;  %v2821_v59 = vld [vmem:[%s6326_s13 + $0x28] sm:$0xff]  ;;  %p4566_p10 = scmp.ne.s32.totalorder %s6998_s17, 1 }
 0x7ef   : > { %5036 = vmatprep.subr.mxu0 %v2716_v6 }
 0x7f0   : > { %5037 = vmatpush3.msra.mxu0 %v2716_v6 }
 0x7f1   : > { %5038 = vmatprep.subr.mxu0 %v2715_v8 }
 0x7f2   : > { %5039 = vmatpush3.msra.mxu0 %v2715_v8 }
 0x7f3   : > { %5040 = vmatprep.subr.mxu0 %v2714_v10 }
 0x7f4   : > { %5041 = vmatpush3.msra.mxu0 %v2714_v10 }
 0x7f5   : > { %5042 = vmatprep.subr.mxu0 %v2713_v12 }
 0x7f6   : > { %5043 = vmatpush3.msra.mxu0 %v2713_v12 }
 0x7f7   : > { %5044 = vmatprep.subr.mxu0 %v2712_v14 }
 0x7f8   : > { %5045 = vmatpush3.msra.mxu0 %v2712_v14 }
 0x7f9   : > { %5046 = vmatprep.subr.mxu0 %v2711_v16 }
 0x7fa   : > { %5047 = vmatpush3.msra.mxu0 %v2711_v16  ;;  %v4543_v16 = vld [vmem:[%s6989_s11] ss:$0 sm:$0xff] }
 0x7fb   : > { %5048 = vmatprep.subr.mxu0 %v2710_v18 }
 0x7fc   : > { %5049 = vmatpush3.msra.mxu0 %v2710_v18 }
 0x7fd   : > { %5050 = vmatprep.subr.mxu0 %v2709_v20 }
 0x7fe   : > { %5051 = vmatpush3.msra.mxu0 %v2709_v20 }
 0x7ff   : > { %5052 = vmatprep.subr.mxu0 %v2708_v22 }
 0x800   : > { %5053 = vmatpush3.msra.mxu0 %v2708_v22 }
 0x801   : > { %5055 = vmatmul.mubr.f32.vlgmr.msra.gmra.mxu0 %v6565_v25  ;;  %5112 = vmatprep.subr.mxu0 %v5816_v36 }
 0x802   : > { %5057 = vmatprep.mubr.f32.mxu0 %v6573_v30 }
 0x805   : > { %5058 = vmatmul.mubr.f32.gmra.mxu0 %v6576_v31 }
 0x806   : > { %5116 = vmatprep.mubr.msk.f32.mxu0 %vm5817_vm0, %v5816_v36 }
 0x871   : > { %v2572_v60 = vpop.xlane.xlu0 %2571 }
 0x872   : > { %v2575_v62 = vmul.f32 0.0078125, %v2572_v60  ;;  %v2820_v60 = vld [vmem:[%s6326_s13 + $0x20] sm:$0xff] }
 0x873   : > { %v2570_v61 = vpop.xlane.xlu1 %2569 }
 0x874   : > { %v2574_v63 = vmul.f32 0.0078125, %v2570_v61  ;;  %v6540_v2 = vsub.f32 %v2568_v44, %v2575_v62  ;;  %v2819_v61 = vld [vmem:[%s6326_s13 + $0x18] sm:$0xff]  ;;  %v2818_v62 = vld [vmem:[%s6326_s13 + $0x10] sm:$0xff] }
 0x876   : > { %v6538_v1 = vsub.f32 %v2567_v53, %v2574_v63  ;;  %v2579_v4 = vmul.f32 %v6540_v2, %v6540_v2  ;;  %v2830_v53 = vld [vmem:[%s6326_s13 + $0x70] sm:$0xff]  ;;  %v2817_v63 = vld [vmem:[%s6326_s13 + $0x8] sm:$0xff] }
 0x878   : > { %v2578_v3 = vmul.f32 %v6538_v1, %v6538_v1 }
 0x87a   : > { %2580 = vadd.xlane.f32.xlu0 %v2578_v3 }
 0x87e   : > { %2582 = vadd.xlane.f32.xlu0 %v2579_v4 }
 0x8c1   : > { %v5056_v3 = vpop.f32.mrf.mxu0 }
 0x8c3   : > { %v2797_v5 = vpop.f32.mrf.mxu0 }
 0x8c5   : > { %v5059_v8 = vpop.f32.mrf.mxu0 }
 0x8c7   : > { %v2807_v13 = vpop.f32.mrf.mxu0 }
 0x903   : > { %v2581_v34 = vpop.xlane.xlu0 %2580 }
 0x904   : > { %v2584_v37 = vmul.f32 0.0078125, %v2581_v34 }
 0x906   : > { %v2586_v38 = vadd.f32 1e-05, %v2584_v37 }
 0x907   : > { %v2583_v39 = vpop.xlane.xlu0 %2582 }
 0x908   : > { %5352 = vrsqrt.f32 %v2586_v38  ;;  %v2585_v40 = vmul.f32 0.0078125, %v2583_v39 }
 0x90a   : > { %v2587_v41 = vadd.f32 1e-05, %v2585_v40 }
 0x90c   : > { %5354 = vrsqrt.f32 %v2587_v41 }
 0x915   : > { %v5353_v42 = vpop.eup %5352 }
 0x916   : > { %v2590_v45 = vmul.f32 %v5353_v42, %v6538_v1  ;;  %v2816_v1 = vld [vmem:[%s6326_s13] sm:$0xff]  ;;  %s6985_s13 = scalar_lea.vmem %s6984_s23, %s6242_s30 }
 0x918   : > { %v2599_v48 = vmul.f32 %v4539_v43, %v2590_v45 }
 0x919   : > { %v5355_v49 = vpop.eup %5354 }
 0x91a   : > { %v2591_v50 = vmul.f32 %v5355_v49, %v6540_v2  ;;  %v6594_v51 = vadd.f32 %v4540_v47, %v2599_v48  ;;  %v4542_v2 = vld [vmem:[%s6985_s13] ss:$0 sm:$0xff] }
 0x91b   : > { %v2803_v4 = vadd.f32 %v5056_v3, %v4542_v2  ;;  %v2798_v6 = vadd.f32 %v4542_v2, %v2797_v5  ;;  %v2813_v10 = vadd.f32 %v5059_v8, %v4542_v2  ;;  %v2808_v14 = vadd.f32 %v4542_v2, %v2807_v13 }
 0x91c   : > { %v2600_v52 = vmul.f32 %v4539_v43, %v2591_v50  ;;  %5019 = vmatprep.mubr.f32.mxu1 %v6594_v51 }
 0x91e   : > { %v6597_v44 = vadd.f32 %v4540_v47, %v2600_v52 }
 0x920   : > { %5020 = vmatmul.mubr.f32.vlgmr.msra.gmra.mxu1 %v6597_v44 }
 0x921   : > { %5061 = vmatpush3.msra.mxu1 %v2831_v32  ;;  %5092 = vmatprep.mubr.f32.mxu1 %v1491_v24 }
 0x922   : > { %5062 = vmatprep.subr.mxu1 %v2830_v53 }
 0x923   : > { %5063 = vmatpush3.msra.mxu1 %v2830_v53 }
 0x924   : > { %5064 = vmatprep.subr.mxu1 %v2829_v46 }
 0x925   : > { %5065 = vmatpush3.msra.mxu1 %v2829_v46 }
 0x926   : > { %5066 = vmatprep.subr.mxu1 %v2828_v54 }
 0x927   : > { %5067 = vmatpush3.msra.mxu1 %v2828_v54 }
 0x928   : > { %5068 = vmatprep.subr.mxu1 %v2827_v55 }
 0x929   : > { %5069 = vmatpush3.msra.mxu1 %v2827_v55 }
 0x92a   : > { %5070 = vmatprep.subr.mxu1 %v2826_v56 }
 0x92b   : > { %5071 = vmatpush3.msra.mxu1 %v2826_v56 }
 0x92c   : > { %5072 = vmatprep.subr.mxu1 %v2825_v57 }
 0x92d   : > { %5073 = vmatpush3.msra.mxu1 %v2825_v57 }
 0x92e   : > { %5074 = vmatprep.subr.mxu1 %v2824_v58 }
 0x92f   : > { %5075 = vmatpush3.msra.mxu1 %v2824_v58 }
 0x930   : > { %5076 = vmatprep.subr.mxu1 %v2823_v33 }
 0x931   : > { %5077 = vmatpush3.msra.mxu1 %v2823_v33 }
 0x932   : > { %5078 = vmatprep.subr.mxu1 %v2822_v35 }
 0x933   : > { %5079 = vmatpush3.msra.mxu1 %v2822_v35 }
 0x934   : > { %5080 = vmatprep.subr.mxu1 %v2821_v59 }
 0x935   : > { %5081 = vmatpush3.msra.mxu1 %v2821_v59 }
 0x936   : > { %5082 = vmatprep.subr.mxu1 %v2820_v60 }
 0x937   : > { %5083 = vmatpush3.msra.mxu1 %v2820_v60 }
 0x938   : > { %5084 = vmatprep.subr.mxu1 %v2819_v61 }
 0x939   : > { %5085 = vmatpush3.msra.mxu1 %v2819_v61 }
 0x93a   : > { %5086 = vmatprep.subr.mxu1 %v2818_v62 }
 0x93b   : > { %5087 = vmatpush3.msra.mxu1 %v2818_v62 }
 0x93c   : > { %5088 = vmatprep.subr.mxu1 %v2817_v63 }
 0x93d   : > { %5089 = vmatpush3.msra.mxu1 %v2817_v63 }
 0x93e   : > { %5090 = vmatprep.subr.mxu1 %v2816_v1 }
 0x93f   : > { %5091 = vmatpush3.msra.mxu1 %v2816_v1 }
 0x940   : > { %5098 = vmatprep.subr.mxu1 %v5816_v36  ;;  %5093 = vmatmul.mubr.f32.vlgmr.msra.gmra.mxu1 %v6565_v25 }
 0x941   : > { %5095 = vmatprep.mubr.f32.mxu1 %v6573_v30  ;;  %5099 = vmatpush3.xpose.msk.msra.mxu1 %vm1789_vm1, %v2803_v4 }
 0x942   : > { %5100 = vmatprep.subr.mxu1 %v5816_v36 }
 0x944   : > { %5096 = vmatmul.mubr.f32.gmra.mxu1 %v6576_v31 }
 0x945   : > { %5102 = vmatprep.mubr.msk.f32.mxu1 %vm5817_vm0, %v5816_v36  ;;  %5101 = vmatpush3.xpose.msk.msra.mxu1 %vm1789_vm1, %v2798_v6 }
 0x946   : > { %5105 = vmatprep.subr.mxu1 %v5816_v36 }
 0x9e0   : > { %v5021_v7 = vpop.f32.mrf.mxu1 }
 0x9e1   : > { %v2705_v15 = vadd.f32 %v5021_v7, %v4541_v9 }
 0x9e2   : > { %v2699_v11 = vpop.f32.mrf.mxu1 }
 0x9e3   : > { %v2700_v12 = vadd.f32 %v4541_v9, %v2699_v11 }
 0x9e5   : > { %5103 = vmatmul.mubr.msk.f32.vlgmr.msra.gmra.mxu1 %vm1789_vm1, %v2700_v12 }
 0x9e6   : > { %5106 = vmatpush3.xpose.msk.msra.mxu1 %vm1789_vm1, %v2813_v10  ;;  %5109 = vmatprep.mubr.msk.f32.mxu1 %vm5817_vm0, %v5816_v36 }
 0x9e7   : > { %5107 = vmatprep.subr.mxu1 %v5816_v36 }
 0x9ea   : > { %5108 = vmatpush3.xpose.msk.msra.mxu1 %vm1789_vm1, %v2808_v14 }
 0x9eb   : > { %5119 = vmatprep.subr.mxu1 %v5816_v36 }
 0x9ed   : > { %5110 = vmatmul.mubr.msk.f32.vlgmr.msra.gmra.mxu1 %vm1789_vm1, %v2705_v15 }
 0x9ee   : > { %5123 = vmatprep.mubr.msk.f32.mxu1 %vm5817_vm0, %v5816_v36 }
 0xa00   : > { %v5094_v17 = vpop.f32.mrf.mxu1 }
 0xa01   : > { %v2911_v18 = vadd.f32 %v5094_v17, %v4543_v16 }
 0xa02   : > { %v2905_v19 = vpop.f32.mrf.mxu1 }
 0xa03   : > { %v6650_v20 = vadd.f32 %v4543_v16, %v2905_v19  ;;  %5113 = vmatpush3.msra.mxu0 %v2911_v18 }
 0xa04   : > { %v5097_v21 = vpop.f32.mrf.mxu1  ;;  %5114 = vmatprep.subr.mxu0 %v5816_v36 }
 0xa05   : > { %v6653_v22 = vadd.f32 %v5097_v21, %v4543_v16  ;;  %5115 = vmatpush3.msra.mxu0 %v6650_v20 }
 0xa06   : > { %v2915_v23 = vpop.f32.mrf.mxu1  ;;  %5140 = vmatprep.subr.mxu0 %v5816_v36 }
 0xa07   : > { %v6657_v24 = vadd.f32 %v4543_v16, %v2915_v23  ;;  %5120 = vmatpush3.msra.mxu1 %v6653_v22 }
 0xa08   : > { %5121 = vmatprep.subr.mxu1 %v5816_v36 }
 0xa09   : > { %5122 = vmatpush3.msra.mxu1 %v6657_v24 }
 0xa0a   : > { %5126 = vmatprep.subr.mxu1 %v5816_v36 }
 0xaa5   : > { %v2999_v25 = vpop.f32.mrf.mxu1 }
 0xaa6   : > { %v3083_v30 = vsel %vm3082_vm4, %v2999_v25, -inf }
 0xaa7   : > { %v5104_v26 = vpop.f32.mrf.mxu1 }
 0xaad   : > { %v3078_v27 = vpop.f32.mrf.mxu1 }
 0xaae   : > { %v3086_v28 = vsel %vm3082_vm4, %v3078_v27, -inf }
 0xaaf   : > { %3087 = vmax.xlane.f32.xlu1 %v3086_v28  ;;  %v5111_v29 = vpop.f32.mrf.mxu1 }
 0xac0   : > { %3261 = vrot.lane.b32.xlu1 %v2803_v4, %s5818_s8 }
 0xac4   : > { %3257 = vrot.lane.b32.xlu1 %v2700_v12, %s5818_s8 }
 0xac8   : > { %3343 = vrot.lane.b32.xlu1 %v2813_v10, %s5818_s8 }
 0xacc   : > { %3341 = vrot.lane.b32.xlu1 %v2808_v14, %s5818_s8 }
 0xaf0   : > { %3084 = vmax.xlane.f32.xlu1 %v3083_v30 }
 0xb01   : > { %3453 = vrot.lane.b32.xlu1 %v2911_v18, %s5818_s8 }
 0xb38   : > { %v3088_v31 = vpop.xlane.xlu1 %3087 }
 0xb39   : > { %v3090_v32 = vsub.f32 %v3078_v27, %v3088_v31 }
 0xb3b   : > { %v3093_v34 = vmul.f32 1.442695, %v3090_v32 }
 0xb3c   : > { %v3262_v42 = vpop.permute.xlu1 %3261 }
 0xb3d   : > { %5356 = vpow2.f32 %v3093_v34 }
 0xb40   : > { %v3258_v48 = vpop.permute.xlu1 %3257 }
 0xb44   : > { %v3344_v50 = vpop.permute.xlu1 %3343 }
 0xb48   : > { %v3342_v52 = vpop.permute.xlu1 %3341 }
 0xb4a   : > { %v5357_v37 = vpop.eup %5356 }
 0xb4b   : > { %v3098_v38 = vsel %vm3082_vm4, %v5357_v37, 0.0 }
 0xb4c   : > { %3099 = vadd.xlane.f32.xlu0 %v3098_v38  ;;  %v3636_v38 = vld [vmem:[%s6329_s28 + $0x78] sm:$0xff] }
 0xb62   : > { %3259 = vrot.lane.b32.xlu0 %v2798_v6, %s5818_s8 }
 0xb66   : > { %3339 = vrot.lane.b32.xlu0 %v2705_v15, %s5818_s8 }
 0xb79   : > { %v3085_v46 = vpop.xlane.xlu1 %3084 }
 0xb7a   : > { %v3089_v54 = vsub.f32 %v2999_v25, %v3085_v46  ;;  %v3623_v46 = vld [vmem:[%s6329_s28 + $0x10] sm:$0xff] }
 0xb7c   : > { %v3091_v56 = vmul.f32 1.442695, %v3089_v54  ;;  %v3622_v54 = vld [vmem:[%s6329_s28 + $0x8] sm:$0xff] }
 0xb7d   : > { %v3454_v17 = vpop.permute.xlu1 %3453 }
 0xbd5   : > { %v3100_v39 = vpop.xlane.xlu0 %3099 }
 0xbd6   : > { %5358 = vrcp.f32 %v3100_v39 }
 0xbd7   : > { %5360 = vpow2.f32 %v3091_v56  ;;  %v3621_v56 = vld [vmem:[%s6329_s28] sm:$0xff] }
 0xbd9   : > { %v3260_v49 = vpop.permute.xlu0 %3259 }
 0xbdd   : > { %v3340_v53 = vpop.permute.xlu0 %3339 }
 0xbe3   : > { %v5359_v40 = vpop.eup %5358 }
 0xbe4   : > { %v3104_v41 = vmul.f32 %v5359_v40, %v3100_v39  ;;  %v5361_v61 = vpop.eup %5360  ;;  %v3635_v39 = vld [vmem:[%s6329_s28 + $0x70] sm:$0xff] }
 0xbe5   : > { %v3095_v63 = vsel %vm3082_vm4, %v5361_v61, 0.0 }
 0xbe6   : > { %v3106_v43 = vsub.f32 2.0, %v3104_v41  ;;  %v3633_v41 = vld [vmem:[%s6329_s28 + $0x60] sm:$0xff] }
 0xbe8   : > { %v3108_v45 = vmul.f32 %v5359_v40, %v3106_v43  ;;  %v3634_v40 = vld [vmem:[%s6329_s28 + $0x68] sm:$0xff]  ;;  %v3631_v43 = vld [vmem:[%s6329_s28 + $0x50] sm:$0xff] }
 0xbea   : > { %v3110_v47 = vmul.f32 %v5357_v37, %v3108_v45  ;;  %v3630_v45 = vld [vmem:[%s6329_s28 + $0x48] sm:$0xff] }
 0xbec   : > { %5124 = vmatmul.mubr.msk.f32.vlgmr.msra.gmra.mxu1 %vm3082_vm4, %v3110_v47  ;;  %v3629_v47 = vld [vmem:[%s6329_s28 + $0x40] sm:$0xff] }
 0xbed   : > { %5127 = vmatpush3.xpose.msk.msra.mxu1 %vm1789_vm1, %v3262_v42  ;;  %5130 = vmatprep.mubr.msk.f32.mxu1 %vm5817_vm0, %v5816_v36  ;;  %v3632_v42 = vld [vmem:[%s6329_s28 + $0x58] sm:$0xff] }
 0xbee   : > { %5128 = vmatprep.subr.mxu1 %v5816_v36 }
 0xbf1   : > { %5129 = vmatpush3.xpose.msk.msra.mxu1 %vm1789_vm1, %v3260_v49  ;;  %v3627_v49 = vld [vmem:[%s6329_s28 + $0x30] sm:$0xff] }
 0xbf2   : > { %5133 = vmatprep.subr.mxu1 %v5816_v36 }
 0xbf4   : > { %5131 = vmatmul.mubr.msk.f32.vlgmr.msra.gmra.mxu1 %vm1789_vm1, %v3258_v48  ;;  %v3628_v48 = vld [vmem:[%s6329_s28 + $0x38] sm:$0xff] }
 0xbf5   : > { %5134 = vmatpush3.xpose.msk.msra.mxu1 %vm1789_vm1, %v3344_v50  ;;  %5137 = vmatprep.mubr.msk.f32.mxu1 %vm5817_vm0, %v5816_v36  ;;  %v3626_v50 = vld [vmem:[%s6329_s28 + $0x28] sm:$0xff] }
 0xbf6   : > { %5135 = vmatprep.subr.mxu1 %v5816_v36 }
 0xbf9   : > { %5136 = vmatpush3.xpose.msk.msra.mxu1 %vm1789_vm1, %v3342_v52  ;;  %v3625_v52 = vld [vmem:[%s6329_s28 + $0x20] sm:$0xff] }
 0xbfa   : > { %5147 = vmatprep.subr.mxu1 %v5816_v36 }
 0xbfc   : > { %5138 = vmatmul.mubr.msk.f32.vlgmr.msra.gmra.mxu1 %vm1789_vm1, %v3340_v53  ;;  %v3624_v53 = vld [vmem:[%s6329_s28 + $0x18] sm:$0xff] }
 0xbfd   : > { %5151 = vmatprep.mubr.msk.f32.mxu1 %vm5817_vm0, %v5816_v36 }
 0xcac   : > { %v6690_v55 = vpop.f32.mrf.mxu1 }
 0xcae   : > { %v5125_v57 = vpop.f32.mrf.mxu1 }
 0xcb4   : > { %v3335_v58 = vpop.f32.mrf.mxu1 }
 0xcb5   : > { %v3421_v33 = vsel %vm3082_vm4, %v3335_v58, -inf }
 0xcb6   : > { %3422 = vmax.xlane.f32.xlu0 %v3421_v33  ;;  %v5132_v35 = vpop.f32.mrf.mxu1 }
 0xcbc   : > { %v3417_v59 = vpop.f32.mrf.mxu1 }
 0xcbd   : > { %v3424_v60 = vsel %vm3082_vm4, %v3417_v59, -inf }
 0xcbe   : > { %3425 = vmax.xlane.f32.xlu0 %v3424_v60  ;;  %v5139_v62 = vpop.f32.mrf.mxu1 }
 0xcc2   : > { %3096 = vadd.xlane.f32.xlu0 %v3095_v63 }
 0xd3f   : > { %v3423_v1 = vpop.xlane.xlu0 %3422 }
 0xd40   : > { %v3427_v2 = vsub.f32 %v3335_v58, %v3423_v1 }
 0xd42   : > { %v3429_v3 = vmul.f32 1.442695, %v3427_v2  ;;  %v4560_v2 = vld [vmem:[%s6991_s7] ss:$0 sm:$0xff] }
 0xd44   : > { %5362 = vpow2.f32 %v3429_v3 }
 0xd47   : > { %v3426_v4 = vpop.xlane.xlu0 %3425 }
 0xd48   : > { %v3428_v5 = vsub.f32 %v3417_v59, %v3426_v4 }
 0xd4a   : > { %v3431_v6 = vmul.f32 1.442695, %v3428_v5 }
 0xd4b   : > { %v3097_v7 = vpop.xlane.xlu0 %3096 }
 0xd4c   : > { %5364 = vpow2.f32 %v3431_v6 }
 0xd4d   : > { %5366 = vrcp.f32 %v3097_v7 }
 0xd51   : > { %v5363_v8 = vpop.eup %5362 }
 0xd52   : > { %v3433_v9 = vsel %vm3082_vm4, %v5363_v8, 0.0 }
 0xd53   : > { %3434 = vadd.xlane.f32.xlu1 %v3433_v9  ;;  %v3791_v9 = vld [vmem:[%s6331_s12 + $0xf0] sm:$0xff] }
 0xd59   : > { %v5365_v10 = vpop.eup %5364 }
 0xd5a   : > { %v5367_v11 = vpop.eup %5366  ;;  %v3436_v12 = vsel %vm3082_vm4, %v5365_v10, 0.0 }
 0xd5b   : > { %v3103_v13 = vmul.f32 %v5367_v11, %v3097_v7  ;;  %3437 = vadd.xlane.f32.xlu0 %v3436_v12  ;;  %v3788_v12 = vld [vmem:[%s6331_s12 + $0xd8] sm:$0xff] }
 0xd5d   : > { %v3105_v14 = vsub.f32 2.0, %v3103_v13  ;;  %v3787_v13 = vld [vmem:[%s6331_s12 + $0xd0] sm:$0xff] }
 0xd5f   : > { %v3107_v15 = vmul.f32 %v5367_v11, %v3105_v14  ;;  %v3789_v11 = vld [vmem:[%s6331_s12 + $0xe0] sm:$0xff]  ;;  %v3786_v14 = vld [vmem:[%s6331_s12 + $0xc8] sm:$0xff] }
 0xd61   : > { %v3109_v16 = vmul.f32 %v5361_v61, %v3107_v15  ;;  %v3785_v15 = vld [vmem:[%s6331_s12 + $0xc0] sm:$0xff] }
 0xd63   : > { %5117 = vmatmul.mubr.msk.f32.vlgmr.msra.gmra.mxu0 %vm3082_vm4, %v3109_v16 }
 0xd64   : > { %5141 = vmatpush3.msra.mxu0 %v3454_v17  ;;  %3451 = vrot.lane.b32.xlu1 %v6650_v20, %s5818_s8 }
 0xd65   : > { %5142 = vmatprep.subr.mxu0 %v5816_v36  ;;  %5144 = vmatprep.mubr.msk.f32.mxu0 %vm5817_vm0, %v5816_v36 }
 0xd68   : > { %3532 = vrot.lane.b32.xlu1 %v6657_v24, %s5818_s8 }
 0xd71   : > { %3534 = vrot.lane.b32.xlu0 %v6653_v22, %s5818_s8 }
 0xddc   : > { %v3435_v18 = vpop.xlane.xlu1 %3434 }
 0xddd   : > { %5368 = vrcp.f32 %v3435_v18 }
 0xde0   : > { %v3452_v19 = vpop.permute.xlu1 %3451 }
 0xde1   : > { %5143 = vmatpush3.msra.mxu0 %v3452_v19 }
 0xde2   : > { %5154 = vmatprep.subr.mxu0 %v3636_v38 }
 0xde4   : > { %v3438_v21 = vpop.xlane.xlu0 %3437  ;;  %v3533_v25 = vpop.permute.xlu1 %3532 }
 0xde5   : > { %5370 = vrcp.f32 %v3438_v21 }
 0xde8   : > { %v3535_v23 = vpop.permute.xlu0 %3534 }
 0xde9   : > { %5148 = vmatpush3.msra.mxu1 %v3535_v23 }
 0xdea   : > { %v5369_v20 = vpop.eup %5368  ;;  %5149 = vmatprep.subr.mxu1 %v5816_v36 }
 0xdeb   : > { %v3441_v26 = vmul.f32 %v5369_v20, %v3435_v18  ;;  %5150 = vmatpush3.msra.mxu1 %v3533_v25  ;;  %v3783_v25 = vld [vmem:[%s6331_s12 + $0xb0] sm:$0xff] }
 0xded   : > { %v3443_v24 = vsub.f32 2.0, %v3441_v26  ;;  %v3782_v26 = vld [vmem:[%s6331_s12 + $0xa8] sm:$0xff] }
 0xdef   : > { %v3445_v27 = vmul.f32 %v5369_v20, %v3443_v24  ;;  %v3784_v20 = vld [vmem:[%s6331_s12 + $0xb8] sm:$0xff]  ;;  %v3781_v24 = vld [vmem:[%s6331_s12 + $0xa0] sm:$0xff] }
 0xdf1   : > { %v3447_v22 = vmul.f32 %v5363_v8, %v3445_v27  ;;  %v3792_v8 = vld [vmem:[%s6331_s12 + $0xf8] sm:$0xff] }
 0xdf2   : > { %v5371_v28 = vpop.eup %5370  ;;  %3805 = vmatprep.subr.mxu1 %v3792_v8  ;;  %v3780_v27 = vld [vmem:[%s6331_s12 + $0x98] sm:$0xff]  ;;  %v3906_v8 = vld [vmem:[%s6333_s2 + $0xa0] sm:$0xff] }
 0xdf3   : > { %v3442_v29 = vmul.f32 %v5371_v28, %v3438_v21  ;;  %5145 = vmatmul.mubr.msk.f32.vlgmr.msra.gmra.mxu0 %vm3082_vm4, %v3447_v22  ;;  %v3779_v22 = vld [vmem:[%s6331_s12 + $0x90] sm:$0xff] }
 0xdf4   : > { %5155 = vmatpush3.msra.mxu0 %v3636_v38  ;;  %v3771_v38 = vld [vmem:[%s6331_s12 + $0x50] sm:$0xff] }
 0xdf5   : > { %v3444_v30 = vsub.f32 2.0, %v3442_v29  ;;  %5156 = vmatprep.subr.mxu0 %v3635_v39  ;;  %v3777_v29 = vld [vmem:[%s6331_s12 + $0x80] sm:$0xff] }
 0xdf6   : > { %5157 = vmatpush3.msra.mxu0 %v3635_v39  ;;  %v3770_v39 = vld [vmem:[%s6331_s12 + $0x48] sm:$0xff] }
 0xdf7   : > { %v3446_v31 = vmul.f32 %v5371_v28, %v3444_v30  ;;  %5158 = vmatprep.subr.mxu0 %v3634_v40  ;;  %v3778_v28 = vld [vmem:[%s6331_s12 + $0x88] sm:$0xff]  ;;  %v3776_v30 = vld [vmem:[%s6331_s12 + $0x78] sm:$0xff] }
 0xdf8   : > { %5159 = vmatpush3.msra.mxu0 %v3634_v40  ;;  %v3769_v40 = vld [vmem:[%s6331_s12 + $0x40] sm:$0xff] }
 0xdf9   : > { %v3448_v32 = vmul.f32 %v5365_v10, %v3446_v31  ;;  %5160 = vmatprep.subr.mxu0 %v3633_v41  ;;  %v3790_v10 = vld [vmem:[%s6331_s12 + $0xe8] sm:$0xff]  ;;  %v3775_v31 = vld [vmem:[%s6331_s12 + $0x70] sm:$0xff] }
 0xdfa   : > { %5161 = vmatpush3.msra.mxu0 %v3633_v41  ;;  %v3768_v41 = vld [vmem:[%s6331_s12 + $0x38] sm:$0xff] }
 0xdfb   : > { %5152 = vmatmul.mubr.msk.f32.vlgmr.msra.gmra.mxu1 %vm3082_vm4, %v3448_v32  ;;  %5162 = vmatprep.subr.mxu0 %v3632_v42  ;;  %v3774_v32 = vld [vmem:[%s6331_s12 + $0x68] sm:$0xff] }
 0xdfc   : > { %3869 = vmatprep.mubr.f32.mxu1 %v5816_v36  ;;  %5163 = vmatpush3.msra.mxu0 %v3632_v42  ;;  %v3767_v42 = vld [vmem:[%s6331_s12 + $0x30] sm:$0xff] }
 0xdfd   : > { %5164 = vmatprep.subr.mxu0 %v3631_v43  ;;  %3806 = vmatpush1.msra.mxu1 %v3791_v9  ;;  %v3890_v9 = vld [vmem:[%s6333_s2 + $0x20] sm:$0xff] }
 0xdfe   : > { %5165 = vmatpush3.msra.mxu0 %v3631_v43  ;;  %3807 = vmatprep.subr.mxu1 %v3790_v10  ;;  %v3766_v43 = vld [vmem:[%s6331_s12 + $0x28] sm:$0xff] }
 0xdff   : > { %5166 = vmatprep.subr.mxu0 %v3630_v45  ;;  %3808 = vmatpush1.msra.mxu1 %v3789_v11 }
 0xe00   : > { %5167 = vmatpush3.msra.mxu0 %v3630_v45  ;;  %3809 = vmatprep.subr.mxu1 %v3788_v12  ;;  %v3765_v45 = vld [vmem:[%s6331_s12 + $0x20] sm:$0xff] }
 0xe01   : > { %5168 = vmatprep.subr.mxu0 %v3629_v47  ;;  %3810 = vmatpush1.msra.mxu1 %v3787_v13 }
 0xe02   : > { %5169 = vmatpush3.msra.mxu0 %v3629_v47  ;;  %3811 = vmatprep.subr.mxu1 %v3786_v14  ;;  %v3764_v47 = vld [vmem:[%s6331_s12 + $0x18] sm:$0xff] }
 0xe03   : > { %5170 = vmatprep.subr.mxu0 %v3628_v48  ;;  %3812 = vmatpush1.msra.mxu1 %v3785_v15 }
 0xe04   : > { %5171 = vmatpush3.msra.mxu0 %v3628_v48  ;;  %3813 = vmatprep.subr.mxu1 %v3784_v20  ;;  %v3763_v48 = vld [vmem:[%s6331_s12 + $0x10] sm:$0xff] }
 0xe05   : > { %5172 = vmatprep.subr.mxu0 %v3627_v49  ;;  %3814 = vmatpush1.msra.mxu1 %v3783_v25 }
 0xe06   : > { %5173 = vmatpush3.msra.mxu0 %v3627_v49  ;;  %3815 = vmatprep.subr.mxu1 %v3782_v26  ;;  %v3762_v49 = vld [vmem:[%s6331_s12 + $0x8] sm:$0xff] }
 0xe07   : > { %5174 = vmatprep.subr.mxu0 %v3626_v50  ;;  %3816 = vmatpush1.msra.mxu1 %v3781_v24 }
 0xe08   : > { %5175 = vmatpush3.msra.mxu0 %v3626_v50  ;;  %3817 = vmatprep.subr.mxu1 %v3780_v27  ;;  %v3761_v50 = vld [vmem:[%s6331_s12] sm:$0xff]  ;;  %v3889_v27 = vld [vmem:[%s6333_s2 + $0x18] sm:$0xff] }
 0xe09   : > { %5176 = vmatprep.subr.mxu0 %v3625_v52  ;;  %3818 = vmatpush1.msra.mxu1 %v3779_v22  ;;  %v3904_v22 = vld [vmem:[%s6333_s2 + $0x90] sm:$0xff] }
 0xe0a   : > { %5177 = vmatpush3.msra.mxu0 %v3625_v52  ;;  %3819 = vmatprep.subr.mxu1 %v3778_v28  ;;  %v3917_v52 = vld [vmem:[%s6333_s2 + $0xf8] sm:$0xff]  ;;  %v3888_v28 = vld [vmem:[%s6333_s2 + $0x10] sm:$0xff] }
 0xe0b   : > { %5178 = vmatprep.subr.mxu0 %v3624_v53  ;;  %3820 = vmatpush1.msra.mxu1 %v3777_v29  ;;  %v3903_v29 = vld [vmem:[%s6333_s2 + $0x88] sm:$0xff] }
 0xe0c   : > { %5179 = vmatpush3.msra.mxu0 %v3624_v53  ;;  %3821 = vmatprep.subr.mxu1 %v3776_v30  ;;  %v3901_v53 = vld [vmem:[%s6333_s2 + $0x78] sm:$0xff]  ;;  %v3902_v30 = vld [vmem:[%s6333_s2 + $0x80] sm:$0xff] }
 0xe0d   : > { %5180 = vmatprep.subr.mxu0 %v3623_v46  ;;  %3822 = vmatpush1.msra.mxu1 %v3775_v31  ;;  %v3886_v31 = vld [vmem:[%s6333_s2] sm:$0xff] }
 0xe0e   : > { %5181 = vmatpush3.msra.mxu0 %v3623_v46  ;;  %3823 = vmatprep.subr.mxu1 %v3774_v32  ;;  %v3916_v46 = vld [vmem:[%s6333_s2 + $0xf0] sm:$0xff]  ;;  %v3793_v32 = vld [vmem:[%s6300_s1] sm:$0x3] }
 0xe0f   : > { %5182 = vmatprep.subr.mxu0 %v3622_v54 }
 0xe10   : > { %5183 = vmatpush3.msra.mxu0 %v3622_v54  ;;  %v3900_v54 = vld [vmem:[%s6333_s2 + $0x70] sm:$0xff] }
 0xe11   : > { %5184 = vmatprep.subr.mxu0 %v3621_v56 }
 0xe12   : > { %5185 = vmatpush3.msra.mxu0 %v3621_v56  ;;  %v3915_v56 = vld [vmem:[%s6333_s2 + $0xe8] sm:$0xff] }
 0xe13   : > { %4769 = vmatprep.subr.mxu0 %v3917_v52 }
 0xe23   : > { %v3180_v34 = vpop.f32.mrf.mxu0 }
 0xe25   : > { %v5118_v37 = vpop.f32.mrf.mxu0 }
 0xe26   : > { %v3772_v37 = vld [vmem:[%s6331_s12 + $0x58] sm:$0xff] }
 0xeb3   : > { %v3526_v57 = vpop.f32.mrf.mxu0 }
 0xeb5   : > { %v5146_v58 = vpop.f32.mrf.mxu0 }
 0xeb6   : > { %v3914_v58 = vld [vmem:[%s6333_s2 + $0xe0] sm:$0xff] }
 0xebb   : > { %v3607_v33 = vpop.f32.mrf.mxu1 }
 0xebc   : > { %v5331_v35 = vpack.i.bf16 %v3607_v33, %v3526_v57  ;;  %v3899_v57 = vld [vmem:[%s6333_s2 + $0x68] sm:$0xff]  ;;  %v3898_v33 = vld [vmem:[%s6333_s2 + $0x60] sm:$0xff] }
 0xebd   : > { %v5153_v59 = vpop.f32.mrf.mxu1 }
 0xebe   : > { %5332 = vrot.lane.b32.xlu1 %v5331_v35, %s5818_s8  ;;  %v3913_v35 = vld [vmem:[%s6333_s2 + $0xd8] sm:$0xff] }
 0xebf   : > { %v3897_v59 = vld [vmem:[%s6333_s2 + $0x58] sm:$0xff] }
 0xf30   : > { %v5333_v60 = vpop.permute.xlu1 %5332 }
 0xf31   : > { %v5335_v61 = vunpack.i.h.bf16 %v5333_v60  ;;  %v5334_v62 = vunpack.i.l.bf16 %v5333_v60  ;;  %v3912_v60 = vld [vmem:[%s6333_s2 + $0xd0] sm:$0xff] }
 0xf33   : > { %v3619_v63 = vsel %vm1789_vm1, %v3180_v34, %v5334_v62  ;;  %v3620_v1 = vsel %vm1789_vm1, %v6690_v55, %v5335_v61  ;;  %v3773_v34 = vld [vmem:[%s6331_s12 + $0x60] sm:$0xff]  ;;  %v3896_v61 = vld [vmem:[%s6333_s2 + $0x50] sm:$0xff]  ;;  %v3911_v62 = vld [vmem:[%s6333_s2 + $0xc8] sm:$0xff] }
 0xf34   : > { %5186 = vmatprep.mubr.f32.mxu0 %v3619_v63  ;;  %3824 = vmatpush1.msra.mxu1 %v3773_v34  ;;  %v3895_v63 = vld [vmem:[%s6333_s2 + $0x48] sm:$0xff]  ;;  %v3801_v34 = vsub.s32 1, %v6429_v0 }
 0xf35   : > { %5187 = vmatmul.mubr.f32.vlgmr.msra.gmra.mxu0 %v3620_v1  ;;  %3825 = vmatprep.subr.mxu1 %v3772_v37  ;;  %v3910_v1 = vld [vmem:[%s6333_s2 + $0xc0] sm:$0xff] }
 0xf36   : > { %3826 = vmatpush1.msra.mxu1 %v3771_v38  ;;  %4770 = vmatpush3.msra.mxu0 %v3901_v53  ;;  %v3802_v38 = vrot.slane %v3793_v32, %v3801_v34 }
 0xf37   : > { %3827 = vmatprep.subr.mxu1 %v3770_v39  ;;  %4771 = vmatprep.subr.mxu0 %v3916_v46  ;;  %v4563_v46 = vld [vmem:[%s1468_s22] ss:$0 sm:$0xff] }
 0xf38   : > { %3828 = vmatpush1.msra.mxu1 %v3769_v40  ;;  %4772 = vmatpush3.msra.mxu0 %v3900_v54 }
 0xf39   : > { %3829 = vmatprep.subr.mxu1 %v3768_v41  ;;  %4773 = vmatprep.subr.mxu0 %v3915_v56 }
 0xf3a   : > { %3830 = vmatpush1.msra.mxu1 %v3767_v42  ;;  %4774 = vmatpush3.msra.mxu0 %v3899_v57 }
 0xf3b   : > { %3831 = vmatprep.subr.mxu1 %v3766_v43  ;;  %4775 = vmatprep.subr.mxu0 %v3914_v58 }
 0xf3c   : > { %3832 = vmatpush1.msra.mxu1 %v3765_v45  ;;  %4776 = vmatpush3.msra.mxu0 %v3898_v33 }
 0xf3d   : > { %3833 = vmatprep.subr.mxu1 %v3764_v47  ;;  %4777 = vmatprep.subr.mxu0 %v3913_v35 }
 0xf3e   : > { %3834 = vmatpush1.msra.mxu1 %v3763_v48  ;;  %4778 = vmatpush3.msra.mxu0 %v3897_v59 }
 0xf3f   : > { %3835 = vmatprep.subr.mxu1 %v3762_v49  ;;  %4779 = vmatprep.subr.mxu0 %v3912_v60 }
 0xf40   : > { %3836 = vmatpush1.msra.mxu1 %v3761_v50  ;;  %4780 = vmatpush3.msra.mxu0 %v3896_v61 }
 0xf41   : > { %4781 = vmatprep.subr.mxu0 %v3911_v62 }
 0xf42   : > { %4782 = vmatpush3.msra.mxu0 %v3895_v63 }
 0xf43   : > { %4783 = vmatprep.subr.mxu0 %v3910_v1 }
 0xff5   : > { %v5188_v3 = vpop.f32.mrf.mxu0 }
 0xff6   : > { %v3716_v4 = vadd.f32 %v5188_v3, %v4560_v2  ;;  %v3909_v3 = vld [vmem:[%s6333_s2 + $0xb8] sm:$0xff] }
 0xff7   : > { %v3710_v5 = vpop.f32.mrf.mxu0 }
 0xff8   : > { %v3711_v6 = vadd.f32 %v4560_v2, %v3710_v5  ;;  %v3720_v7 = vadd.f32 %v3716_v4, %v6597_v44  ;;  %v3894_v2 = vld [vmem:[%s6333_s2 + $0x40] sm:$0xff]  ;;  %v3893_v4 = vld [vmem:[%s6333_s2 + $0x38] sm:$0xff]  ;;  %v3908_v5 = vld [vmem:[%s6333_s2 + $0xb0] sm:$0xff] }
 0xff9   : > { %4784 = vmatpush3.msra.mxu0 %v3894_v2 }
 0xffa   : > { %3723 = vadd.xlane.f32.xlu1 %v3720_v7  ;;  %v3719_v55 = vadd.f32 %v3711_v6, %v6594_v51  ;;  %4785 = vmatprep.subr.mxu0 %v3909_v3  ;;  %v3892_v6 = vld [vmem:[%s6333_s2 + $0x30] sm:$0xff] }
 0xffb   : > { %4786 = vmatpush3.msra.mxu0 %v3893_v4 }
 0xffc   : > { %3721 = vadd.xlane.f32.xlu0 %v3719_v55  ;;  %4787 = vmatprep.subr.mxu0 %v3908_v5 }
 0xffd   : > { %4788 = vmatpush3.msra.mxu0 %v3892_v6 }
0x1083   : > { %v3724_v51 = vpop.xlane.xlu1 %3723 }
0x1084   : > { %v3726_v16 = vmul.f32 0.0078125, %v3724_v51 }
0x1085   : > { %v3722_v44 = vpop.xlane.xlu0 %3721 }
0x1086   : > { %v3725_v17 = vmul.f32 0.0078125, %v3722_v44  ;;  %v6748_v19 = vsub.f32 %v3720_v7, %v3726_v16  ;;  %v3907_v7 = vld [vmem:[%s6333_s2 + $0xa8] sm:$0xff]  ;;  %v4561_v44 = vld [vmem:[%s6993_s20] ss:$0 sm:$0xff] }
0x1087   : > { %4789 = vmatprep.subr.mxu0 %v3907_v7 }
0x1088   : > { %v6746_v18 = vsub.f32 %v3719_v55, %v3725_v17  ;;  %v3730_v23 = vmul.f32 %v6748_v19, %v6748_v19  ;;  %v3891_v55 = vld [vmem:[%s6333_s2 + $0x28] sm:$0xff]  ;;  %v4562_v17 = vld [vmem:[%s1461_s18] ss:$0 sm:$0xff] }
0x1089   : > { %4790 = vmatpush3.msra.mxu0 %v3891_v55 }
0x108a   : > { %v3729_v21 = vmul.f32 %v6746_v18, %v6746_v18  ;;  %4791 = vmatprep.subr.mxu0 %v3906_v8 }
0x108b   : > { %4792 = vmatpush3.msra.mxu0 %v3890_v9 }
0x108c   : > { %3731 = vadd.xlane.f32.xlu0 %v3729_v21 }
0x1090   : > { %3733 = vadd.xlane.f32.xlu0 %v3730_v23 }
0x1115   : > { %v3732_v10 = vpop.xlane.xlu0 %3731 }
0x1116   : > { %v3735_v11 = vmul.f32 0.0078125, %v3732_v10 }
0x1118   : > { %v3737_v12 = vadd.f32 1e-05, %v3735_v11 }
0x1119   : > { %v3734_v13 = vpop.xlane.xlu0 %3733 }
0x111a   : > { %5372 = vrsqrt.f32 %v3737_v12  ;;  %v3736_v14 = vmul.f32 0.0078125, %v3734_v13  ;;  %v4564_v13 = vld [vmem:[%s1471_s19] ss:$0 sm:$0xff] }
0x111c   : > { %v3738_v15 = vadd.f32 1e-05, %v3736_v14 }
0x111e   : > { %5374 = vrsqrt.f32 %v3738_v15  ;;  %v4565_v15 = vld [vmem:[%s1474_s14] ss:$0 sm:$0xff] }
0x1127   : > { %v5373_v51 = vpop.eup %5372 }
0x1128   : > { %v3741_v16 = vmul.f32 %v5373_v51, %v6746_v18  ;;  %v3905_v18 = vld [vmem:[%s6333_s2 + $0x98] sm:$0xff] }
0x1129   : > { %4793 = vmatprep.subr.mxu0 %v3905_v18 }
0x112a   : > { %v3750_v21 = vmul.f32 %v4561_v44, %v3741_v16  ;;  %4794 = vmatpush3.msra.mxu0 %v3889_v27 }
0x112b   : > { %v5375_v23 = vpop.eup %5374  ;;  %4795 = vmatprep.subr.mxu0 %v3904_v22 }
0x112c   : > { %v3759_v20 = vadd.f32 %v4562_v17, %v3750_v21  ;;  %v3742_v25 = vmul.f32 %v5375_v23, %v6748_v19  ;;  %4796 = vmatpush3.msra.mxu0 %v3888_v28  ;;  %v3887_v19 = vld [vmem:[%s6333_s2 + $0x8] sm:$0xff] }
0x112d   : > { %4797 = vmatprep.subr.mxu0 %v3903_v29 }
0x112e   : > { %3870 = vmatmul.mubr.f32.vlgmr.msra.gmra.mxu1 %v3759_v20  ;;  %v3751_v26 = vmul.f32 %v4561_v44, %v3742_v25  ;;  %4798 = vmatpush3.msra.mxu0 %v3887_v19 }
0x112f   : > { %3875 = vmatprep.mubr.f32.mxu1 %v5816_v36  ;;  %4799 = vmatprep.subr.mxu0 %v3902_v30  ;;  %v3797_v36 = vsub.s32 0, %v6429_v0 }
0x1130   : > { %v3760_v24 = vadd.f32 %v4562_v17, %v3751_v26  ;;  %4800 = vmatpush3.msra.mxu0 %v3886_v31 }
0x1131   : > { %v3798_v37 = vrot.slane %v3793_v32, %v3797_v36 }
0x1132   : > { %3876 = vmatmul.mubr.f32.gmra.mxu1 %v3760_v24 }
0x11ee   : > { %v3871_v39 = vpop.f32.mrf.mxu1 }
0x11ef   : > { %v3872_v40 = vadd.f32 %v3871_v39, %v3798_v37 }
0x11f0   : > { %v3873_v41 = vpop.f32.mrf.mxu1 }
0x11f1   : > { %v3874_v42 = vadd.f32 %v3873_v41, %v3802_v38  ;;  %v3882_v47 = vmax.f32 %v3872_v40, 0.0 }
0x11f2   : > { %v3877_v43 = vpop.f32.mrf.mxu1 }
0x11f3   : > { %v3883_v45 = vmax.f32 %v3874_v42, 0.0  ;;  %v3878_v48 = vadd.f32 %v3877_v43, %v3798_v37 }
0x11f4   : > { %v3879_v49 = vpop.f32.mrf.mxu1 }
0x11f5   : > { %v3880_v50 = vadd.f32 %v3879_v49, %v3802_v38  ;;  %3989 = vmatprep.mubr.f32.mxu0 %v3883_v45  ;;  %v3884_v53 = vmax.f32 %v3878_v48, 0.0 }
0x11f6   : > { %3990 = vmatmul.mubr.f32.vlgmr.msra.gmra.mxu0 %v3882_v47 }
0x11f7   : > { %v3885_v52 = vmax.f32 %v3880_v50, 0.0 }
0x11f9   : > { %3994 = vmatprep.mubr.f32.mxu0 %v3885_v52 }
0x11fa   : > { %3995 = vmatmul.mubr.f32.gmra.mxu0 %v3884_v53 }
0x12b6   : > { %v4801_v0 = vpop.f32.mrf.mxu0 }
0x12b8   : > { %v4802_v54 = vpop.f32.mrf.mxu0 }
0x12b9   : > { %v4803_v56 = vadd.f32 %v4802_v54, %v4801_v0 }
0x12ba   : > { %v4804_v57 = vpop.f32.mrf.mxu0 }
0x12bb   : > { %v3992_v58 = vadd.f32 %v4803_v56, %v4563_v46 }
0x12bc   : > { %v4805_v33 = vpop.f32.mrf.mxu0 }
0x12bd   : > { %v4806_v35 = vadd.f32 %v4805_v33, %v4804_v57  ;;  %v4000_v59 = vadd.f32 %v3992_v58, %v3759_v20 }
0x12bf   : > { %v3997_v60 = vadd.f32 %v4806_v35, %v4563_v46  ;;  %4002 = vadd.xlane.f32.xlu0 %v4000_v59 }
0x12c1   : > { %v4001_v61 = vadd.f32 %v3997_v60, %v3760_v24 }
0x12c3   : > { %4004 = vadd.xlane.f32.xlu1 %v4001_v61 }
0x1348   : > { %v4003_v62 = vpop.xlane.xlu0 %4002 }
0x1349   : > { %v4006_v63 = vmul.f32 0.0078125, %v4003_v62 }
0x134b   : > { %v4008_v1 = vsub.f32 %v4000_v59, %v4006_v63 }
0x134c   : > { %v4005_v2 = vpop.xlane.xlu1 %4004 }
0x134d   : > { %v4007_v3 = vmul.f32 0.0078125, %v4005_v2  ;;  %v4010_v4 = vmul.f32 %v4008_v1, %v4008_v1 }
0x134f   : > { %v4009_v5 = vsub.f32 %v4001_v61, %v4007_v3  ;;  %4012 = vadd.xlane.f32.xlu0 %v4010_v4 }
0x1351   : > { %v4011_v6 = vmul.f32 %v4009_v5, %v4009_v5 }
0x1353   : > { %4014 = vadd.xlane.f32.xlu1 %v4011_v6 }
0x13d8   : > { %v4013_v7 = vpop.xlane.xlu0 %4012 }
0x13d9   : > { %v4016_v55 = vmul.f32 0.0078125, %v4013_v7 }
0x13db   : > { %v4018_v8 = vadd.f32 1e-05, %v4016_v55 }
0x13dc   : > { %v4015_v9 = vpop.xlane.xlu1 %4014 }
0x13dd   : > { %5376 = vrsqrt.f32 %v4018_v8  ;;  %v4017_v10 = vmul.f32 0.0078125, %v4015_v9 }
0x13df   : > { %v4019_v11 = vadd.f32 1e-05, %v4017_v10 }
0x13e1   : > { %5378 = vrsqrt.f32 %v4019_v11 }
0x13ea   : > { %v5377_v12 = vpop.eup %5376 }
0x13eb   : > { %v4022_v14 = vmul.f32 %v5377_v12, %v4008_v1 }
0x13ed   : > { %v4031_v51 = vmul.f32 %v4564_v13, %v4022_v14 }
0x13ee   : > { %v5379_v44 = vpop.eup %5378 }
0x13ef   : > { %v4040_v16 = vadd.f32 %v4565_v15, %v4031_v51  ;;  %v4023_v17 = vmul.f32 %v5379_v44, %v4009_v5 }
0x13f1   : > { %4042 = vst [vmem:[#allocation2] sm:$0xff] %v4040_v16  ;;  %v4032_v21 = vmul.f32 %v4564_v13, %v4023_v17  ;;  %4047 = sbr.rel (%p4566_p10) target bundleno = 5111 (0x13f7), region = 188 }
0x13f3   : > { %v4041_v23 = vadd.f32 %v4565_v15, %v4032_v21 }
0x13f5   : > { %4043 = vst [vmem:[#allocation2 + $0x8] sm:$0xff] %v4041_v23 }
0x13f6   : > { %4048 = vst [vmem:[#allocation18] sm:$0xff] %v4040_v16  ;;  %4049 = vst [vmem:[#allocation18 + $0x8] sm:$0xff] %v4041_v23 }
0x13f7 PF: > { %p5264_p12 = scmp.eq.s32.totalorder %s5996_s10, 1  ;;  %s5819_s19 = smov [#allocation18]  }
0x13f8   : > { %s4059_s30 = sshll.u32 %s5819_s19, 4  ;;  %s4060_s30 = int_to_ptr.vmem [resolvable:$true] %s4059_s30 }
0x13f9   : > { %s5712_s14 = scalar_lea.vmem %s4060_s30, 256  ;;  %p5719_p0 = scmp.lt.s32.totalorder %s4060_s30, %s4060_s30 }
0x13fa   : > { %p5713_p1 = scmp.ne.s32.totalorder %s4060_s30, %s5712_s14  ;;  %p5720_p3 = scmp.lt.s32.totalorder %s5712_s14, %s5712_s14 }
0x13fc   : > { %p5714_p2 = pnand %p5713_p1, %p5264_p12  ;;  %p5721_p13 = por %p5720_p3, %p5719_p0 }
0x13fe   : > { %p5715_p11 = pneg %p5714_p2 }
0x1400   : > { %p5722_p4 = pnand %p5721_p13, %p5715_p11 }
0x1402   : > { %5725 = shalt.err (!%p5722_p4)
}
0x1403   : > { %s5820_s6 = smov 128   ;;  %s5821_s11 = smov 8  }
0x1404   : > { %s6999_s29 = sld [smem:[#allocation54_spill]] }
0x140a   : > { %5218 = dma.vmem_to_hbm [thread:$0]  (%p5264_p12), %s4060_s30, 256, %s6999_s29, [#allocation5], %s5820_s6, %s5820_s6, %s5821_s11  }
0x140b   : > { %5773 = dma.done.wait (%p5264_p12), [#allocation5], 256  }
0x140c   : > { %5775 = vsyncadd (%p5264_p12), [#allocation5], 4294967040 }
0x140d PF: > { %s7000_s7 = sld [smem:[#allocation24_spill]]  ;;  %s7003_s8 = smov %s5782_s5 }
0x140e   : > { %s7001_s12 = sld [smem:[#allocation26_spill]]  ;;  %s7004_s5 = smov %s5786_s9 }
0x140f   : > { %s7002_s16 = sld [smem:[#allocation25_spill]]  ;;  %s7006_s30 = smov %s5794_s3 }
0x1413   : > { %s41_s6 = sadd.s32 1, %s7000_s7  }
0x1414   : > { %p38_p6 = scmp.ge.s32.totalorder %s41_s6, 4   ;;  %s7005_s9 = smov %s7001_s12 }
0x1415   : > { %s7007_s3 = smov %s7002_s16 }
0x1416   :  { %40 = sbr.rel (!%p38_p6) target bundleno = 34 (0x22), region = 334 }
0x141b   :  { %4075 = vsyncpa [#allocation4], 1 }
0x141c   :  { %4077 = vsyncpa [#allocation4 + $0x1], 1 }
0x141d   :  { %4078 = vsyncpa [#allocation7], 1 }
0x141e   :  { %4079 = vsyncpa [#allocation5], 1 }
0x141f   :  { %4081 = vsyncpa [#allocation5 + $0x1], 1 }

</bundles_post_ra>
